<compile_context>
chip_gen: v6e
topology: v6e:2x2x1
jax: 0.10.0
libtpu: 0.0.40
codegen_flags: <defaults>
</compile_context>

<pallas_src>
import functools

import jax
import jax.numpy as jnp
from jax.experimental import pallas as pl
from jax.experimental.pallas import tpu as pltpu

# ---- synthetic scaled-down BEATs config (real BEATs: 128 mels, patch 16, D=768, 12 heads/layers) ----
MEL_BINS = 32
PATCH = 8
EMBED = 32
HEADS = 4
FFN = 64
LAYERS = 2
HEAD_H = 100
FBANK_MEAN, FBANK_STD = 15.41663, 6.55582  # BEATs dataset stats used in extract_features


# ----------------------------- kernel helpers ----------------------------------------------------
def _ln(x, g, b, eps=1e-5):
    mu = jnp.mean(x, axis=-1, keepdims=True)
    var = jnp.mean(jnp.square(x - mu), axis=-1, keepdims=True)
    return (x - mu) * jax.lax.rsqrt(var + eps) * g + b


def _mm(a, b):
    # bf16 MXU inputs, f32 accumulation.
    return jnp.dot(a.astype(jnp.bfloat16), b.astype(jnp.bfloat16),
                   preferred_element_type=jnp.float32)


# ----------------------------- fused kernel ------------------------------------------------------
def fused_kernel(n_seq, seq_len,
                 p_ref, pw_ref, pb_ref, ln0g_ref, ln0b_ref,
                 wqkv_ref, bqkv_ref, wo_ref, bo_ref, ln1g_ref, ln1b_ref,
                 w1_ref, b1_ref, w2_ref, b2_ref, ln2g_ref, ln2b_ref,
                 hw1_ref, hb1_ref, hw2_ref, hb2_ref, hw3_ref, hb3_ref,
                 o_ref):
    """Whole forward pass for both clips (stacked on batch): patches -> similarity logits."""
    D = EMBED
    dh = D // HEADS
    scale = 1.0 / jnp.sqrt(jnp.float32(dh))

    # -- patch embed (Conv2d stride==kernel as matmul; fbank normalization pre-folded into pw/pb) --
    x = _mm(p_ref[...], pw_ref[...]) + pb_ref[...]            # [N, D], N = n_seq * seq_len
    x = _ln(x, ln0g_ref[...], ln0b_ref[...])

    # -- post-LN transformer encoder layers (static loop over stacked layer weights) --------------
    for l in range(LAYERS):
        qkv = _mm(x, wqkv_ref[l]) + bqkv_ref[l]               # single fused QKV matmul -> [N, 3D]
        q3 = (qkv[:, :D] * scale).reshape(n_seq, seq_len, D)
        k3 = qkv[:, D:2 * D].reshape(n_seq, seq_len, D)
        v3 = qkv[:, 2 * D:].reshape(n_seq, seq_len, D)

        attn_heads = []
        for h in range(HEADS):                                # static per-head attention core
            sl = slice(h * dh, (h + 1) * dh)
            s = jnp.einsum('bqd,bkd->bqk', q3[..., sl], k3[..., sl],
                           preferred_element_type=jnp.float32)
            s = s - jnp.max(s, axis=-1, keepdims=True)
            p = jnp.exp(s)
            p = p * pl.reciprocal(jnp.sum(p, axis=-1, keepdims=True), approx=True)
            attn_heads.append(jnp.einsum('bqk,bkd->bqd', p, v3[..., sl],
                                         preferred_element_type=jnp.float32))
        a = jnp.concatenate(attn_heads, axis=-1).reshape(n_seq * seq_len, D)
        attn = _mm(a, wo_ref[l]) + bo_ref[l]                  # single full-width output projection

        x = _ln(x + attn, ln1g_ref[l], ln1b_ref[l])

        h1 = _mm(x, w1_ref[l]) + b1_ref[l]
        h1 = jax.nn.gelu(h1, approximate=True)                # tanh-approx GELU (EUP-friendly)
        h2 = _mm(h1, w2_ref[l]) + b2_ref[l]
        x = _ln(x + h2, ln2g_ref[l], ln2b_ref[l])

    # -- mean-pool over time per sequence; first half of sequences = clip0, second half = clip1 ---
    feats = jnp.mean(x.reshape(n_seq, seq_len, D), axis=1)    # [n_seq, D]
    half = n_seq // 2
    f0 = feats[:half]
    f1 = feats[half:]

    # -- MLP head: concat([f0, f1], -1) @ W1 == f0 @ W1[:D] + f1 @ W1[D:] --------------------------
    hw1 = hw1_ref[...]
    h = _mm(f0, hw1[:D]) + _mm(f1, hw1[D:]) + hb1_ref[...]
    h = jnp.maximum(h, 0.0)
    h = jnp.maximum(_mm(h, hw2_ref[...]) + hb2_ref[...], 0.0)
    o_ref[...] = _mm(h, hw3_ref[...]) + hb3_ref[...]          # [B, 1]


# ----------------------------- pallas_call wrapper ------------------------------------------------
def _full_spec(shape):
    nd = len(shape)
    return pl.BlockSpec(shape, lambda *_, _nd=nd: (0,) * _nd)


# ----------------------------- params -------------------------------------------------------------
def init_params(key):
    ks = iter(jax.random.split(key, 16))

    def nrm(shape, scale=0.02):
        return (scale * jax.random.normal(next(ks), shape)).astype(jnp.float32)

    zeros = lambda s: jnp.zeros(s, jnp.float32)
    ones = lambda s: jnp.ones(s, jnp.float32)
    L, D, F, H = LAYERS, EMBED, FFN, HEAD_H

    return {
        # flattened Conv2d(1, EMBED, PATCH, PATCH) weight, (kh, kw) row-major
        'patch_w': nrm((PATCH * PATCH, D)), 'patch_b': zeros((1, D)),
        'ln0_g': ones((1, D)), 'ln0_b': zeros((1, D)),
        # transformer layer weights stacked on a leading layer axis; Wq|Wk|Wv fused into [D, 3D]
        'wqkv': nrm((L, D, 3 * D)), 'bqkv': zeros((L, 1, 3 * D)),
        'wo': nrm((L, D, D)), 'bo': zeros((L, 1, D)),
        'ln1g': ones((L, 1, D)), 'ln1b': zeros((L, 1, D)),
        'w1': nrm((L, D, F)), 'b1': zeros((L, 1, F)),
        'w2': nrm((L, F, D)), 'b2': zeros((L, 1, D)),
        'ln2g': ones((L, 1, D)), 'ln2b': zeros((L, 1, D)),
        # MLP similarity head
        'head_w1': nrm((2 * D, H), 0.1), 'head_b1': zeros((1, H)),
        'head_w2': nrm((H, H), 0.1), 'head_b2': zeros((1, H)),
        'head_w3': nrm((H, 1), 0.1), 'head_b3': zeros((1, 1)),
    }


# ----------------------------- forward (glue + single fused kernel) -------------------------------
def forward(fbank_0, fbank_1, params):
    """Similarity of two audio clips: both clips embedded + pooled + MLP head in one pallas_call."""
    B, T, F = fbank_0.shape
    nt, nf = T // PATCH, F // PATCH
    seq_len = nt * nf
    n_seq = 2 * B

    # Both clips stacked on the batch axis -> one pass through the encoder.
    fb = jnp.concatenate([fbank_0, fbank_1], axis=0)          # [2B, T, F]
    # Non-overlapping PxP patches, flattened (kh, kw) row-major; sequence order = time-major then
    # freq, matching torch's conv output `.reshape(B, D, -1).transpose(1, 2)`.
    patches = (fb.reshape(n_seq, nt, PATCH, nf, PATCH)
                 .transpose(0, 1, 3, 2, 4)
                 .reshape(n_seq * seq_len, PATCH * PATCH))

    # Fold BEATs fbank normalization (x - mean) / (2*std) into the patch-embed weights (exact):
    #   w' = w / (2*std),  b' = b - (mean / (2*std)) * colsum(w)
    inv = 1.0 / (2.0 * FBANK_STD)
    pw = params['patch_w'] * inv
    pb = params['patch_b'] - (FBANK_MEAN * inv) * jnp.sum(params['patch_w'], axis=0, keepdims=True)

    inputs = [patches, pw, pb, params['ln0_g'], params['ln0_b'],
              params['wqkv'], params['bqkv'], params['wo'], params['bo'],
              params['ln1g'], params['ln1b'],
              params['w1'], params['b1'], params['w2'], params['b2'],
              params['ln2g'], params['ln2b'],
              params['head_w1'], params['head_b1'],
              params['head_w2'], params['head_b2'],
              params['head_w3'], params['head_b3']]

    out = pl.pallas_call(
        functools.partial(fused_kernel, n_seq, seq_len),
        grid=(1,),
        in_specs=[_full_spec(a.shape) for a in inputs],
        out_specs=_full_spec((B, 1)),
        out_shape=jax.ShapeDtypeStruct((B, 1), jnp.float32),
        compiler_params=pltpu.CompilerParams(dimension_semantics=("arbitrary",)),
    )(*inputs)
    return out[:, 0]  # .squeeze(-1)


# ----------------------------- demo ----------------------------------------------------------------
if __name__ == "__main__":
    key = jax.random.PRNGKey(0)
    kp, k0, k1 = jax.random.split(key, 3)
    params = init_params(kp)

    B, T_FRAMES = 2, 32
    # Precomputed log-mel fbank-style inputs (values near BEATs' dataset stats).
    fbank_0 = 15.0 + 6.0 * jax.random.normal(k0, (B, T_FRAMES, MEL_BINS), jnp.float32)
    fbank_1 = 15.0 + 6.0 * jax.random.normal(k1, (B, T_FRAMES, MEL_BINS), jnp.float32)

    similarity = jax.jit(forward)(fbank_0, fbank_1, params)
    jax.block_until_ready(similarity)
    assert similarity.shape == (B,) and similarity.dtype == jnp.float32
    print("KERNEL_OK")
</pallas_src>

<mosaic_0001>
module attributes {stable_mosaic.version = 11 : i64} {
  func.func @fused_kernel(%arg0: i32, %arg1: memref<64x64xf32, #tpu.memory_space<vmem>>, %arg2: memref<64x32xf32, #tpu.memory_space<vmem>>, %arg3: memref<1x32xf32, #tpu.memory_space<vmem>>, %arg4: memref<1x32xf32, #tpu.memory_space<vmem>>, %arg5: memref<1x32xf32, #tpu.memory_space<vmem>>, %arg6: memref<2x32x96xf32, #tpu.memory_space<vmem>>, %arg7: memref<2x1x96xf32, #tpu.memory_space<vmem>>, %arg8: memref<2x32x32xf32, #tpu.memory_space<vmem>>, %arg9: memref<2x1x32xf32, #tpu.memory_space<vmem>>, %arg10: memref<2x1x32xf32, #tpu.memory_space<vmem>>, %arg11: memref<2x1x32xf32, #tpu.memory_space<vmem>>, %arg12: memref<2x32x64xf32, #tpu.memory_space<vmem>>, %arg13: memref<2x1x64xf32, #tpu.memory_space<vmem>>, %arg14: memref<2x64x32xf32, #tpu.memory_space<vmem>>, %arg15: memref<2x1x32xf32, #tpu.memory_space<vmem>>, %arg16: memref<2x1x32xf32, #tpu.memory_space<vmem>>, %arg17: memref<2x1x32xf32, #tpu.memory_space<vmem>>, %arg18: memref<64x100xf32, #tpu.memory_space<vmem>>, %arg19: memref<1x100xf32, #tpu.memory_space<vmem>>, %arg20: memref<100x100xf32, #tpu.memory_space<vmem>>, %arg21: memref<1x100xf32, #tpu.memory_space<vmem>>, %arg22: memref<100x1xf32, #tpu.memory_space<vmem>>, %arg23: memref<1x1xf32, #tpu.memory_space<vmem>>, %arg24: memref<2x1xf32, #tpu.memory_space<vmem>>) attributes {dimension_semantics = [#tpu.dimension_semantics<arbitrary>], iteration_bounds = array<i64: 1>, scalar_prefetch = 0 : i64, scratch_operands = 0 : i64, tpu.core_type = #tpu.core_type<tc>, window_params = [{pipeline_mode = #tpu.pipeline_mode<synchronous>, transform_indices = @transform_0, window_bounds = array<i64: 64, 64>}, {pipeline_mode = #tpu.pipeline_mode<synchronous>, transform_indices = @transform_1, window_bounds = array<i64: 64, 32>}, {pipeline_mode = #tpu.pipeline_mode<synchronous>, transform_indices = @transform_2, window_bounds = array<i64: 1, 32>}, {pipeline_mode = #tpu.pipeline_mode<synchronous>, transform_indices = @transform_3, window_bounds = array<i64: 1, 32>}, {pipeline_mode = #tpu.pipeline_mode<synchronous>, transform_indices = @transform_4, window_bounds = array<i64: 1, 32>}, {pipeline_mode = #tpu.pipeline_mode<synchronous>, transform_indices = @transform_5, window_bounds = array<i64: 2, 32, 96>}, {pipeline_mode = #tpu.pipeline_mode<synchronous>, transform_indices = @transform_6, window_bounds = array<i64: 2, 1, 96>}, {pipeline_mode = #tpu.pipeline_mode<synchronous>, transform_indices = @transform_7, window_bounds = array<i64: 2, 32, 32>}, {pipeline_mode = #tpu.pipeline_mode<synchronous>, transform_indices = @transform_8, window_bounds = array<i64: 2, 1, 32>}, {pipeline_mode = #tpu.pipeline_mode<synchronous>, transform_indices = @transform_9, window_bounds = array<i64: 2, 1, 32>}, {pipeline_mode = #tpu.pipeline_mode<synchronous>, transform_indices = @transform_10, window_bounds = array<i64: 2, 1, 32>}, {pipeline_mode = #tpu.pipeline_mode<synchronous>, transform_indices = @transform_11, window_bounds = array<i64: 2, 32, 64>}, {pipeline_mode = #tpu.pipeline_mode<synchronous>, transform_indices = @transform_12, window_bounds = array<i64: 2, 1, 64>}, {pipeline_mode = #tpu.pipeline_mode<synchronous>, transform_indices = @transform_13, window_bounds = array<i64: 2, 64, 32>}, {pipeline_mode = #tpu.pipeline_mode<synchronous>, transform_indices = @transform_14, window_bounds = array<i64: 2, 1, 32>}, {pipeline_mode = #tpu.pipeline_mode<synchronous>, transform_indices = @transform_15, window_bounds = array<i64: 2, 1, 32>}, {pipeline_mode = #tpu.pipeline_mode<synchronous>, transform_indices = @transform_16, window_bounds = array<i64: 2, 1, 32>}, {pipeline_mode = #tpu.pipeline_mode<synchronous>, transform_indices = @transform_17, window_bounds = array<i64: 64, 100>}, {pipeline_mode = #tpu.pipeline_mode<synchronous>, transform_indices = @transform_18, window_bounds = array<i64: 1, 100>}, {pipeline_mode = #tpu.pipeline_mode<synchronous>, transform_indices = @transform_19, window_bounds = array<i64: 100, 100>}, {pipeline_mode = #tpu.pipeline_mode<synchronous>, transform_indices = @transform_20, window_bounds = array<i64: 1, 100>}, {pipeline_mode = #tpu.pipeline_mode<synchronous>, transform_indices = @transform_21, window_bounds = array<i64: 100, 1>}, {pipeline_mode = #tpu.pipeline_mode<synchronous>, transform_indices = @transform_22, window_bounds = array<i64: 1, 1>}, {pipeline_mode = #tpu.pipeline_mode<synchronous>, transform_indices = @transform_23, window_bounds = array<i64: 2, 1>}]} {
    %cst = arith.constant 8.000000e+00 : f32
    %0 = math.sqrt %cst : f32
    %cst_0 = arith.constant 1.000000e+00 : f32
    %1 = arith.divf %cst_0, %0 : f32
    %c0 = arith.constant 0 : index
    %c0_1 = arith.constant 0 : index
    %2 = vector.load %arg1[%c0, %c0_1] : memref<64x64xf32, #tpu.memory_space<vmem>>, vector<64x64xf32>
    %c0_2 = arith.constant 0 : index
    %c0_3 = arith.constant 0 : index
    %3 = vector.load %arg2[%c0_2, %c0_3] : memref<64x32xf32, #tpu.memory_space<vmem>>, vector<64x32xf32>
    %4 = arith.truncf %2 : vector<64x64xf32> to vector<64x64xbf16>
    %5 = arith.truncf %3 : vector<64x32xf32> to vector<64x32xbf16>
    %cst_4 = arith.constant dense<0.000000e+00> : vector<64x32xf32>
    %6 = tpu.matmul %4, %5, %cst_4 {dimension_numbers = #tpu.dot_dimension_numbers<[1], [0], [0], [1], [0, 0, 1, 1], [], []>} : vector<64x64xbf16>, vector<64x32xbf16>, vector<64x32xf32> -> vector<64x32xf32>
    %c0_5 = arith.constant 0 : index
    %c0_6 = arith.constant 0 : index
    %7 = vector.load %arg3[%c0_5, %c0_6] : memref<1x32xf32, #tpu.memory_space<vmem>>, vector<1x32xf32>
    %8 = vector.broadcast %7 : vector<1x32xf32> to vector<64x32xf32>
    %9 = arith.addf %6, %8 : vector<64x32xf32>
    %c0_7 = arith.constant 0 : index
    %c0_8 = arith.constant 0 : index
    %10 = vector.load %arg4[%c0_7, %c0_8] : memref<1x32xf32, #tpu.memory_space<vmem>>, vector<1x32xf32>
    %c0_9 = arith.constant 0 : index
    %c0_10 = arith.constant 0 : index
    %11 = vector.load %arg5[%c0_9, %c0_10] : memref<1x32xf32, #tpu.memory_space<vmem>>, vector<1x32xf32>
    %cst_11 = arith.constant dense<0.000000e+00> : vector<64xf32>
    %12 = vector.multi_reduction <add>, %9, %cst_11 [1] : vector<64x32xf32> to vector<64xf32>
    %13 = vector.shape_cast %12 : vector<64xf32> to vector<64x1xf32>
    %cst_12 = arith.constant 3.200000e+01 : f32
    %14 = vector.broadcast %cst_12 : f32 to vector<64x1xf32>
    %15 = arith.divf %13, %14 : vector<64x1xf32>
    %16 = vector.broadcast %15 : vector<64x1xf32> to vector<64x32xf32>
    %17 = arith.subf %9, %16 : vector<64x32xf32>
    %18 = arith.mulf %17, %17 : vector<64x32xf32>
    %cst_13 = arith.constant dense<0.000000e+00> : vector<64xf32>
    %19 = vector.multi_reduction <add>, %18, %cst_13 [1] : vector<64x32xf32> to vector<64xf32>
    %20 = vector.shape_cast %19 : vector<64xf32> to vector<64x1xf32>
    %cst_14 = arith.constant 3.200000e+01 : f32
    %21 = vector.broadcast %cst_14 : f32 to vector<64x1xf32>
    %22 = arith.divf %20, %21 : vector<64x1xf32>
    %23 = vector.broadcast %15 : vector<64x1xf32> to vector<64x32xf32>
    %24 = arith.subf %9, %23 : vector<64x32xf32>
    %cst_15 = arith.constant 9.99999974E-6 : f32
    %25 = vector.broadcast %cst_15 : f32 to vector<64x1xf32>
    %26 = arith.addf %22, %25 : vector<64x1xf32>
    %27 = math.rsqrt %26 : vector<64x1xf32>
    %28 = vector.broadcast %27 : vector<64x1xf32> to vector<64x32xf32>
    %29 = arith.mulf %24, %28 : vector<64x32xf32>
    %30 = vector.broadcast %10 : vector<1x32xf32> to vector<64x32xf32>
    %31 = arith.mulf %29, %30 : vector<64x32xf32>
    %32 = vector.broadcast %11 : vector<1x32xf32> to vector<64x32xf32>
    %33 = arith.addf %31, %32 : vector<64x32xf32>
    %c0_16 = arith.constant 0 : index
    %c0_17 = arith.constant 0 : index
    %c0_18 = arith.constant 0 : index
    %34 = vector.load %arg6[%c0_16, %c0_17, %c0_18] : memref<2x32x96xf32, #tpu.memory_space<vmem>>, vector<1x32x96xf32>
    %35 = vector.shape_cast %34 : vector<1x32x96xf32> to vector<32x96xf32>
    %36 = arith.truncf %33 : vector<64x32xf32> to vector<64x32xbf16>
    %37 = arith.truncf %35 : vector<32x96xf32> to vector<32x96xbf16>
    %cst_19 = arith.constant dense<0.000000e+00> : vector<64x96xf32>
    %38 = tpu.matmul %36, %37, %cst_19 {dimension_numbers = #tpu.dot_dimension_numbers<[1], [0], [0], [1], [0, 0, 1, 1], [], []>} : vector<64x32xbf16>, vector<32x96xbf16>, vector<64x96xf32> -> vector<64x96xf32>
    %c0_20 = arith.constant 0 : index
    %c0_21 = arith.constant 0 : index
    %c0_22 = arith.constant 0 : index
    %39 = vector.load %arg7[%c0_20, %c0_21, %c0_22] : memref<2x1x96xf32, #tpu.memory_space<vmem>>, vector<1x1x96xf32>
    %40 = vector.shape_cast %39 : vector<1x1x96xf32> to vector<1x96xf32>
    %41 = vector.broadcast %40 : vector<1x96xf32> to vector<64x96xf32>
    %42 = arith.addf %38, %41 : vector<64x96xf32>
    %43 = vector.extract_strided_slice %42 {offsets = [0, 0], sizes = [64, 32], strides = [1, 1]} : vector<64x96xf32> to vector<64x32xf32>
    %44 = vector.broadcast %1 : f32 to vector<64x32xf32>
    %45 = arith.mulf %43, %44 : vector<64x32xf32>
    %46 = vector.shape_cast %45 : vector<64x32xf32> to vector<4x16x32xf32>
    %47 = vector.extract_strided_slice %42 {offsets = [0, 32], sizes = [64, 32], strides = [1, 1]} : vector<64x96xf32> to vector<64x32xf32>
    %48 = vector.shape_cast %47 : vector<64x32xf32> to vector<4x16x32xf32>
    %49 = vector.extract_strided_slice %42 {offsets = [0, 64], sizes = [64, 32], strides = [1, 1]} : vector<64x96xf32> to vector<64x32xf32>
    %50 = vector.shape_cast %49 : vector<64x32xf32> to vector<4x16x32xf32>
    %51 = vector.extract_strided_slice %46 {offsets = [0, 0, 0], sizes = [4, 16, 8], strides = [1, 1, 1]} : vector<4x16x32xf32> to vector<4x16x8xf32>
    %52 = vector.extract_strided_slice %48 {offsets = [0, 0, 0], sizes = [4, 16, 8], strides = [1, 1, 1]} : vector<4x16x32xf32> to vector<4x16x8xf32>
    "tpu.trace_start"() <{level = 10 : i32, message = "bqd,bkd->bqk"}> : () -> ()
    %cst_23 = arith.constant dense<0.000000e+00> : vector<4x16x16xf32>
    %53 = tpu.matmul %51, %52, %cst_23 {dimension_numbers = #tpu.dot_dimension_numbers<[2], [2], [1], [1], [0, 0, 0, 1, 1, 1], [0], [0]>} : vector<4x16x8xf32>, vector<4x16x8xf32>, vector<4x16x16xf32> -> vector<4x16x16xf32>
    "tpu.trace_stop"() : () -> ()
    %cst_24 = arith.constant dense<0xFF800000> : vector<4x16xf32>
    %54 = vector.multi_reduction <maximumf>, %53, %cst_24 [2] : vector<4x16x16xf32> to vector<4x16xf32>
    %55 = vector.shape_cast %54 : vector<4x16xf32> to vector<4x16x1xf32>
    %56 = vector.broadcast %55 : vector<4x16x1xf32> to vector<4x16x16xf32>
    %57 = arith.subf %53, %56 : vector<4x16x16xf32>
    %58 = math.exp %57 : vector<4x16x16xf32>
    %cst_25 = arith.constant dense<0.000000e+00> : vector<4x16xf32>
    %59 = vector.multi_reduction <add>, %58, %cst_25 [2] : vector<4x16x16xf32> to vector<4x16xf32>
    %60 = vector.shape_cast %59 : vector<4x16xf32> to vector<4x16x1xf32>
    %61 = tpu.reciprocal %60 {approx = true} : vector<4x16x1xf32> -> vector<4x16x1xf32>
    %62 = vector.broadcast %61 : vector<4x16x1xf32> to vector<4x16x16xf32>
    %63 = arith.mulf %58, %62 : vector<4x16x16xf32>
    %64 = vector.extract_strided_slice %50 {offsets = [0, 0, 0], sizes = [4, 16, 8], strides = [1, 1, 1]} : vector<4x16x32xf32> to vector<4x16x8xf32>
    "tpu.trace_start"() <{level = 10 : i32, message = "bqk,bkd->bqd"}> : () -> ()
    %cst_26 = arith.constant dense<0.000000e+00> : vector<4x16x8xf32>
    %65 = tpu.matmul %63, %64, %cst_26 {dimension_numbers = #tpu.dot_dimension_numbers<[2], [1], [1], [2], [0, 0, 0, 1, 1, 2], [0], [0]>} : vector<4x16x16xf32>, vector<4x16x8xf32>, vector<4x16x8xf32> -> vector<4x16x8xf32>
    "tpu.trace_stop"() : () -> ()
    %66 = vector.extract_strided_slice %46 {offsets = [0, 0, 8], sizes = [4, 16, 8], strides = [1, 1, 1]} : vector<4x16x32xf32> to vector<4x16x8xf32>
    %67 = vector.extract_strided_slice %48 {offsets = [0, 0, 8], sizes = [4, 16, 8], strides = [1, 1, 1]} : vector<4x16x32xf32> to vector<4x16x8xf32>
    "tpu.trace_start"() <{level = 10 : i32, message = "bqd,bkd->bqk"}> : () -> ()
    %cst_27 = arith.constant dense<0.000000e+00> : vector<4x16x16xf32>
    %68 = tpu.matmul %66, %67, %cst_27 {dimension_numbers = #tpu.dot_dimension_numbers<[2], [2], [1], [1], [0, 0, 0, 1, 1, 1], [0], [0]>} : vector<4x16x8xf32>, vector<4x16x8xf32>, vector<4x16x16xf32> -> vector<4x16x16xf32>
    "tpu.trace_stop"() : () -> ()
    %cst_28 = arith.constant dense<0xFF800000> : vector<4x16xf32>
    %69 = vector.multi_reduction <maximumf>, %68, %cst_28 [2] : vector<4x16x16xf32> to vector<4x16xf32>
    %70 = vector.shape_cast %69 : vector<4x16xf32> to vector<4x16x1xf32>
    %71 = vector.broadcast %70 : vector<4x16x1xf32> to vector<4x16x16xf32>
    %72 = arith.subf %68, %71 : vector<4x16x16xf32>
    %73 = math.exp %72 : vector<4x16x16xf32>
    %cst_29 = arith.constant dense<0.000000e+00> : vector<4x16xf32>
    %74 = vector.multi_reduction <add>, %73, %cst_29 [2] : vector<4x16x16xf32> to vector<4x16xf32>
    %75 = vector.shape_cast %74 : vector<4x16xf32> to vector<4x16x1xf32>
    %76 = tpu.reciprocal %75 {approx = true} : vector<4x16x1xf32> -> vector<4x16x1xf32>
    %77 = vector.broadcast %76 : vector<4x16x1xf32> to vector<4x16x16xf32>
    %78 = arith.mulf %73, %77 : vector<4x16x16xf32>
    %79 = vector.extract_strided_slice %50 {offsets = [0, 0, 8], sizes = [4, 16, 8], strides = [1, 1, 1]} : vector<4x16x32xf32> to vector<4x16x8xf32>
    "tpu.trace_start"() <{level = 10 : i32, message = "bqk,bkd->bqd"}> : () -> ()
    %cst_30 = arith.constant dense<0.000000e+00> : vector<4x16x8xf32>
    %80 = tpu.matmul %78, %79, %cst_30 {dimension_numbers = #tpu.dot_dimension_numbers<[2], [1], [1], [2], [0, 0, 0, 1, 1, 2], [0], [0]>} : vector<4x16x16xf32>, vector<4x16x8xf32>, vector<4x16x8xf32> -> vector<4x16x8xf32>
    "tpu.trace_stop"() : () -> ()
    %81 = vector.extract_strided_slice %46 {offsets = [0, 0, 16], sizes = [4, 16, 8], strides = [1, 1, 1]} : vector<4x16x32xf32> to vector<4x16x8xf32>
    %82 = vector.extract_strided_slice %48 {offsets = [0, 0, 16], sizes = [4, 16, 8], strides = [1, 1, 1]} : vector<4x16x32xf32> to vector<4x16x8xf32>
    "tpu.trace_start"() <{level = 10 : i32, message = "bqd,bkd->bqk"}> : () -> ()
    %cst_31 = arith.constant dense<0.000000e+00> : vector<4x16x16xf32>
    %83 = tpu.matmul %81, %82, %cst_31 {dimension_numbers = #tpu.dot_dimension_numbers<[2], [2], [1], [1], [0, 0, 0, 1, 1, 1], [0], [0]>} : vector<4x16x8xf32>, vector<4x16x8xf32>, vector<4x16x16xf32> -> vector<4x16x16xf32>
    "tpu.trace_stop"() : () -> ()
    %cst_32 = arith.constant dense<0xFF800000> : vector<4x16xf32>
    %84 = vector.multi_reduction <maximumf>, %83, %cst_32 [2] : vector<4x16x16xf32> to vector<4x16xf32>
    %85 = vector.shape_cast %84 : vector<4x16xf32> to vector<4x16x1xf32>
    %86 = vector.broadcast %85 : vector<4x16x1xf32> to vector<4x16x16xf32>
    %87 = arith.subf %83, %86 : vector<4x16x16xf32>
    %88 = math.exp %87 : vector<4x16x16xf32>
    %cst_33 = arith.constant dense<0.000000e+00> : vector<4x16xf32>
    %89 = vector.multi_reduction <add>, %88, %cst_33 [2] : vector<4x16x16xf32> to vector<4x16xf32>
    %90 = vector.shape_cast %89 : vector<4x16xf32> to vector<4x16x1xf32>
    %91 = tpu.reciprocal %90 {approx = true} : vector<4x16x1xf32> -> vector<4x16x1xf32>
    %92 = vector.broadcast %91 : vector<4x16x1xf32> to vector<4x16x16xf32>
    %93 = arith.mulf %88, %92 : vector<4x16x16xf32>
    %94 = vector.extract_strided_slice %50 {offsets = [0, 0, 16], sizes = [4, 16, 8], strides = [1, 1, 1]} : vector<4x16x32xf32> to vector<4x16x8xf32>
    "tpu.trace_start"() <{level = 10 : i32, message = "bqk,bkd->bqd"}> : () -> ()
    %cst_34 = arith.constant dense<0.000000e+00> : vector<4x16x8xf32>
    %95 = tpu.matmul %93, %94, %cst_34 {dimension_numbers = #tpu.dot_dimension_numbers<[2], [1], [1], [2], [0, 0, 0, 1, 1, 2], [0], [0]>} : vector<4x16x16xf32>, vector<4x16x8xf32>, vector<4x16x8xf32> -> vector<4x16x8xf32>
    "tpu.trace_stop"() : () -> ()
    %96 = vector.extract_strided_slice %46 {offsets = [0, 0, 24], sizes = [4, 16, 8], strides = [1, 1, 1]} : vector<4x16x32xf32> to vector<4x16x8xf32>
    %97 = vector.extract_strided_slice %48 {offsets = [0, 0, 24], sizes = [4, 16, 8], strides = [1, 1, 1]} : vector<4x16x32xf32> to vector<4x16x8xf32>
    "tpu.trace_start"() <{level = 10 : i32, message = "bqd,bkd->bqk"}> : () -> ()
    %cst_35 = arith.constant dense<0.000000e+00> : vector<4x16x16xf32>
    %98 = tpu.matmul %96, %97, %cst_35 {dimension_numbers = #tpu.dot_dimension_numbers<[2], [2], [1], [1], [0, 0, 0, 1, 1, 1], [0], [0]>} : vector<4x16x8xf32>, vector<4x16x8xf32>, vector<4x16x16xf32> -> vector<4x16x16xf32>
    "tpu.trace_stop"() : () -> ()
    %cst_36 = arith.constant dense<0xFF800000> : vector<4x16xf32>
    %99 = vector.multi_reduction <maximumf>, %98, %cst_36 [2] : vector<4x16x16xf32> to vector<4x16xf32>
    %100 = vector.shape_cast %99 : vector<4x16xf32> to vector<4x16x1xf32>
    %101 = vector.broadcast %100 : vector<4x16x1xf32> to vector<4x16x16xf32>
    %102 = arith.subf %98, %101 : vector<4x16x16xf32>
    %103 = math.exp %102 : vector<4x16x16xf32>
    %cst_37 = arith.constant dense<0.000000e+00> : vector<4x16xf32>
    %104 = vector.multi_reduction <add>, %103, %cst_37 [2] : vector<4x16x16xf32> to vector<4x16xf32>
    %105 = vector.shape_cast %104 : vector<4x16xf32> to vector<4x16x1xf32>
    %106 = tpu.reciprocal %105 {approx = true} : vector<4x16x1xf32> -> vector<4x16x1xf32>
    %107 = vector.broadcast %106 : vector<4x16x1xf32> to vector<4x16x16xf32>
    %108 = arith.mulf %103, %107 : vector<4x16x16xf32>
    %109 = vector.extract_strided_slice %50 {offsets = [0, 0, 24], sizes = [4, 16, 8], strides = [1, 1, 1]} : vector<4x16x32xf32> to vector<4x16x8xf32>
    "tpu.trace_start"() <{level = 10 : i32, message = "bqk,bkd->bqd"}> : () -> ()
    %cst_38 = arith.constant dense<0.000000e+00> : vector<4x16x8xf32>
    %110 = tpu.matmul %108, %109, %cst_38 {dimension_numbers = #tpu.dot_dimension_numbers<[2], [1], [1], [2], [0, 0, 0, 1, 1, 2], [0], [0]>} : vector<4x16x16xf32>, vector<4x16x8xf32>, vector<4x16x8xf32> -> vector<4x16x8xf32>
    "tpu.trace_stop"() : () -> ()
    %111 = tpu.concatenate %65, %80, %95, %110 in 2 : vector<4x16x8xf32>, vector<4x16x8xf32>, vector<4x16x8xf32>, vector<4x16x8xf32> -> vector<4x16x32xf32>
    %112 = vector.shape_cast %111 : vector<4x16x32xf32> to vector<64x32xf32>
    %c0_39 = arith.constant 0 : index
    %c0_40 = arith.constant 0 : index
    %c0_41 = arith.constant 0 : index
    %113 = vector.load %arg8[%c0_39, %c0_40, %c0_41] : memref<2x32x32xf32, #tpu.memory_space<vmem>>, vector<1x32x32xf32>
    %114 = vector.shape_cast %113 : vector<1x32x32xf32> to vector<32x32xf32>
    %115 = arith.truncf %112 : vector<64x32xf32> to vector<64x32xbf16>
    %116 = arith.truncf %114 : vector<32x32xf32> to vector<32x32xbf16>
    %cst_42 = arith.constant dense<0.000000e+00> : vector<64x32xf32>
    %117 = tpu.matmul %115, %116, %cst_42 {dimension_numbers = #tpu.dot_dimension_numbers<[1], [0], [0], [1], [0, 0, 1, 1], [], []>} : vector<64x32xbf16>, vector<32x32xbf16>, vector<64x32xf32> -> vector<64x32xf32>
    %c0_43 = arith.constant 0 : index
    %c0_44 = arith.constant 0 : index
    %c0_45 = arith.constant 0 : index
    %118 = vector.load %arg9[%c0_43, %c0_44, %c0_45] : memref<2x1x32xf32, #tpu.memory_space<vmem>>, vector<1x1x32xf32>
    %119 = vector.shape_cast %118 : vector<1x1x32xf32> to vector<1x32xf32>
    %120 = vector.broadcast %119 : vector<1x32xf32> to vector<64x32xf32>
    %121 = arith.addf %117, %120 : vector<64x32xf32>
    %122 = arith.addf %33, %121 : vector<64x32xf32>
    %c0_46 = arith.constant 0 : index
    %c0_47 = arith.constant 0 : index
    %c0_48 = arith.constant 0 : index
    %123 = vector.load %arg10[%c0_46, %c0_47, %c0_48] : memref<2x1x32xf32, #tpu.memory_space<vmem>>, vector<1x1x32xf32>
    %124 = vector.shape_cast %123 : vector<1x1x32xf32> to vector<1x32xf32>
    %c0_49 = arith.constant 0 : index
    %c0_50 = arith.constant 0 : index
    %c0_51 = arith.constant 0 : index
    %125 = vector.load %arg11[%c0_49, %c0_50, %c0_51] : memref<2x1x32xf32, #tpu.memory_space<vmem>>, vector<1x1x32xf32>
    %126 = vector.shape_cast %125 : vector<1x1x32xf32> to vector<1x32xf32>
    %cst_52 = arith.constant dense<0.000000e+00> : vector<64xf32>
    %127 = vector.multi_reduction <add>, %122, %cst_52 [1] : vector<64x32xf32> to vector<64xf32>
    %128 = vector.shape_cast %127 : vector<64xf32> to vector<64x1xf32>
    %cst_53 = arith.constant 3.200000e+01 : f32
    %129 = vector.broadcast %cst_53 : f32 to vector<64x1xf32>
    %130 = arith.divf %128, %129 : vector<64x1xf32>
    %131 = vector.broadcast %130 : vector<64x1xf32> to vector<64x32xf32>
    %132 = arith.subf %122, %131 : vector<64x32xf32>
    %133 = arith.mulf %132, %132 : vector<64x32xf32>
    %cst_54 = arith.constant dense<0.000000e+00> : vector<64xf32>
    %134 = vector.multi_reduction <add>, %133, %cst_54 [1] : vector<64x32xf32> to vector<64xf32>
    %135 = vector.shape_cast %134 : vector<64xf32> to vector<64x1xf32>
    %cst_55 = arith.constant 3.200000e+01 : f32
    %136 = vector.broadcast %cst_55 : f32 to vector<64x1xf32>
    %137 = arith.divf %135, %136 : vector<64x1xf32>
    %138 = vector.broadcast %130 : vector<64x1xf32> to vector<64x32xf32>
    %139 = arith.subf %122, %138 : vector<64x32xf32>
    %cst_56 = arith.constant 9.99999974E-6 : f32
    %140 = vector.broadcast %cst_56 : f32 to vector<64x1xf32>
    %141 = arith.addf %137, %140 : vector<64x1xf32>
    %142 = math.rsqrt %141 : vector<64x1xf32>
    %143 = vector.broadcast %142 : vector<64x1xf32> to vector<64x32xf32>
    %144 = arith.mulf %139, %143 : vector<64x32xf32>
    %145 = vector.broadcast %124 : vector<1x32xf32> to vector<64x32xf32>
    %146 = arith.mulf %144, %145 : vector<64x32xf32>
    %147 = vector.broadcast %126 : vector<1x32xf32> to vector<64x32xf32>
    %148 = arith.addf %146, %147 : vector<64x32xf32>
    %c0_57 = arith.constant 0 : index
    %c0_58 = arith.constant 0 : index
    %c0_59 = arith.constant 0 : index
    %149 = vector.load %arg12[%c0_57, %c0_58, %c0_59] : memref<2x32x64xf32, #tpu.memory_space<vmem>>, vector<1x32x64xf32>
    %150 = vector.shape_cast %149 : vector<1x32x64xf32> to vector<32x64xf32>
    %151 = arith.truncf %148 : vector<64x32xf32> to vector<64x32xbf16>
    %152 = arith.truncf %150 : vector<32x64xf32> to vector<32x64xbf16>
    %cst_60 = arith.constant dense<0.000000e+00> : vector<64x64xf32>
    %153 = tpu.matmul %151, %152, %cst_60 {dimension_numbers = #tpu.dot_dimension_numbers<[1], [0], [0], [1], [0, 0, 1, 1], [], []>} : vector<64x32xbf16>, vector<32x64xbf16>, vector<64x64xf32> -> vector<64x64xf32>
    %c0_61 = arith.constant 0 : index
    %c0_62 = arith.constant 0 : index
    %c0_63 = arith.constant 0 : index
    %154 = vector.load %arg13[%c0_61, %c0_62, %c0_63] : memref<2x1x64xf32, #tpu.memory_space<vmem>>, vector<1x1x64xf32>
    %155 = vector.shape_cast %154 : vector<1x1x64xf32> to vector<1x64xf32>
    %156 = vector.broadcast %155 : vector<1x64xf32> to vector<64x64xf32>
    %157 = arith.addf %153, %156 : vector<64x64xf32>
    %158 = arith.mulf %157, %157 : vector<64x64xf32>
    %159 = arith.mulf %157, %158 : vector<64x64xf32>
    %cst_64 = arith.constant 4.471500e-02 : f32
    %160 = vector.broadcast %cst_64 : f32 to vector<64x64xf32>
    %161 = arith.mulf %160, %159 : vector<64x64xf32>
    %162 = arith.addf %157, %161 : vector<64x64xf32>
    %cst_65 = arith.constant 0.797884583 : f32
    %163 = vector.broadcast %cst_65 : f32 to vector<64x64xf32>
    %164 = arith.mulf %163, %162 : vector<64x64xf32>
    %165 = math.tanh %164 : vector<64x64xf32>
    %cst_66 = arith.constant 1.000000e+00 : f32
    %166 = vector.broadcast %cst_66 : f32 to vector<64x64xf32>
    %167 = arith.addf %166, %165 : vector<64x64xf32>
    %cst_67 = arith.constant 5.000000e-01 : f32
    %168 = vector.broadcast %cst_67 : f32 to vector<64x64xf32>
    %169 = arith.mulf %168, %167 : vector<64x64xf32>
    %170 = arith.mulf %157, %169 : vector<64x64xf32>
    %c0_68 = arith.constant 0 : index
    %c0_69 = arith.constant 0 : index
    %c0_70 = arith.constant 0 : index
    %171 = vector.load %arg14[%c0_68, %c0_69, %c0_70] : memref<2x64x32xf32, #tpu.memory_space<vmem>>, vector<1x64x32xf32>
    %172 = vector.shape_cast %171 : vector<1x64x32xf32> to vector<64x32xf32>
    %173 = arith.truncf %170 : vector<64x64xf32> to vector<64x64xbf16>
    %174 = arith.truncf %172 : vector<64x32xf32> to vector<64x32xbf16>
    %cst_71 = arith.constant dense<0.000000e+00> : vector<64x32xf32>
    %175 = tpu.matmul %173, %174, %cst_71 {dimension_numbers = #tpu.dot_dimension_numbers<[1], [0], [0], [1], [0, 0, 1, 1], [], []>} : vector<64x64xbf16>, vector<64x32xbf16>, vector<64x32xf32> -> vector<64x32xf32>
    %c0_72 = arith.constant 0 : index
    %c0_73 = arith.constant 0 : index
    %c0_74 = arith.constant 0 : index
    %176 = vector.load %arg15[%c0_72, %c0_73, %c0_74] : memref<2x1x32xf32, #tpu.memory_space<vmem>>, vector<1x1x32xf32>
    %177 = vector.shape_cast %176 : vector<1x1x32xf32> to vector<1x32xf32>
    %178 = vector.broadcast %177 : vector<1x32xf32> to vector<64x32xf32>
    %179 = arith.addf %175, %178 : vector<64x32xf32>
    %180 = arith.addf %148, %179 : vector<64x32xf32>
    %c0_75 = arith.constant 0 : index
    %c0_76 = arith.constant 0 : index
    %c0_77 = arith.constant 0 : index
    %181 = vector.load %arg16[%c0_75, %c0_76, %c0_77] : memref<2x1x32xf32, #tpu.memory_space<vmem>>, vector<1x1x32xf32>
    %182 = vector.shape_cast %181 : vector<1x1x32xf32> to vector<1x32xf32>
    %c0_78 = arith.constant 0 : index
    %c0_79 = arith.constant 0 : index
    %c0_80 = arith.constant 0 : index
    %183 = vector.load %arg17[%c0_78, %c0_79, %c0_80] : memref<2x1x32xf32, #tpu.memory_space<vmem>>, vector<1x1x32xf32>
    %184 = vector.shape_cast %183 : vector<1x1x32xf32> to vector<1x32xf32>
    %cst_81 = arith.constant dense<0.000000e+00> : vector<64xf32>
    %185 = vector.multi_reduction <add>, %180, %cst_81 [1] : vector<64x32xf32> to vector<64xf32>
    %186 = vector.shape_cast %185 : vector<64xf32> to vector<64x1xf32>
    %cst_82 = arith.constant 3.200000e+01 : f32
    %187 = vector.broadcast %cst_82 : f32 to vector<64x1xf32>
    %188 = arith.divf %186, %187 : vector<64x1xf32>
    %189 = vector.broadcast %188 : vector<64x1xf32> to vector<64x32xf32>
    %190 = arith.subf %180, %189 : vector<64x32xf32>
    %191 = arith.mulf %190, %190 : vector<64x32xf32>
    %cst_83 = arith.constant dense<0.000000e+00> : vector<64xf32>
    %192 = vector.multi_reduction <add>, %191, %cst_83 [1] : vector<64x32xf32> to vector<64xf32>
    %193 = vector.shape_cast %192 : vector<64xf32> to vector<64x1xf32>
    %cst_84 = arith.constant 3.200000e+01 : f32
    %194 = vector.broadcast %cst_84 : f32 to vector<64x1xf32>
    %195 = arith.divf %193, %194 : vector<64x1xf32>
    %196 = vector.broadcast %188 : vector<64x1xf32> to vector<64x32xf32>
    %197 = arith.subf %180, %196 : vector<64x32xf32>
    %cst_85 = arith.constant 9.99999974E-6 : f32
    %198 = vector.broadcast %cst_85 : f32 to vector<64x1xf32>
    %199 = arith.addf %195, %198 : vector<64x1xf32>
    %200 = math.rsqrt %199 : vector<64x1xf32>
    %201 = vector.broadcast %200 : vector<64x1xf32> to vector<64x32xf32>
    %202 = arith.mulf %197, %201 : vector<64x32xf32>
    %203 = vector.broadcast %182 : vector<1x32xf32> to vector<64x32xf32>
    %204 = arith.mulf %202, %203 : vector<64x32xf32>
    %205 = vector.broadcast %184 : vector<1x32xf32> to vector<64x32xf32>
    %206 = arith.addf %204, %205 : vector<64x32xf32>
    %c1 = arith.constant 1 : index
    %c0_86 = arith.constant 0 : index
    %c0_87 = arith.constant 0 : index
    %207 = vector.load %arg6[%c1, %c0_86, %c0_87] : memref<2x32x96xf32, #tpu.memory_space<vmem>>, vector<1x32x96xf32>
    %208 = vector.shape_cast %207 : vector<1x32x96xf32> to vector<32x96xf32>
    %209 = arith.truncf %206 : vector<64x32xf32> to vector<64x32xbf16>
    %210 = arith.truncf %208 : vector<32x96xf32> to vector<32x96xbf16>
    %cst_88 = arith.constant dense<0.000000e+00> : vector<64x96xf32>
    %211 = tpu.matmul %209, %210, %cst_88 {dimension_numbers = #tpu.dot_dimension_numbers<[1], [0], [0], [1], [0, 0, 1, 1], [], []>} : vector<64x32xbf16>, vector<32x96xbf16>, vector<64x96xf32> -> vector<64x96xf32>
    %c1_89 = arith.constant 1 : index
    %c0_90 = arith.constant 0 : index
    %c0_91 = arith.constant 0 : index
    %212 = vector.load %arg7[%c1_89, %c0_90, %c0_91] : memref<2x1x96xf32, #tpu.memory_space<vmem>>, vector<1x1x96xf32>
    %213 = vector.shape_cast %212 : vector<1x1x96xf32> to vector<1x96xf32>
    %214 = vector.broadcast %213 : vector<1x96xf32> to vector<64x96xf32>
    %215 = arith.addf %211, %214 : vector<64x96xf32>
    %216 = vector.extract_strided_slice %215 {offsets = [0, 0], sizes = [64, 32], strides = [1, 1]} : vector<64x96xf32> to vector<64x32xf32>
    %217 = vector.broadcast %1 : f32 to vector<64x32xf32>
    %218 = arith.mulf %216, %217 : vector<64x32xf32>
    %219 = vector.shape_cast %218 : vector<64x32xf32> to vector<4x16x32xf32>
    %220 = vector.extract_strided_slice %215 {offsets = [0, 32], sizes = [64, 32], strides = [1, 1]} : vector<64x96xf32> to vector<64x32xf32>
    %221 = vector.shape_cast %220 : vector<64x32xf32> to vector<4x16x32xf32>
    %222 = vector.extract_strided_slice %215 {offsets = [0, 64], sizes = [64, 32], strides = [1, 1]} : vector<64x96xf32> to vector<64x32xf32>
    %223 = vector.shape_cast %222 : vector<64x32xf32> to vector<4x16x32xf32>
    %224 = vector.extract_strided_slice %219 {offsets = [0, 0, 0], sizes = [4, 16, 8], strides = [1, 1, 1]} : vector<4x16x32xf32> to vector<4x16x8xf32>
    %225 = vector.extract_strided_slice %221 {offsets = [0, 0, 0], sizes = [4, 16, 8], strides = [1, 1, 1]} : vector<4x16x32xf32> to vector<4x16x8xf32>
    "tpu.trace_start"() <{level = 10 : i32, message = "bqd,bkd->bqk"}> : () -> ()
    %cst_92 = arith.constant dense<0.000000e+00> : vector<4x16x16xf32>
    %226 = tpu.matmul %224, %225, %cst_92 {dimension_numbers = #tpu.dot_dimension_numbers<[2], [2], [1], [1], [0, 0, 0, 1, 1, 1], [0], [0]>} : vector<4x16x8xf32>, vector<4x16x8xf32>, vector<4x16x16xf32> -> vector<4x16x16xf32>
    "tpu.trace_stop"() : () -> ()
    %cst_93 = arith.constant dense<0xFF800000> : vector<4x16xf32>
    %227 = vector.multi_reduction <maximumf>, %226, %cst_93 [2] : vector<4x16x16xf32> to vector<4x16xf32>
    %228 = vector.shape_cast %227 : vector<4x16xf32> to vector<4x16x1xf32>
    %229 = vector.broadcast %228 : vector<4x16x1xf32> to vector<4x16x16xf32>
    %230 = arith.subf %226, %229 : vector<4x16x16xf32>
    %231 = math.exp %230 : vector<4x16x16xf32>
    %cst_94 = arith.constant dense<0.000000e+00> : vector<4x16xf32>
    %232 = vector.multi_reduction <add>, %231, %cst_94 [2] : vector<4x16x16xf32> to vector<4x16xf32>
    %233 = vector.shape_cast %232 : vector<4x16xf32> to vector<4x16x1xf32>
    %234 = tpu.reciprocal %233 {approx = true} : vector<4x16x1xf32> -> vector<4x16x1xf32>
    %235 = vector.broadcast %234 : vector<4x16x1xf32> to vector<4x16x16xf32>
    %236 = arith.mulf %231, %235 : vector<4x16x16xf32>
    %237 = vector.extract_strided_slice %223 {offsets = [0, 0, 0], sizes = [4, 16, 8], strides = [1, 1, 1]} : vector<4x16x32xf32> to vector<4x16x8xf32>
    "tpu.trace_start"() <{level = 10 : i32, message = "bqk,bkd->bqd"}> : () -> ()
    %cst_95 = arith.constant dense<0.000000e+00> : vector<4x16x8xf32>
    %238 = tpu.matmul %236, %237, %cst_95 {dimension_numbers = #tpu.dot_dimension_numbers<[2], [1], [1], [2], [0, 0, 0, 1, 1, 2], [0], [0]>} : vector<4x16x16xf32>, vector<4x16x8xf32>, vector<4x16x8xf32> -> vector<4x16x8xf32>
    "tpu.trace_stop"() : () -> ()
    %239 = vector.extract_strided_slice %219 {offsets = [0, 0, 8], sizes = [4, 16, 8], strides = [1, 1, 1]} : vector<4x16x32xf32> to vector<4x16x8xf32>
    %240 = vector.extract_strided_slice %221 {offsets = [0, 0, 8], sizes = [4, 16, 8], strides = [1, 1, 1]} : vector<4x16x32xf32> to vector<4x16x8xf32>
    "tpu.trace_start"() <{level = 10 : i32, message = "bqd,bkd->bqk"}> : () -> ()
    %cst_96 = arith.constant dense<0.000000e+00> : vector<4x16x16xf32>
    %241 = tpu.matmul %239, %240, %cst_96 {dimension_numbers = #tpu.dot_dimension_numbers<[2], [2], [1], [1], [0, 0, 0, 1, 1, 1], [0], [0]>} : vector<4x16x8xf32>, vector<4x16x8xf32>, vector<4x16x16xf32> -> vector<4x16x16xf32>
    "tpu.trace_stop"() : () -> ()
    %cst_97 = arith.constant dense<0xFF800000> : vector<4x16xf32>
    %242 = vector.multi_reduction <maximumf>, %241, %cst_97 [2] : vector<4x16x16xf32> to vector<4x16xf32>
    %243 = vector.shape_cast %242 : vector<4x16xf32> to vector<4x16x1xf32>
    %244 = vector.broadcast %243 : vector<4x16x1xf32> to vector<4x16x16xf32>
    %245 = arith.subf %241, %244 : vector<4x16x16xf32>
    %246 = math.exp %245 : vector<4x16x16xf32>
    %cst_98 = arith.constant dense<0.000000e+00> : vector<4x16xf32>
    %247 = vector.multi_reduction <add>, %246, %cst_98 [2] : vector<4x16x16xf32> to vector<4x16xf32>
    %248 = vector.shape_cast %247 : vector<4x16xf32> to vector<4x16x1xf32>
    %249 = tpu.reciprocal %248 {approx = true} : vector<4x16x1xf32> -> vector<4x16x1xf32>
    %250 = vector.broadcast %249 : vector<4x16x1xf32> to vector<4x16x16xf32>
    %251 = arith.mulf %246, %250 : vector<4x16x16xf32>
    %252 = vector.extract_strided_slice %223 {offsets = [0, 0, 8], sizes = [4, 16, 8], strides = [1, 1, 1]} : vector<4x16x32xf32> to vector<4x16x8xf32>
    "tpu.trace_start"() <{level = 10 : i32, message = "bqk,bkd->bqd"}> : () -> ()
    %cst_99 = arith.constant dense<0.000000e+00> : vector<4x16x8xf32>
    %253 = tpu.matmul %251, %252, %cst_99 {dimension_numbers = #tpu.dot_dimension_numbers<[2], [1], [1], [2], [0, 0, 0, 1, 1, 2], [0], [0]>} : vector<4x16x16xf32>, vector<4x16x8xf32>, vector<4x16x8xf32> -> vector<4x16x8xf32>
    "tpu.trace_stop"() : () -> ()
    %254 = vector.extract_strided_slice %219 {offsets = [0, 0, 16], sizes = [4, 16, 8], strides = [1, 1, 1]} : vector<4x16x32xf32> to vector<4x16x8xf32>
    %255 = vector.extract_strided_slice %221 {offsets = [0, 0, 16], sizes = [4, 16, 8], strides = [1, 1, 1]} : vector<4x16x32xf32> to vector<4x16x8xf32>
    "tpu.trace_start"() <{level = 10 : i32, message = "bqd,bkd->bqk"}> : () -> ()
    %cst_100 = arith.constant dense<0.000000e+00> : vector<4x16x16xf32>
    %256 = tpu.matmul %254, %255, %cst_100 {dimension_numbers = #tpu.dot_dimension_numbers<[2], [2], [1], [1], [0, 0, 0, 1, 1, 1], [0], [0]>} : vector<4x16x8xf32>, vector<4x16x8xf32>, vector<4x16x16xf32> -> vector<4x16x16xf32>
    "tpu.trace_stop"() : () -> ()
    %cst_101 = arith.constant dense<0xFF800000> : vector<4x16xf32>
    %257 = vector.multi_reduction <maximumf>, %256, %cst_101 [2] : vector<4x16x16xf32> to vector<4x16xf32>
    %258 = vector.shape_cast %257 : vector<4x16xf32> to vector<4x16x1xf32>
    %259 = vector.broadcast %258 : vector<4x16x1xf32> to vector<4x16x16xf32>
    %260 = arith.subf %256, %259 : vector<4x16x16xf32>
    %261 = math.exp %260 : vector<4x16x16xf32>
    %cst_102 = arith.constant dense<0.000000e+00> : vector<4x16xf32>
    %262 = vector.multi_reduction <add>, %261, %cst_102 [2] : vector<4x16x16xf32> to vector<4x16xf32>
    %263 = vector.shape_cast %262 : vector<4x16xf32> to vector<4x16x1xf32>
    %264 = tpu.reciprocal %263 {approx = true} : vector<4x16x1xf32> -> vector<4x16x1xf32>
    %265 = vector.broadcast %264 : vector<4x16x1xf32> to vector<4x16x16xf32>
    %266 = arith.mulf %261, %265 : vector<4x16x16xf32>
    %267 = vector.extract_strided_slice %223 {offsets = [0, 0, 16], sizes = [4, 16, 8], strides = [1, 1, 1]} : vector<4x16x32xf32> to vector<4x16x8xf32>
    "tpu.trace_start"() <{level = 10 : i32, message = "bqk,bkd->bqd"}> : () -> ()
    %cst_103 = arith.constant dense<0.000000e+00> : vector<4x16x8xf32>
    %268 = tpu.matmul %266, %267, %cst_103 {dimension_numbers = #tpu.dot_dimension_numbers<[2], [1], [1], [2], [0, 0, 0, 1, 1, 2], [0], [0]>} : vector<4x16x16xf32>, vector<4x16x8xf32>, vector<4x16x8xf32> -> vector<4x16x8xf32>
    "tpu.trace_stop"() : () -> ()
    %269 = vector.extract_strided_slice %219 {offsets = [0, 0, 24], sizes = [4, 16, 8], strides = [1, 1, 1]} : vector<4x16x32xf32> to vector<4x16x8xf32>
    %270 = vector.extract_strided_slice %221 {offsets = [0, 0, 24], sizes = [4, 16, 8], strides = [1, 1, 1]} : vector<4x16x32xf32> to vector<4x16x8xf32>
    "tpu.trace_start"() <{level = 10 : i32, message = "bqd,bkd->bqk"}> : () -> ()
    %cst_104 = arith.constant dense<0.000000e+00> : vector<4x16x16xf32>
    %271 = tpu.matmul %269, %270, %cst_104 {dimension_numbers = #tpu.dot_dimension_numbers<[2], [2], [1], [1], [0, 0, 0, 1, 1, 1], [0], [0]>} : vector<4x16x8xf32>, vector<4x16x8xf32>, vector<4x16x16xf32> -> vector<4x16x16xf32>
    "tpu.trace_stop"() : () -> ()
    %cst_105 = arith.constant dense<0xFF800000> : vector<4x16xf32>
    %272 = vector.multi_reduction <maximumf>, %271, %cst_105 [2] : vector<4x16x16xf32> to vector<4x16xf32>
    %273 = vector.shape_cast %272 : vector<4x16xf32> to vector<4x16x1xf32>
    %274 = vector.broadcast %273 : vector<4x16x1xf32> to vector<4x16x16xf32>
    %275 = arith.subf %271, %274 : vector<4x16x16xf32>
    %276 = math.exp %275 : vector<4x16x16xf32>
    %cst_106 = arith.constant dense<0.000000e+00> : vector<4x16xf32>
    %277 = vector.multi_reduction <add>, %276, %cst_106 [2] : vector<4x16x16xf32> to vector<4x16xf32>
    %278 = vector.shape_cast %277 : vector<4x16xf32> to vector<4x16x1xf32>
    %279 = tpu.reciprocal %278 {approx = true} : vector<4x16x1xf32> -> vector<4x16x1xf32>
    %280 = vector.broadcast %279 : vector<4x16x1xf32> to vector<4x16x16xf32>
    %281 = arith.mulf %276, %280 : vector<4x16x16xf32>
    %282 = vector.extract_strided_slice %223 {offsets = [0, 0, 24], sizes = [4, 16, 8], strides = [1, 1, 1]} : vector<4x16x32xf32> to vector<4x16x8xf32>
    "tpu.trace_start"() <{level = 10 : i32, message = "bqk,bkd->bqd"}> : () -> ()
    %cst_107 = arith.constant dense<0.000000e+00> : vector<4x16x8xf32>
    %283 = tpu.matmul %281, %282, %cst_107 {dimension_numbers = #tpu.dot_dimension_numbers<[2], [1], [1], [2], [0, 0, 0, 1, 1, 2], [0], [0]>} : vector<4x16x16xf32>, vector<4x16x8xf32>, vector<4x16x8xf32> -> vector<4x16x8xf32>
    "tpu.trace_stop"() : () -> ()
    %284 = tpu.concatenate %238, %253, %268, %283 in 2 : vector<4x16x8xf32>, vector<4x16x8xf32>, vector<4x16x8xf32>, vector<4x16x8xf32> -> vector<4x16x32xf32>
    %285 = vector.shape_cast %284 : vector<4x16x32xf32> to vector<64x32xf32>
    %c1_108 = arith.constant 1 : index
    %c0_109 = arith.constant 0 : index
    %c0_110 = arith.constant 0 : index
    %286 = vector.load %arg8[%c1_108, %c0_109, %c0_110] : memref<2x32x32xf32, #tpu.memory_space<vmem>>, vector<1x32x32xf32>
    %287 = vector.shape_cast %286 : vector<1x32x32xf32> to vector<32x32xf32>
    %288 = arith.truncf %285 : vector<64x32xf32> to vector<64x32xbf16>
    %289 = arith.truncf %287 : vector<32x32xf32> to vector<32x32xbf16>
    %cst_111 = arith.constant dense<0.000000e+00> : vector<64x32xf32>
    %290 = tpu.matmul %288, %289, %cst_111 {dimension_numbers = #tpu.dot_dimension_numbers<[1], [0], [0], [1], [0, 0, 1, 1], [], []>} : vector<64x32xbf16>, vector<32x32xbf16>, vector<64x32xf32> -> vector<64x32xf32>
    %c1_112 = arith.constant 1 : index
    %c0_113 = arith.constant 0 : index
    %c0_114 = arith.constant 0 : index
    %291 = vector.load %arg9[%c1_112, %c0_113, %c0_114] : memref<2x1x32xf32, #tpu.memory_space<vmem>>, vector<1x1x32xf32>
    %292 = vector.shape_cast %291 : vector<1x1x32xf32> to vector<1x32xf32>
    %293 = vector.broadcast %292 : vector<1x32xf32> to vector<64x32xf32>
    %294 = arith.addf %290, %293 : vector<64x32xf32>
    %295 = arith.addf %206, %294 : vector<64x32xf32>
    %c1_115 = arith.constant 1 : index
    %c0_116 = arith.constant 0 : index
    %c0_117 = arith.constant 0 : index
    %296 = vector.load %arg10[%c1_115, %c0_116, %c0_117] : memref<2x1x32xf32, #tpu.memory_space<vmem>>, vector<1x1x32xf32>
    %297 = vector.shape_cast %296 : vector<1x1x32xf32> to vector<1x32xf32>
    %c1_118 = arith.constant 1 : index
    %c0_119 = arith.constant 0 : index
    %c0_120 = arith.constant 0 : index
    %298 = vector.load %arg11[%c1_118, %c0_119, %c0_120] : memref<2x1x32xf32, #tpu.memory_space<vmem>>, vector<1x1x32xf32>
    %299 = vector.shape_cast %298 : vector<1x1x32xf32> to vector<1x32xf32>
    %cst_121 = arith.constant dense<0.000000e+00> : vector<64xf32>
    %300 = vector.multi_reduction <add>, %295, %cst_121 [1] : vector<64x32xf32> to vector<64xf32>
    %301 = vector.shape_cast %300 : vector<64xf32> to vector<64x1xf32>
    %cst_122 = arith.constant 3.200000e+01 : f32
    %302 = vector.broadcast %cst_122 : f32 to vector<64x1xf32>
    %303 = arith.divf %301, %302 : vector<64x1xf32>
    %304 = vector.broadcast %303 : vector<64x1xf32> to vector<64x32xf32>
    %305 = arith.subf %295, %304 : vector<64x32xf32>
    %306 = arith.mulf %305, %305 : vector<64x32xf32>
    %cst_123 = arith.constant dense<0.000000e+00> : vector<64xf32>
    %307 = vector.multi_reduction <add>, %306, %cst_123 [1] : vector<64x32xf32> to vector<64xf32>
    %308 = vector.shape_cast %307 : vector<64xf32> to vector<64x1xf32>
    %cst_124 = arith.constant 3.200000e+01 : f32
    %309 = vector.broadcast %cst_124 : f32 to vector<64x1xf32>
    %310 = arith.divf %308, %309 : vector<64x1xf32>
    %311 = vector.broadcast %303 : vector<64x1xf32> to vector<64x32xf32>
    %312 = arith.subf %295, %311 : vector<64x32xf32>
    %cst_125 = arith.constant 9.99999974E-6 : f32
    %313 = vector.broadcast %cst_125 : f32 to vector<64x1xf32>
    %314 = arith.addf %310, %313 : vector<64x1xf32>
    %315 = math.rsqrt %314 : vector<64x1xf32>
    %316 = vector.broadcast %315 : vector<64x1xf32> to vector<64x32xf32>
    %317 = arith.mulf %312, %316 : vector<64x32xf32>
    %318 = vector.broadcast %297 : vector<1x32xf32> to vector<64x32xf32>
    %319 = arith.mulf %317, %318 : vector<64x32xf32>
    %320 = vector.broadcast %299 : vector<1x32xf32> to vector<64x32xf32>
    %321 = arith.addf %319, %320 : vector<64x32xf32>
    %c1_126 = arith.constant 1 : index
    %c0_127 = arith.constant 0 : index
    %c0_128 = arith.constant 0 : index
    %322 = vector.load %arg12[%c1_126, %c0_127, %c0_128] : memref<2x32x64xf32, #tpu.memory_space<vmem>>, vector<1x32x64xf32>
    %323 = vector.shape_cast %322 : vector<1x32x64xf32> to vector<32x64xf32>
    %324 = arith.truncf %321 : vector<64x32xf32> to vector<64x32xbf16>
    %325 = arith.truncf %323 : vector<32x64xf32> to vector<32x64xbf16>
    %cst_129 = arith.constant dense<0.000000e+00> : vector<64x64xf32>
    %326 = tpu.matmul %324, %325, %cst_129 {dimension_numbers = #tpu.dot_dimension_numbers<[1], [0], [0], [1], [0, 0, 1, 1], [], []>} : vector<64x32xbf16>, vector<32x64xbf16>, vector<64x64xf32> -> vector<64x64xf32>
    %c1_130 = arith.constant 1 : index
    %c0_131 = arith.constant 0 : index
    %c0_132 = arith.constant 0 : index
    %327 = vector.load %arg13[%c1_130, %c0_131, %c0_132] : memref<2x1x64xf32, #tpu.memory_space<vmem>>, vector<1x1x64xf32>
    %328 = vector.shape_cast %327 : vector<1x1x64xf32> to vector<1x64xf32>
    %329 = vector.broadcast %328 : vector<1x64xf32> to vector<64x64xf32>
    %330 = arith.addf %326, %329 : vector<64x64xf32>
    %331 = arith.mulf %330, %330 : vector<64x64xf32>
    %332 = arith.mulf %330, %331 : vector<64x64xf32>
    %cst_133 = arith.constant 4.471500e-02 : f32
    %333 = vector.broadcast %cst_133 : f32 to vector<64x64xf32>
    %334 = arith.mulf %333, %332 : vector<64x64xf32>
    %335 = arith.addf %330, %334 : vector<64x64xf32>
    %cst_134 = arith.constant 0.797884583 : f32
    %336 = vector.broadcast %cst_134 : f32 to vector<64x64xf32>
    %337 = arith.mulf %336, %335 : vector<64x64xf32>
    %338 = math.tanh %337 : vector<64x64xf32>
    %cst_135 = arith.constant 1.000000e+00 : f32
    %339 = vector.broadcast %cst_135 : f32 to vector<64x64xf32>
    %340 = arith.addf %339, %338 : vector<64x64xf32>
    %cst_136 = arith.constant 5.000000e-01 : f32
    %341 = vector.broadcast %cst_136 : f32 to vector<64x64xf32>
    %342 = arith.mulf %341, %340 : vector<64x64xf32>
    %343 = arith.mulf %330, %342 : vector<64x64xf32>
    %c1_137 = arith.constant 1 : index
    %c0_138 = arith.constant 0 : index
    %c0_139 = arith.constant 0 : index
    %344 = vector.load %arg14[%c1_137, %c0_138, %c0_139] : memref<2x64x32xf32, #tpu.memory_space<vmem>>, vector<1x64x32xf32>
    %345 = vector.shape_cast %344 : vector<1x64x32xf32> to vector<64x32xf32>
    %346 = arith.truncf %343 : vector<64x64xf32> to vector<64x64xbf16>
    %347 = arith.truncf %345 : vector<64x32xf32> to vector<64x32xbf16>
    %cst_140 = arith.constant dense<0.000000e+00> : vector<64x32xf32>
    %348 = tpu.matmul %346, %347, %cst_140 {dimension_numbers = #tpu.dot_dimension_numbers<[1], [0], [0], [1], [0, 0, 1, 1], [], []>} : vector<64x64xbf16>, vector<64x32xbf16>, vector<64x32xf32> -> vector<64x32xf32>
    %c1_141 = arith.constant 1 : index
    %c0_142 = arith.constant 0 : index
    %c0_143 = arith.constant 0 : index
    %349 = vector.load %arg15[%c1_141, %c0_142, %c0_143] : memref<2x1x32xf32, #tpu.memory_space<vmem>>, vector<1x1x32xf32>
    %350 = vector.shape_cast %349 : vector<1x1x32xf32> to vector<1x32xf32>
    %351 = vector.broadcast %350 : vector<1x32xf32> to vector<64x32xf32>
    %352 = arith.addf %348, %351 : vector<64x32xf32>
    %353 = arith.addf %321, %352 : vector<64x32xf32>
    %c1_144 = arith.constant 1 : index
    %c0_145 = arith.constant 0 : index
    %c0_146 = arith.constant 0 : index
    %354 = vector.load %arg16[%c1_144, %c0_145, %c0_146] : memref<2x1x32xf32, #tpu.memory_space<vmem>>, vector<1x1x32xf32>
    %355 = vector.shape_cast %354 : vector<1x1x32xf32> to vector<1x32xf32>
    %c1_147 = arith.constant 1 : index
    %c0_148 = arith.constant 0 : index
    %c0_149 = arith.constant 0 : index
    %356 = vector.load %arg17[%c1_147, %c0_148, %c0_149] : memref<2x1x32xf32, #tpu.memory_space<vmem>>, vector<1x1x32xf32>
    %357 = vector.shape_cast %356 : vector<1x1x32xf32> to vector<1x32xf32>
    %cst_150 = arith.constant dense<0.000000e+00> : vector<64xf32>
    %358 = vector.multi_reduction <add>, %353, %cst_150 [1] : vector<64x32xf32> to vector<64xf32>
    %359 = vector.shape_cast %358 : vector<64xf32> to vector<64x1xf32>
    %cst_151 = arith.constant 3.200000e+01 : f32
    %360 = vector.broadcast %cst_151 : f32 to vector<64x1xf32>
    %361 = arith.divf %359, %360 : vector<64x1xf32>
    %362 = vector.broadcast %361 : vector<64x1xf32> to vector<64x32xf32>
    %363 = arith.subf %353, %362 : vector<64x32xf32>
    %364 = arith.mulf %363, %363 : vector<64x32xf32>
    %cst_152 = arith.constant dense<0.000000e+00> : vector<64xf32>
    %365 = vector.multi_reduction <add>, %364, %cst_152 [1] : vector<64x32xf32> to vector<64xf32>
    %366 = vector.shape_cast %365 : vector<64xf32> to vector<64x1xf32>
    %cst_153 = arith.constant 3.200000e+01 : f32
    %367 = vector.broadcast %cst_153 : f32 to vector<64x1xf32>
    %368 = arith.divf %366, %367 : vector<64x1xf32>
    %369 = vector.broadcast %361 : vector<64x1xf32> to vector<64x32xf32>
    %370 = arith.subf %353, %369 : vector<64x32xf32>
    %cst_154 = arith.constant 9.99999974E-6 : f32
    %371 = vector.broadcast %cst_154 : f32 to vector<64x1xf32>
    %372 = arith.addf %368, %371 : vector<64x1xf32>
    %373 = math.rsqrt %372 : vector<64x1xf32>
    %374 = vector.broadcast %373 : vector<64x1xf32> to vector<64x32xf32>
    %375 = arith.mulf %370, %374 : vector<64x32xf32>
    %376 = vector.broadcast %355 : vector<1x32xf32> to vector<64x32xf32>
    %377 = arith.mulf %375, %376 : vector<64x32xf32>
    %378 = vector.broadcast %357 : vector<1x32xf32> to vector<64x32xf32>
    %379 = arith.addf %377, %378 : vector<64x32xf32>
    %380 = vector.shape_cast %379 : vector<64x32xf32> to vector<4x16x32xf32>
    %cst_155 = arith.constant dense<0.000000e+00> : vector<4x32xf32>
    %381 = vector.multi_reduction <add>, %380, %cst_155 [1] : vector<4x16x32xf32> to vector<4x32xf32>
    %cst_156 = arith.constant 1.600000e+01 : f32
    %382 = vector.broadcast %cst_156 : f32 to vector<4x32xf32>
    %383 = arith.divf %381, %382 : vector<4x32xf32>
    %384 = vector.extract_strided_slice %383 {offsets = [0, 0], sizes = [2, 32], strides = [1, 1]} : vector<4x32xf32> to vector<2x32xf32>
    %385 = vector.extract_strided_slice %383 {offsets = [2, 0], sizes = [2, 32], strides = [1, 1]} : vector<4x32xf32> to vector<2x32xf32>
    %c0_157 = arith.constant 0 : index
    %c0_158 = arith.constant 0 : index
    %386 = vector.load %arg18[%c0_157, %c0_158] : memref<64x100xf32, #tpu.memory_space<vmem>>, vector<64x100xf32>
    %387 = vector.extract_strided_slice %386 {offsets = [0, 0], sizes = [32, 100], strides = [1, 1]} : vector<64x100xf32> to vector<32x100xf32>
    %388 = arith.truncf %384 : vector<2x32xf32> to vector<2x32xbf16>
    %389 = arith.truncf %387 : vector<32x100xf32> to vector<32x100xbf16>
    %cst_159 = arith.constant dense<0.000000e+00> : vector<2x100xf32>
    %390 = tpu.matmul %388, %389, %cst_159 {dimension_numbers = #tpu.dot_dimension_numbers<[1], [0], [0], [1], [0, 0, 1, 1], [], []>} : vector<2x32xbf16>, vector<32x100xbf16>, vector<2x100xf32> -> vector<2x100xf32>
    %391 = vector.extract_strided_slice %386 {offsets = [32, 0], sizes = [32, 100], strides = [1, 1]} : vector<64x100xf32> to vector<32x100xf32>
    %392 = arith.truncf %385 : vector<2x32xf32> to vector<2x32xbf16>
    %393 = arith.truncf %391 : vector<32x100xf32> to vector<32x100xbf16>
    %cst_160 = arith.constant dense<0.000000e+00> : vector<2x100xf32>
    %394 = tpu.matmul %392, %393, %cst_160 {dimension_numbers = #tpu.dot_dimension_numbers<[1], [0], [0], [1], [0, 0, 1, 1], [], []>} : vector<2x32xbf16>, vector<32x100xbf16>, vector<2x100xf32> -> vector<2x100xf32>
    %395 = arith.addf %390, %394 : vector<2x100xf32>
    %c0_161 = arith.constant 0 : index
    %c0_162 = arith.constant 0 : index
    %396 = vector.load %arg19[%c0_161, %c0_162] : memref<1x100xf32, #tpu.memory_space<vmem>>, vector<1x100xf32>
    %397 = vector.broadcast %396 : vector<1x100xf32> to vector<2x100xf32>
    %398 = arith.addf %395, %397 : vector<2x100xf32>
    %cst_163 = arith.constant 0.000000e+00 : f32
    %399 = vector.broadcast %cst_163 : f32 to vector<2x100xf32>
    %400 = arith.maximumf %398, %399 : vector<2x100xf32>
    %c0_164 = arith.constant 0 : index
    %c0_165 = arith.constant 0 : index
    %401 = vector.load %arg20[%c0_164, %c0_165] : memref<100x100xf32, #tpu.memory_space<vmem>>, vector<100x100xf32>
    %402 = arith.truncf %400 : vector<2x100xf32> to vector<2x100xbf16>
    %403 = arith.truncf %401 : vector<100x100xf32> to vector<100x100xbf16>
    %cst_166 = arith.constant dense<0.000000e+00> : vector<2x100xf32>
    %404 = tpu.matmul %402, %403, %cst_166 {dimension_numbers = #tpu.dot_dimension_numbers<[1], [0], [0], [1], [0, 0, 1, 1], [], []>} : vector<2x100xbf16>, vector<100x100xbf16>, vector<2x100xf32> -> vector<2x100xf32>
    %c0_167 = arith.constant 0 : index
    %c0_168 = arith.constant 0 : index
    %405 = vector.load %arg21[%c0_167, %c0_168] : memref<1x100xf32, #tpu.memory_space<vmem>>, vector<1x100xf32>
    %406 = vector.broadcast %405 : vector<1x100xf32> to vector<2x100xf32>
    %407 = arith.addf %404, %406 : vector<2x100xf32>
    %cst_169 = arith.constant 0.000000e+00 : f32
    %408 = vector.broadcast %cst_169 : f32 to vector<2x100xf32>
    %409 = arith.maximumf %407, %408 : vector<2x100xf32>
    %c0_170 = arith.constant 0 : index
    %c0_171 = arith.constant 0 : index
    %410 = vector.load %arg22[%c0_170, %c0_171] : memref<100x1xf32, #tpu.memory_space<vmem>>, vector<100x1xf32>
    %411 = arith.truncf %409 : vector<2x100xf32> to vector<2x100xbf16>
    %412 = arith.truncf %410 : vector<100x1xf32> to vector<100x1xbf16>
    %cst_172 = arith.constant dense<0.000000e+00> : vector<2x1xf32>
    %413 = tpu.matmul %411, %412, %cst_172 {dimension_numbers = #tpu.dot_dimension_numbers<[1], [0], [0], [1], [0, 0, 1, 1], [], []>} : vector<2x100xbf16>, vector<100x1xbf16>, vector<2x1xf32> -> vector<2x1xf32>
    %c0_173 = arith.constant 0 : index
    %c0_174 = arith.constant 0 : index
    %414 = vector.load %arg23[%c0_173, %c0_174] : memref<1x1xf32, #tpu.memory_space<vmem>>, vector<1x1xf32>
    %415 = vector.broadcast %414 : vector<1x1xf32> to vector<2x1xf32>
    %416 = arith.addf %413, %415 : vector<2x1xf32>
    %c0_175 = arith.constant 0 : index
    %c0_176 = arith.constant 0 : index
    %417 = vector.load %arg24[%c0_175, %c0_176] : memref<2x1xf32, #tpu.memory_space<vmem>>, vector<2x1xf32>
    tpu.vector_store %arg24[%c0_175, %c0_176], %416 {strides = array<i32>} : memref<2x1xf32, #tpu.memory_space<vmem>>, vector<2x1xf32>,
    return
  }
  func.func @transform_0(%arg0: i32) -> (i32, i32) {
    %c0_i32 = arith.constant 0 : i32
    %c0_i32_0 = arith.constant 0 : i32
    %c0_i32_1 = arith.constant 0 : i32
    return %c0_i32, %c0_i32_0 : i32, i32
  }
  func.func @transform_1(%arg0: i32) -> (i32, i32) {
    %c0_i32 = arith.constant 0 : i32
    %c0_i32_0 = arith.constant 0 : i32
    %c0_i32_1 = arith.constant 0 : i32
    return %c0_i32, %c0_i32_0 : i32, i32
  }
  func.func @transform_2(%arg0: i32) -> (i32, i32) {
    %c0_i32 = arith.constant 0 : i32
    %c0_i32_0 = arith.constant 0 : i32
    %c0_i32_1 = arith.constant 0 : i32
    return %c0_i32, %c0_i32_0 : i32, i32
  }
  func.func @transform_3(%arg0: i32) -> (i32, i32) {
    %c0_i32 = arith.constant 0 : i32
    %c0_i32_0 = arith.constant 0 : i32
    %c0_i32_1 = arith.constant 0 : i32
    return %c0_i32, %c0_i32_0 : i32, i32
  }
  func.func @transform_4(%arg0: i32) -> (i32, i32) {
    %c0_i32 = arith.constant 0 : i32
    %c0_i32_0 = arith.constant 0 : i32
    %c0_i32_1 = arith.constant 0 : i32
    return %c0_i32, %c0_i32_0 : i32, i32
  }
  func.func @transform_5(%arg0: i32) -> (i32, i32, i32) {
    %c0_i32 = arith.constant 0 : i32
    %c0_i32_0 = arith.constant 0 : i32
    %c0_i32_1 = arith.constant 0 : i32
    %c0_i32_2 = arith.constant 0 : i32
    return %c0_i32, %c0_i32_0, %c0_i32_1 : i32, i32, i32
  }
  func.func @transform_6(%arg0: i32) -> (i32, i32, i32) {
    %c0_i32 = arith.constant 0 : i32
    %c0_i32_0 = arith.constant 0 : i32
    %c0_i32_1 = arith.constant 0 : i32
    %c0_i32_2 = arith.constant 0 : i32
    return %c0_i32, %c0_i32_0, %c0_i32_1 : i32, i32, i32
  }
  func.func @transform_7(%arg0: i32) -> (i32, i32, i32) {
    %c0_i32 = arith.constant 0 : i32
    %c0_i32_0 = arith.constant 0 : i32
    %c0_i32_1 = arith.constant 0 : i32
    %c0_i32_2 = arith.constant 0 : i32
    return %c0_i32, %c0_i32_0, %c0_i32_1 : i32, i32, i32
  }
  func.func @transform_8(%arg0: i32) -> (i32, i32, i32) {
    %c0_i32 = arith.constant 0 : i32
    %c0_i32_0 = arith.constant 0 : i32
    %c0_i32_1 = arith.constant 0 : i32
    %c0_i32_2 = arith.constant 0 : i32
    return %c0_i32, %c0_i32_0, %c0_i32_1 : i32, i32, i32
  }
  func.func @transform_9(%arg0: i32) -> (i32, i32, i32) {
    %c0_i32 = arith.constant 0 : i32
    %c0_i32_0 = arith.constant 0 : i32
    %c0_i32_1 = arith.constant 0 : i32
    %c0_i32_2 = arith.constant 0 : i32
    return %c0_i32, %c0_i32_0, %c0_i32_1 : i32, i32, i32
  }
  func.func @transform_10(%arg0: i32) -> (i32, i32, i32) {
    %c0_i32 = arith.constant 0 : i32
    %c0_i32_0 = arith.constant 0 : i32
    %c0_i32_1 = arith.constant 0 : i32
    %c0_i32_2 = arith.constant 0 : i32
    return %c0_i32, %c0_i32_0, %c0_i32_1 : i32, i32, i32
  }
  func.func @transform_11(%arg0: i32) -> (i32, i32, i32) {
    %c0_i32 = arith.constant 0 : i32
    %c0_i32_0 = arith.constant 0 : i32
    %c0_i32_1 = arith.constant 0 : i32
    %c0_i32_2 = arith.constant 0 : i32
    return %c0_i32, %c0_i32_0, %c0_i32_1 : i32, i32, i32
  }
  func.func @transform_12(%arg0: i32) -> (i32, i32, i32) {
    %c0_i32 = arith.constant 0 : i32
    %c0_i32_0 = arith.constant 0 : i32
    %c0_i32_1 = arith.constant 0 : i32
    %c0_i32_2 = arith.constant 0 : i32
    return %c0_i32, %c0_i32_0, %c0_i32_1 : i32, i32, i32
  }
  func.func @transform_13(%arg0: i32) -> (i32, i32, i32) {
    %c0_i32 = arith.constant 0 : i32
    %c0_i32_0 = arith.constant 0 : i32
    %c0_i32_1 = arith.constant 0 : i32
    %c0_i32_2 = arith.constant 0 : i32
    return %c0_i32, %c0_i32_0, %c0_i32_1 : i32, i32, i32
  }
  func.func @transform_14(%arg0: i32) -> (i32, i32, i32) {
    %c0_i32 = arith.constant 0 : i32
    %c0_i32_0 = arith.constant 0 : i32
    %c0_i32_1 = arith.constant 0 : i32
    %c0_i32_2 = arith.constant 0 : i32
    return %c0_i32, %c0_i32_0, %c0_i32_1 : i32, i32, i32
  }
  func.func @transform_15(%arg0: i32) -> (i32, i32, i32) {
    %c0_i32 = arith.constant 0 : i32
    %c0_i32_0 = arith.constant 0 : i32
    %c0_i32_1 = arith.constant 0 : i32
    %c0_i32_2 = arith.constant 0 : i32
    return %c0_i32, %c0_i32_0, %c0_i32_1 : i32, i32, i32
  }
  func.func @transform_16(%arg0: i32) -> (i32, i32, i32) {
    %c0_i32 = arith.constant 0 : i32
    %c0_i32_0 = arith.constant 0 : i32
    %c0_i32_1 = arith.constant 0 : i32
    %c0_i32_2 = arith.constant 0 : i32
    return %c0_i32, %c0_i32_0, %c0_i32_1 : i32, i32, i32
  }
  func.func @transform_17(%arg0: i32) -> (i32, i32) {
    %c0_i32 = arith.constant 0 : i32
    %c0_i32_0 = arith.constant 0 : i32
    %c0_i32_1 = arith.constant 0 : i32
    return %c0_i32, %c0_i32_0 : i32, i32
  }
  func.func @transform_18(%arg0: i32) -> (i32, i32) {
    %c0_i32 = arith.constant 0 : i32
    %c0_i32_0 = arith.constant 0 : i32
    %c0_i32_1 = arith.constant 0 : i32
    return %c0_i32, %c0_i32_0 : i32, i32
  }
  func.func @transform_19(%arg0: i32) -> (i32, i32) {
    %c0_i32 = arith.constant 0 : i32
    %c0_i32_0 = arith.constant 0 : i32
    %c0_i32_1 = arith.constant 0 : i32
    return %c0_i32, %c0_i32_0 : i32, i32
  }
  func.func @transform_20(%arg0: i32) -> (i32, i32) {
    %c0_i32 = arith.constant 0 : i32
    %c0_i32_0 = arith.constant 0 : i32
    %c0_i32_1 = arith.constant 0 : i32
    return %c0_i32, %c0_i32_0 : i32, i32
  }
  func.func @transform_21(%arg0: i32) -> (i32, i32) {
    %c0_i32 = arith.constant 0 : i32
    %c0_i32_0 = arith.constant 0 : i32
    %c0_i32_1 = arith.constant 0 : i32
    return %c0_i32, %c0_i32_0 : i32, i32
  }
  func.func @transform_22(%arg0: i32) -> (i32, i32) {
    %c0_i32 = arith.constant 0 : i32
    %c0_i32_0 = arith.constant 0 : i32
    %c0_i32_1 = arith.constant 0 : i32
    return %c0_i32, %c0_i32_0 : i32, i32
  }
  func.func @transform_23(%arg0: i32) -> (i32, i32) {
    %c0_i32 = arith.constant 0 : i32
    %c0_i32_0 = arith.constant 0 : i32
    %c0_i32_1 = arith.constant 0 : i32
    return %c0_i32, %c0_i32_0 : i32, i32
  }
}

</mosaic_0001>

<bundles_post_ra>
// kernel: forward.1
= control target key start
LH: loop header
LB: loop body
LE: loop exit
PB: predicated region body
PF: predicated region fallthrough
CT: control target
= control target key end

     0   :  { %vm108_vm0 = vcmask 523264   ;;  %vm188_vm1 = vcmask 261120   ;;  %vm430_vm2 = vcmask 64512   ;;  %s10535_s29 = smov 96   ;;  %vm789_vm3 = vcmask 130048   ;;  %s13045_s30 = smov 56   ;;  %s13002_s1 = inlined_call_operand.vmem [shape: f32[64,32], index: 1, kind: input, shape index: {}]   ;;  %s13003_s0 = inlined_call_operand.vmem [shape: f32[64,64], index: 0, kind: input, shape index: {}]   ;;  %s13004_s2 = inlined_call_operand.vmem [shape: f32[1,32], index: 2, kind: input, shape index: {}]   ;;  %s13005_s5 = inlined_call_operand.vmem [shape: f32[2,32,96], index: 5, kind: input, shape index: {}]   ;;  %s13006_s3 = inlined_call_operand.vmem [shape: f32[1,32], index: 3, kind: input, shape index: {}]   ;;  %s13007_s4 = inlined_call_operand.vmem [shape: f32[1,32], index: 4, kind: input, shape index: {}]   ;;  %s13008_s6 = inlined_call_operand.vmem [shape: f32[2,1,96], index: 6, kind: input, shape index: {}]   ;;  %s13009_s7 = inlined_call_operand.vmem [shape: f32[2,32,32], index: 7, kind: input, shape index: {}]   ;;  %s13010_s8 = inlined_call_operand.vmem [shape: f32[2,1,32], index: 8, kind: input, shape index: {}]   ;;  %s13011_s11 = inlined_call_operand.vmem [shape: f32[2,32,64], index: 11, kind: input, shape index: {}]   ;;  %s13012_s9 = inlined_call_operand.vmem [shape: f32[2,1,32], index: 9, kind: input, shape index: {}]   ;;  %s13013_s10 = inlined_call_operand.vmem [shape: f32[2,1,32], index: 10, kind: input, shape index: {}]   ;;  %s13014_s13 = inlined_call_operand.vmem [shape: f32[2,64,32], index: 13, kind: input, shape index: {}]   ;;  %s13015_s12 = inlined_call_operand.vmem [shape: f32[2,1,64], index: 12, kind: input, shape index: {}]   ;;  %s13016_s14 = inlined_call_operand.vmem [shape: f32[2,1,32], index: 14, kind: input, shape index: {}]   ;;  %s13017_s15 = inlined_call_operand.vmem [shape: f32[2,1,32], index: 15, kind: input, shape index: {}]   ;;  %s13018_s16 = inlined_call_operand.vmem [shape: f32[2,1,32], index: 16, kind: input, shape index: {}]   ;;  %s13019_s17 = inlined_call_operand.vmem [shape: f32[64,100], index: 17, kind: input, shape index: {}]   ;;  %s13020_s19 = inlined_call_operand.vmem [shape: f32[100,100], index: 19, kind: input, shape index: {}]   ;;  %s13021_s21 = inlined_call_operand.vmem [shape: f32[100,1], index: 21, kind: input, shape index: {}]   ;;  %s13022_s18 = inlined_call_operand.vmem [shape: f32[1,100], index: 18, kind: input, shape index: {}]   ;;  %s13023_s22 = inlined_call_operand.<no memory space> [shape: f32[1,1], index: 22, kind: input, shape index: {}]   ;;  %s13024_s20 = inlined_call_operand.vmem [shape: f32[1,100], index: 20, kind: input, shape index: {}]   ;;  %s13025_s23 = inlined_call_operand.vmem [shape: f32[2,1], index: 23, kind: output, shape index: {}]  }
   0x1   :  { %13051 = sst [smem:[#allocation3_spill]] %s13002_s1  ;;  %s13047_s1 = smov 120   ;;  %vm3738_vm4 = vcmask 195584   ;;  %vm10550_vm5 = vmmov 0   ;;  %vm8666_vm6 = vcmask 1041408   ;;  %vm8530_vm7 = vcmask 1041409  }
   0x2   :  { %13052 = sst [smem:[#allocation4_spill]] %s13003_s0  ;;  %s13043_s25 = smov 80   ;;  %vm8662_vm8 = vcmask 818176   ;;  %vm8785_vm9 = vcmask 1024  }
   0x3   :  { %13053 = sst [smem:[#allocation5_spill]] %s13004_s2  ;;  %s13037_s26 = smov 72  }
   0x4   :  { %13054 = sst [smem:[#allocation6_spill]] %s13005_s5  ;;  %s10536_s5 = smov 64  }
   0x5   :  { %13055 = sst [smem:[#allocation7_spill]] %s13006_s3  ;;  %s13035_s2 = smov 104  }
   0x6   :  { %13056 = sst [smem:[#allocation8_spill]] %s13007_s4  ;;  %s13041_s4 = smov 112  }
   0x7   :  { %13057 = sst [smem:[#allocation9_spill]] %s13008_s6  ;;  %s10547_s27 = smov 16  }
   0x8   :  { %13058 = sst [smem:[#allocation10_spill]] %s13009_s7 }
   0x9   :  { %s13059_s24 = sld [smem:[#allocation3_spill]] }
   0xa   :  { %s13060_s3 = sld [smem:[#allocation4_spill]] }
   0xb   :  { %s13061_s6 = sld [smem:[#allocation5_spill]] }
   0xc   :  { %s13062_s7 = sld [smem:[#allocation6_spill]] }
   0xd   :  { %s13063_s0 = sld [smem:[#allocation7_spill]] }
   0xe   :  { %s13065_s28 = sld [smem:[#allocation9_spill]] }
   0xf   :  { %v91_v0 = vld [vmem:[%s13059_s24 + $0x30] sm:$0xff]  ;;  %v92_v1 = vld [vmem:[%s13059_s24 + $0x38] sm:$0xff]  ;;  %v89_v2 = vld [vmem:[%s13059_s24 + $0x20] sm:$0xff] }
  0x10   :  { %v100_v3 = vpack.c.bf16 %v92_v1, %v91_v0  ;;  %v90_v4 = vld [vmem:[%s13059_s24 + $0x28] sm:$0xff]  ;;  %v87_v6 = vld [vmem:[%s13059_s24 + $0x10] sm:$0xff]  ;;  %v88_v7 = vld [vmem:[%s13059_s24 + $0x18] sm:$0xff] }
  0x11   :  { %v99_v5 = vpack.c.bf16 %v90_v4, %v89_v2  ;;  %v77_v8 = vld [vmem:[%s13060_s3] sm:$0xff]  ;;  %v78_v9 = vld [vmem:[%s13060_s3 + $0x8] sm:$0xff]  ;;  %v98_v11 = vpack.c.bf16 %v88_v7, %v87_v6  ;;  %v79_v15 = vld [vmem:[%s13060_s3 + $0x10] sm:$0xff] }
  0x12   :  { %9411 = vmatprep.subr.bf16.mxu0 %v100_v3  ;;  %v93_v10 = vpack.c.bf16 %v78_v9, %v77_v8  ;;  %v85_v12 = vld [vmem:[%s13059_s24] sm:$0xff]  ;;  %v86_v13 = vld [vmem:[%s13059_s24 + $0x8] sm:$0xff]  ;;  %v80_v16 = vld [vmem:[%s13060_s3 + $0x18] sm:$0xff]  ;;  %s10537_s24 = smov 88  }
  0x13   :  { %9412 = vmatpush3.bf16.msra.mxu0 %v100_v3  ;;  %v97_v14 = vpack.c.bf16 %v86_v13, %v85_v12  ;;  %v81_v17 = vld [vmem:[%s13060_s3 + $0x20] sm:$0xff]  ;;  %v82_v18 = vld [vmem:[%s13060_s3 + $0x28] sm:$0xff]  ;;  %v94_v19 = vpack.c.bf16 %v80_v16, %v79_v15  ;;  %v83_v21 = vld [vmem:[%s13060_s3 + $0x30] sm:$0xff] }
  0x14   :  { %9413 = vmatprep.subr.bf16.mxu0 %v99_v5  ;;  %9419 = vmatprep.mubr.msk.bf16.mxu0 %vm108_vm0, %v93_v10  ;;  %v95_v20 = vpack.c.bf16 %v82_v18, %v81_v17  ;;  %v84_v22 = vld [vmem:[%s13060_s3 + $0x38] sm:$0xff]  ;;  %v8791_v24 = vld [vmem:[%s13061_s6] ss:$0 sm:$0xff]  ;;  %s13064_s6 = sld [smem:[#allocation8_spill]]  ;;  %s13031_s3 = smov 8  }
  0x15   :  { %v96_v23 = vpack.c.bf16 %v84_v22, %v83_v21 }
  0x17   :  { %9414 = vmatpush3.bf16.msra.mxu0 %v99_v5 }
  0x18   :  { %9415 = vmatprep.subr.bf16.mxu0 %v98_v11 }
  0x1b   :  { %9416 = vmatpush3.bf16.msra.mxu0 %v98_v11 }
  0x1c   :  { %9417 = vmatprep.subr.bf16.mxu0 %v97_v14 }
  0x1f   :  { %9418 = vmatpush3.bf16.msra.mxu0 %v97_v14 }
  0x22   :  { %9420 = vmatmul.mubr.msk.bf16.vlgmr.msra.gmra.mxu0 %vm108_vm0, %v94_v19 }
  0x23   :  { %9423 = vmatprep.mubr.msk.bf16.mxu0 %vm108_vm0, %v95_v20 }
  0x2a   :  { %9424 = vmatmul.mubr.msk.bf16.gmra.mxu0 %vm108_vm0, %v96_v23 }
  0xe2   :  { %v9421_v25 = vpop.f32.mrf.mxu0 }
  0xe3   :  { %v164_v26 = vadd.f32 %v9421_v25, %v8791_v24  ;;  %v324_v25 = vld [vmem:[%s13062_s7 + $0x10] sm:$0xff] }
  0xe4   :  { %v155_v27 = vpop.f32.mrf.mxu0 }
  0xe5   :  { %v156_v28 = vadd.f32 %v8791_v24, %v155_v27  ;;  %v195_v29 = vsel %vm188_vm1, %v164_v26, 0.0  ;;  %v322_v27 = vld [vmem:[%s13062_s7] sm:$0xff] }
  0xe6   :  { %196 = vadd.xlane.f32.xlu1 %v195_v29  ;;  %v9422_v30 = vpop.f32.mrf.mxu0  ;;  %v323_v29 = vld [vmem:[%s13062_s7 + $0x8] sm:$0xff] }
  0xe7   :  { %v167_v31 = vadd.f32 %v9422_v30, %v8791_v24  ;;  %v189_v32 = vsel %vm188_vm1, %v156_v28, 0.0  ;;  %v330_v30 = vpack.c.bf16 %v323_v29, %v322_v27 }
  0xe8   :  { %v158_v33 = vpop.f32.mrf.mxu0  ;;  %190 = vadd.xlane.f32.xlu0 %v189_v32 }
  0xe9   :  { %v159_v34 = vadd.f32 %v8791_v24, %v158_v33  ;;  %v198_v35 = vsel %vm188_vm1, %v167_v31, 0.0 }
  0xea   :  { %199 = vadd.xlane.f32.xlu1 %v198_v35  ;;  %v9425_v36 = vpop.f32.mrf.mxu0 }
  0xeb   :  { %v192_v37 = vsel %vm188_vm1, %v159_v34, 0.0  ;;  %v180_v41 = vadd.f32 %v9425_v36, %v8791_v24 }
  0xec   :  { %v171_v38 = vpop.f32.mrf.mxu0  ;;  %193 = vadd.xlane.f32.xlu0 %v192_v37 }
  0xed   :  { %v172_v39 = vadd.f32 %v8791_v24, %v171_v38  ;;  %v207_v47 = vsel %vm188_vm1, %v180_v41, 0.0 }
  0xee   :  { %v9426_v40 = vpop.f32.mrf.mxu0 }
  0xef   :  { %v201_v42 = vsel %vm188_vm1, %v172_v39, 0.0  ;;  %v183_v45 = vadd.f32 %v9426_v40, %v8791_v24 }
  0xf0   :  { %v174_v43 = vpop.f32.mrf.mxu0  ;;  %202 = vadd.xlane.f32.xlu0 %v201_v42 }
  0xf1   :  { %v175_v44 = vadd.f32 %v8791_v24, %v174_v43  ;;  %v210_v48 = vsel %vm188_vm1, %v183_v45, 0.0 }
  0xf3   :  { %v204_v46 = vsel %vm188_vm1, %v175_v44, 0.0 }
  0xf4   :  { %205 = vadd.xlane.f32.xlu1 %v204_v46  ;;  %208 = vadd.xlane.f32.xlu0 %v207_v47 }
  0xf8   :  { %211 = vadd.xlane.f32.xlu1 %v210_v48 }
 0x16f   :  { %v197_v49 = vpop.xlane.xlu1 %196 }
 0x170   :  { %v216_v50 = vmul.f32 0.03125, %v197_v49 }
 0x171   :  { %v191_v51 = vpop.xlane.xlu0 %190 }
 0x172   :  { %v214_v52 = vmul.f32 0.03125, %v191_v51  ;;  %v10734_v54 = vsub.f32 %v164_v26, %v216_v50  ;;  %v325_v26 = vld [vmem:[%s13062_s7 + $0x18] sm:$0xff] }
 0x173   :  { %v200_v53 = vpop.xlane.xlu1 %199 }
 0x174   :  { %v10736_v55 = vsub.f32 %v156_v28, %v214_v52  ;;  %v217_v56 = vmul.f32 0.03125, %v200_v53  ;;  %v232_v63 = vmul.f32 %v10734_v54, %v10734_v54  ;;  %v331_v28 = vpack.c.bf16 %v325_v26, %v324_v25 }
 0x175   :  { %v194_v57 = vpop.xlane.xlu0 %193 }
 0x176   :  { %v215_v58 = vmul.f32 0.03125, %v194_v57  ;;  %v230_v59 = vmul.f32 %v10736_v55, %v10736_v55  ;;  %v10740_v60 = vsub.f32 %v167_v31, %v217_v56  ;;  %v244_v4 = vsel %vm188_vm1, %v232_v63, 0.0  ;;  %9427 = vmatprep.subr.bf16.mxu1 %v331_v28 }
 0x177   :  { %9428 = vmatpush3.bf16.msra.mxu1 %v331_v28 }
 0x178   :  { %v10742_v61 = vsub.f32 %v159_v34, %v215_v58  ;;  %v238_v62 = vsel %vm188_vm1, %v230_v59, 0.0  ;;  %v233_v6 = vmul.f32 %v10740_v60, %v10740_v60  ;;  %9429 = vmatprep.subr.bf16.mxu1 %v330_v30  ;;  %v8796_v59 = vld [vmem:[%s13063_s0] ss:$0 sm:$0xff]  ;;  %s13039_s0 = smov 48  }
 0x179   :  { %239 = vadd.xlane.f32.xlu0 %v238_v62  ;;  %v203_v0 = vpop.xlane.xlu0 %202 }
 0x17a   :  { %v218_v1 = vmul.f32 0.03125, %v203_v0  ;;  %v231_v2 = vmul.f32 %v10742_v61, %v10742_v61  ;;  %v247_v14 = vsel %vm188_vm1, %v233_v6, 0.0 }
 0x17b   :  { %9430 = vmatpush3.bf16.msra.mxu1 %v330_v30 }
 0x17c   :  { %v10749_v3 = vsub.f32 %v172_v39, %v218_v1  ;;  %v241_v5 = vsel %vm188_vm1, %v231_v2, 0.0  ;;  %v8797_v2 = vld [vmem:[%s13064_s6] ss:$0 sm:$0xff]  ;;  %s13033_s6 = smov 40  }
 0x17d   :  { %v206_v7 = vpop.xlane.xlu1 %205  ;;  %245 = vadd.xlane.f32.xlu0 %v244_v4  ;;  %242 = vadd.xlane.f32.xlu1 %v241_v5  ;;  %v209_v8 = vpop.xlane.xlu0 %208 }
 0x17e   :  { %v219_v9 = vmul.f32 0.03125, %v206_v7  ;;  %v220_v10 = vmul.f32 0.03125, %v209_v8  ;;  %v234_v11 = vmul.f32 %v10749_v3, %v10749_v3 }
 0x180   :  { %v10757_v12 = vsub.f32 %v175_v44, %v219_v9  ;;  %v10759_v13 = vsub.f32 %v180_v41, %v220_v10  ;;  %v250_v15 = vsel %vm188_vm1, %v234_v11, 0.0 }
 0x181   :  { %v212_v16 = vpop.xlane.xlu1 %211  ;;  %248 = vadd.xlane.f32.xlu1 %v247_v14  ;;  %251 = vadd.xlane.f32.xlu0 %v250_v15 }
 0x182   :  { %v221_v17 = vmul.f32 0.03125, %v212_v16  ;;  %v235_v18 = vmul.f32 %v10757_v12, %v10757_v12  ;;  %v236_v19 = vmul.f32 %v10759_v13, %v10759_v13 }
 0x184   :  { %v10767_v20 = vsub.f32 %v183_v45, %v221_v17  ;;  %v253_v21 = vsel %vm188_vm1, %v235_v18, 0.0  ;;  %v256_v22 = vsel %vm188_vm1, %v236_v19, 0.0 }
 0x185   :  { %254 = vadd.xlane.f32.xlu1 %v253_v21  ;;  %257 = vadd.xlane.f32.xlu0 %v256_v22 }
 0x186   :  { %v237_v23 = vmul.f32 %v10767_v20, %v10767_v20 }
 0x188   :  { %v259_v24 = vsel %vm188_vm1, %v237_v23, 0.0 }
 0x189   :  { %260 = vadd.xlane.f32.xlu1 %v259_v24 }
 0x202   :  { %v240_v31 = vpop.xlane.xlu0 %239 }
 0x203   :  { %v262_v32 = vmul.f32 0.03125, %v240_v31 }
 0x205   :  { %v270_v33 = vadd.f32 1e-05, %v262_v32 }
 0x206   :  { %v243_v34 = vpop.xlane.xlu1 %242  ;;  %v246_v35 = vpop.xlane.xlu0 %245 }
 0x207   :  { %10167 = vrsqrt.f32 %v270_v33  ;;  %v263_v36 = vmul.f32 0.03125, %v243_v34  ;;  %v264_v37 = vmul.f32 0.03125, %v246_v35 }
 0x209   :  { %v271_v38 = vadd.f32 1e-05, %v263_v36  ;;  %v272_v39 = vadd.f32 1e-05, %v264_v37 }
 0x20a   :  { %v249_v40 = vpop.xlane.xlu1 %248  ;;  %v252_v41 = vpop.xlane.xlu0 %251 }
 0x20b   :  { %10169 = vrsqrt.f32 %v271_v38  ;;  %v265_v42 = vmul.f32 0.03125, %v249_v40  ;;  %v266_v43 = vmul.f32 0.03125, %v252_v41 }
 0x20c   :  { %10171 = vrsqrt.f32 %v272_v39 }
 0x20d   :  { %v273_v44 = vadd.f32 1e-05, %v265_v42  ;;  %v274_v45 = vadd.f32 1e-05, %v266_v43 }
 0x20e   :  { %v255_v46 = vpop.xlane.xlu1 %254  ;;  %v258_v47 = vpop.xlane.xlu0 %257 }
 0x20f   :  { %10173 = vrsqrt.f32 %v273_v44  ;;  %v267_v48 = vmul.f32 0.03125, %v255_v46  ;;  %v268_v49 = vmul.f32 0.03125, %v258_v47 }
 0x210   :  { %10175 = vrsqrt.f32 %v274_v45 }
 0x211   :  { %v275_v50 = vadd.f32 1e-05, %v267_v48  ;;  %v276_v51 = vadd.f32 1e-05, %v268_v49 }
 0x212   :  { %v261_v52 = vpop.xlane.xlu1 %260 }
 0x213   :  { %10177 = vrsqrt.f32 %v275_v50  ;;  %v269_v53 = vmul.f32 0.03125, %v261_v52 }
 0x214   :  { %v10168_v56 = vpop.eup %10167  ;;  %10179 = vrsqrt.f32 %v276_v51 }
 0x215   :  { %v277_v57 = vadd.f32 1e-05, %v269_v53  ;;  %v286_v58 = vmul.f32 %v10168_v56, %v10736_v55 }
 0x217   :  { %10181 = vrsqrt.f32 %v277_v57  ;;  %v300_v1 = vmul.f32 %v8796_v59, %v286_v58 }
 0x218   :  { %v10170_v62 = vpop.eup %10169 }
 0x219   :  { %v10172_v63 = vpop.eup %10171  ;;  %v287_v0 = vmul.f32 %v10170_v62, %v10742_v61  ;;  %v10795_v55 = vadd.f32 %v8797_v2, %v300_v1 }
 0x21a   :  { %v288_v4 = vmul.f32 %v10172_v63, %v10734_v54 }
 0x21b   :  { %v301_v5 = vmul.f32 %v8796_v59, %v287_v0 }
 0x21c   :  { %v10174_v6 = vpop.eup %10173  ;;  %v302_v10 = vmul.f32 %v8796_v59, %v288_v4 }
 0x21d   :  { %v10176_v7 = vpop.eup %10175  ;;  %v10797_v8 = vadd.f32 %v8797_v2, %v301_v5  ;;  %v289_v9 = vmul.f32 %v10174_v6, %v10740_v60 }
 0x21e   :  { %v290_v11 = vmul.f32 %v10176_v7, %v10749_v3  ;;  %v10804_v54 = vadd.f32 %v8797_v2, %v302_v10 }
 0x21f   :  { %v326_v61 = vpack.c.bf16 %v10797_v8, %v10795_v55  ;;  %v303_v14 = vmul.f32 %v8796_v59, %v289_v9 }
 0x220   :  { %v10178_v15 = vpop.eup %10177  ;;  %v304_v19 = vmul.f32 %v8796_v59, %v290_v11 }
 0x221   :  { %v10180_v16 = vpop.eup %10179  ;;  %9431 = vmatprep.mubr.msk.bf16.mxu1 %vm188_vm1, %v326_v61  ;;  %v10806_v17 = vadd.f32 %v8797_v2, %v303_v14  ;;  %v291_v18 = vmul.f32 %v10178_v15, %v10757_v12 }
 0x222   :  { %v292_v60 = vmul.f32 %v10180_v16, %v10759_v13  ;;  %v10813_v23 = vadd.f32 %v8797_v2, %v304_v19 }
 0x223   :  { %v327_v3 = vpack.c.bf16 %v10806_v17, %v10804_v54  ;;  %v305_v21 = vmul.f32 %v8796_v59, %v291_v18 }
 0x224   :  { %v10182_v22 = vpop.eup %10181  ;;  %v306_v26 = vmul.f32 %v8796_v59, %v292_v60 }
 0x225   :  { %9432 = vmatmul.mubr.msk.bf16.vlgmr.msra.gmra.mxu1 %vm188_vm1, %v327_v3  ;;  %v10815_v24 = vadd.f32 %v8797_v2, %v305_v21  ;;  %v293_v25 = vmul.f32 %v10182_v22, %v10767_v20  ;;  %v8798_v20 = vld [vmem:[%s13065_s28] ss:$0 sm:$0xff] }
 0x226   :  { %v10821_v13 = vadd.f32 %v8797_v2, %v306_v26 }
 0x227   :  { %v328_v12 = vpack.c.bf16 %v10815_v24, %v10813_v23  ;;  %v307_v27 = vmul.f32 %v8796_v59, %v293_v25 }
 0x229   :  { %9435 = vmatprep.mubr.msk.bf16.mxu1 %vm188_vm1, %v328_v12  ;;  %v10823_v28 = vadd.f32 %v8797_v2, %v307_v27 }
 0x22b   :  { %v329_v29 = vpack.c.bf16 %v10823_v28, %v10821_v13 }
 0x22d   :  { %9436 = vmatmul.mubr.msk.bf16.gmra.mxu1 %vm188_vm1, %v329_v29 }
 0x2e5   :  { %v9433_v30 = vpop.f32.mrf.mxu1 }
 0x2e6   :  { %v10831_v31 = vadd.f32 %v9433_v30, %v8798_v20 }
 0x2e7   :  { %v385_v32 = vpop.f32.mrf.mxu1 }
 0x2e8   :  { %v10833_v33 = vadd.f32 %v8798_v20, %v385_v32  ;;  %v10836_v34 = vmul.f32 0.35355338, %v10831_v31 }
 0x2e9   :  { %v9434_v35 = vpop.f32.mrf.mxu1 }
 0x2ea   :  { %v10838_v36 = vadd.f32 %v9434_v35, %v8798_v20  ;;  %9450 = vmatprep.mubr.msk.f32.mxu0 %vm430_vm2, %v10836_v34  ;;  %v10843_v37 = vmul.f32 0.35355338, %v10833_v33 }
 0x2eb   :  { %v388_v38 = vpop.f32.mrf.mxu1 }
 0x2ec   :  { %v10845_v39 = vadd.f32 %v8798_v20, %v388_v38  ;;  %520 = vrot.lane.b32.xlu1 %v10838_v36, %s10535_s29  ;;  %9443 = vmatprep.mubr.msk.f32.mxu1 %vm430_vm2, %v10843_v37  ;;  %v10891_v57 = vmul.f32 0.35355338, %v10838_v36 }
 0x2ed   :  { %v9437_v40 = vpop.f32.mrf.mxu1 }
 0x2ee   :  { %428 = vrot.lane.b32.xlu0 %v10845_v39, %s10535_s29  ;;  %v10867_v47 = vadd.f32 %v9437_v40, %v8798_v20  ;;  %v10881_v52 = vmul.f32 0.35355338, %v10845_v39 }
 0x2ef   :  { %v401_v41 = vpop.f32.mrf.mxu1 }
 0x2f0   :  { %426 = vrot.lane.b32.xlu1 %v10833_v33, %s10535_s29  ;;  %v10863_v46 = vadd.f32 %v8798_v20, %v401_v41  ;;  %v10897_v59 = vmul.f32 0.35355338, %v10867_v47 }
 0x2f1   :  { %v9438_v42 = vpop.f32.mrf.mxu1 }
 0x2f2   :  { %v10859_v45 = vadd.f32 %v9438_v42, %v8798_v20  ;;  %v10885_v56 = vmul.f32 0.35355338, %v10863_v46 }
 0x2f3   :  { %v404_v43 = vpop.f32.mrf.mxu1 }
 0x2f4   :  { %v10855_v44 = vadd.f32 %v8798_v20, %v404_v43  ;;  %518 = vrot.lane.b32.xlu1 %v10831_v31, %s10535_s29  ;;  %v10915_v1 = vmul.f32 0.35355338, %v10859_v45 }
 0x2f6   :  { %611 = vrot.lane.b32.xlu0 %v10855_v44, %s10535_s29  ;;  %v10909_v0 = vmul.f32 0.35355338, %v10855_v44 }
 0x2f8   :  { %702 = vrot.lane.b32.xlu1 %v10859_v45, %s10535_s29 }
 0x2fa   :  { %609 = vrot.lane.b32.xlu0 %v10863_v46, %s10535_s29 }
 0x2fc   :  { %700 = vrot.lane.b32.xlu1 %v10867_v47, %s10535_s29 }
 0x35e   :  { %v521_v48 = vpop.permute.xlu1 %520 }
 0x35f   :  { %9446 = vmatprep.subr.msk.mxu0 %vm430_vm2, %v521_v48 }
 0x360   :  { %9447 = vmatpush3.xpose.msk.msra.mxu0 %vm430_vm2, %v521_v48  ;;  %v429_v49 = vpop.permute.xlu0 %428 }
 0x361   :  { %9439 = vmatprep.subr.msk.mxu1 %vm430_vm2, %v429_v49 }
 0x362   :  { %v427_v50 = vpop.permute.xlu1 %426  ;;  %9440 = vmatpush3.xpose.msk.msra.mxu1 %vm430_vm2, %v429_v49 }
 0x363   :  { %9441 = vmatprep.subr.msk.mxu1 %vm430_vm2, %v427_v50 }
 0x366   :  { %v519_v51 = vpop.permute.xlu1 %518  ;;  %9442 = vmatpush3.xpose.msk.msra.mxu1 %vm430_vm2, %v427_v50 }
 0x367   :  { %9448 = vmatprep.subr.msk.mxu0 %vm430_vm2, %v519_v51 }
 0x368   :  { %9449 = vmatpush3.xpose.msk.msra.mxu0 %vm430_vm2, %v519_v51  ;;  %v612_v53 = vpop.permute.xlu0 %611 }
 0x369   :  { %9444 = vmatmul.mubr.msk.f32.vlgmr.msra.gmra.mxu1 %vm430_vm2, %v10881_v52  ;;  %9453 = vmatprep.subr.msk.mxu1 %vm430_vm2, %v612_v53 }
 0x36a   :  { %v703_v58 = vpop.permute.xlu1 %702  ;;  %9454 = vmatpush3.xpose.msk.msra.mxu1 %vm430_vm2, %v612_v53  ;;  %9457 = vmatprep.mubr.msk.f32.mxu1 %vm430_vm2, %v10885_v56 }
 0x36b   :  { %9451 = vmatmul.mubr.msk.f32.vlgmr.msra.gmra.mxu0 %vm430_vm2, %v10891_v57  ;;  %9460 = vmatprep.subr.msk.mxu0 %vm430_vm2, %v703_v58 }
 0x36c   :  { %9461 = vmatpush3.xpose.msk.msra.mxu0 %vm430_vm2, %v703_v58  ;;  %9464 = vmatprep.mubr.msk.f32.mxu0 %vm430_vm2, %v10897_v59  ;;  %v610_v62 = vpop.permute.xlu0 %609 }
 0x36d   :  { %9455 = vmatprep.subr.msk.mxu1 %vm430_vm2, %v610_v62 }
 0x36e   :  { %v701_v63 = vpop.permute.xlu1 %700  ;;  %9456 = vmatpush3.xpose.msk.msra.mxu1 %vm430_vm2, %v610_v62 }
 0x36f   :  { %9462 = vmatprep.subr.msk.mxu0 %vm430_vm2, %v701_v63 }
 0x370   :  { %9463 = vmatpush3.xpose.msk.msra.mxu0 %vm430_vm2, %v701_v63 }
 0x371   :  { %9458 = vmatmul.mubr.msk.f32.vlgmr.msra.gmra.mxu1 %vm430_vm2, %v10909_v0 }
 0x373   :  { %9465 = vmatmul.mubr.msk.f32.vlgmr.msra.gmra.mxu0 %vm430_vm2, %v10915_v1 }
 0x429   :  { %v9445_v2 = vpop.f32.mrf.mxu1 }
 0x42a   :  { %v793_v4 = vsel %vm789_vm3, %v9445_v2, -inf }
 0x42b   :  { %v9452_v5 = vpop.f32.mrf.mxu0  ;;  %794 = vmax.xlane.f32.xlu1 %v793_v4  ;;  %v507_v9 = vpop.f32.mrf.mxu1 }
 0x42c   :  { %v799_v6 = vsel %vm789_vm3, %v9452_v5, -inf  ;;  %v790_v15 = vsel %vm789_vm3, %v507_v9, -inf }
 0x42d   :  { %v598_v7 = vpop.f32.mrf.mxu0  ;;  %800 = vmax.xlane.f32.xlu0 %v799_v6 }
 0x42e   :  { %v796_v10 = vsel %vm789_vm3, %v598_v7, -inf }
 0x431   :  { %797 = vmax.xlane.f32.xlu0 %v796_v10  ;;  %v9459_v11 = vpop.f32.mrf.mxu1 }
 0x432   :  { %v805_v61 = vsel %vm789_vm3, %v9459_v11, -inf }
 0x433   :  { %v9466_v14 = vpop.f32.mrf.mxu0  ;;  %806 = vmax.xlane.f32.xlu1 %v805_v61  ;;  %v689_v16 = vpop.f32.mrf.mxu1 }
 0x434   :  { %v811_v18 = vsel %vm789_vm3, %v9466_v14, -inf  ;;  %v802_v19 = vsel %vm789_vm3, %v689_v16, -inf }
 0x435   :  { %791 = vmax.xlane.f32.xlu0 %v790_v15  ;;  %v780_v60 = vpop.f32.mrf.mxu0 }
 0x436   :  { %v808_v3 = vsel %vm789_vm3, %v780_v60, -inf }
 0x437   :  { %812 = vmax.xlane.f32.xlu1 %v811_v18 }
 0x439   :  { %803 = vmax.xlane.f32.xlu0 %v802_v19 }
 0x43d   :  { %809 = vmax.xlane.f32.xlu0 %v808_v3 }
 0x448   :  { %967 = vrot.lane.b32.xlu1 %v10838_v36, %s10536_s5 }
 0x44c   :  { %878 = vrot.lane.b32.xlu1 %v10833_v33, %s10536_s5 }
 0x450   :  { %965 = vrot.lane.b32.xlu1 %v10831_v31, %s10536_s5 }
 0x453   :  { %880 = vrot.lane.b32.xlu0 %v10845_v39, %s10536_s5 }
 0x454   :  { %1141 = vrot.lane.b32.xlu1 %v10859_v45, %s10536_s5 }
 0x457   :  { %1054 = vrot.lane.b32.xlu0 %v10855_v44, %s10536_s5 }
 0x458   :  { %1139 = vrot.lane.b32.xlu1 %v10867_v47, %s10536_s5 }
 0x45b   :  { %1052 = vrot.lane.b32.xlu0 %v10863_v46, %s10536_s5 }
 0x45c   :  { %1323 = vrot.lane.b32.xlu1 %v10838_v36, %s10537_s24 }
 0x45f   :  { %1232 = vrot.lane.b32.xlu0 %v10845_v39, %s10537_s24 }
 0x460   :  { %1321 = vrot.lane.b32.xlu1 %v10831_v31, %s10537_s24 }
 0x463   :  { %1230 = vrot.lane.b32.xlu0 %v10833_v33, %s10537_s24 }
 0x464   :  { %1414 = vrot.lane.b32.xlu1 %v10855_v44, %s10537_s24 }
 0x467   :  { %1226 = vrot.lane.b32.xlu0 %v10843_v37, %s13047_s1 }
 0x4b4   :  { %v795_v21 = vpop.xlane.xlu1 %794 }
 0x4b5   :  { %v815_v22 = vsub.f32 %v9445_v2, %v795_v21 }
 0x4b6   :  { %v801_v25 = vpop.xlane.xlu0 %800 }
 0x4b7   :  { %v817_v26 = vsub.f32 %v9452_v5, %v801_v25  ;;  %v824_v12 = vmul.f32 1.442695, %v815_v22 }
 0x4b9   :  { %v828_v27 = vmul.f32 1.442695, %v817_v26 }
 0x4ba   :  { %v798_v29 = vpop.xlane.xlu0 %797 }
 0x4bb   :  { %10183 = vpow2.f32 %v828_v27  ;;  %v816_v20 = vsub.f32 %v598_v7, %v798_v29 }
 0x4bc   :  { %v807_v30 = vpop.xlane.xlu1 %806  ;;  %10185 = vpow2.f32 %v824_v12 }
 0x4bd   :  { %v826_v32 = vmul.f32 1.442695, %v816_v20  ;;  %v819_v38 = vsub.f32 %v9459_v11, %v807_v30 }
 0x4be   :  { %v792_v35 = vpop.xlane.xlu0 %791 }
 0x4bf   :  { %10187 = vpow2.f32 %v826_v32  ;;  %v814_v40 = vsub.f32 %v507_v9, %v792_v35  ;;  %v832_v49 = vmul.f32 1.442695, %v819_v38 }
 0x4c0   :  { %v813_v41 = vpop.xlane.xlu1 %812 }
 0x4c1   :  { %v822_v42 = vmul.f32 1.442695, %v814_v40  ;;  %v821_v43 = vsub.f32 %v9466_v14, %v813_v41 }
 0x4c2   :  { %v804_v48 = vpop.xlane.xlu0 %803 }
 0x4c3   :  { %10189 = vpow2.f32 %v822_v42  ;;  %v836_v50 = vmul.f32 1.442695, %v821_v43  ;;  %v818_v53 = vsub.f32 %v689_v16, %v804_v48 }
 0x4c4   :  { %v968_v51 = vpop.permute.xlu1 %967 }
 0x4c5   :  { %10191 = vpow2.f32 %v836_v50  ;;  %9474 = vmatprep.subr.mxu1 %v968_v51  ;;  %v830_v4 = vmul.f32 1.442695, %v818_v53 }
 0x4c6   :  { %9475 = vmatpush3.msra.mxu1 %v968_v51  ;;  %v810_v58 = vpop.xlane.xlu0 %809  ;;  %10193 = vpow2.f32 %v832_v49 }
 0x4c7   :  { %v820_v62 = vsub.f32 %v780_v60, %v810_v58 }
 0x4c8   :  { %v10955_v63 = vpop.eup %10183  ;;  %v879_v2 = vpop.permute.xlu1 %878 }
 0x4c9   :  { %v834_v5 = vmul.f32 1.442695, %v820_v62  ;;  %v847_v6 = vsel %vm789_vm3, %v10955_v63, 0.0  ;;  %v10959_v7 = vpop.eup %10185 }
 0x4ca   :  { %848 = vadd.xlane.f32.xlu1 %v847_v6  ;;  %v881_v9 = vpop.permute.xlu0 %880  ;;  %v841_v61 = vsel %vm789_vm3, %v10959_v7, 0.0 }
 0x4cb   :  { %10195 = vpow2.f32 %v834_v5  ;;  %9467 = vmatprep.subr.mxu0 %v881_v9 }
 0x4cc   :  { %v10961_v10 = vpop.eup %10187  ;;  %v966_v11 = vpop.permute.xlu1 %965  ;;  %9468 = vmatpush3.msra.mxu0 %v881_v9  ;;  %10197 = vpow2.f32 %v830_v4 }
 0x4cd   :  { %9469 = vmatprep.subr.mxu0 %v879_v2  ;;  %9476 = vmatprep.subr.mxu1 %v966_v11  ;;  %v844_v14 = vsel %vm789_vm3, %v10961_v10, 0.0 }
 0x4ce   :  { %9477 = vmatpush3.msra.mxu1 %v966_v11  ;;  %842 = vadd.xlane.f32.xlu1 %v841_v61  ;;  %v10967_v15 = vpop.permute.xlu0 %1054 }
 0x4cf   :  { %845 = vadd.xlane.f32.xlu0 %v844_v14  ;;  %9470 = vmatpush3.msra.mxu0 %v879_v2 }
 0x4d0   :  { %v10190_v16 = vpop.eup %10189  ;;  %9481 = vmatprep.subr.mxu0 %v10967_v15  ;;  %v1142_v18 = vpop.permute.xlu1 %1141 }
 0x4d1   :  { %9488 = vmatprep.subr.mxu1 %v1142_v18  ;;  %v838_v19 = vsel %vm789_vm3, %v10190_v16, 0.0 }
 0x4d2   :  { %v10971_v60 = vpop.eup %10191  ;;  %v1053_v20 = vpop.permute.xlu0 %1052 }
 0x4d3   :  { %839 = vadd.xlane.f32.xlu0 %v838_v19  ;;  %v859_v3 = vsel %vm789_vm3, %v10971_v60, 0.0  ;;  %v10975_v21 = vpop.eup %10193 }
 0x4d4   :  { %860 = vadd.xlane.f32.xlu1 %v859_v3  ;;  %v853_v22 = vsel %vm789_vm3, %v10975_v21, 0.0  ;;  %v1140_v29 = vpop.permute.xlu1 %1139 }
 0x4d6   :  { %v11007_v32 = vpop.permute.xlu0 %1232 }
 0x4d8   :  { %v10979_v25 = vpop.eup %10195  ;;  %854 = vadd.xlane.f32.xlu1 %v853_v22  ;;  %v1324_v30 = vpop.permute.xlu1 %1323 }
 0x4d9   :  { %v856_v26 = vsel %vm789_vm3, %v10979_v25, 0.0  ;;  %v10983_v12 = vpop.eup %10197 }
 0x4da   :  { %857 = vadd.xlane.f32.xlu0 %v856_v26  ;;  %v850_v27 = vsel %vm789_vm3, %v10983_v12, 0.0  ;;  %v11011_v38 = vpop.permute.xlu0 %1230 }
 0x4dc   :  { %v11009_v35 = vpop.permute.xlu1 %1321 }
 0x4de   :  { %851 = vadd.xlane.f32.xlu0 %v850_v27  ;;  %v1227_v42 = vpop.permute.xlu0 %1226 }
 0x4e0   :  { %v11013_v40 = vpop.permute.xlu1 %1414 }
 0x4e9   :  { %1317 = vrot.lane.b32.xlu1 %v10836_v34, %s13047_s1 }
 0x4ed   :  { %1319 = vrot.lane.b32.xlu1 %v10891_v57, %s13047_s1 }
 0x4f1   :  { %1503 = vrot.lane.b32.xlu1 %v10867_v47, %s10537_s24 }
 0x4f4   :  { %1228 = vrot.lane.b32.xlu0 %v10881_v52, %s13047_s1 }
 0x4f5   :  { %1410 = vrot.lane.b32.xlu1 %v10909_v0, %s13047_s1 }
 0x4f8   :  { %1505 = vrot.lane.b32.xlu0 %v10859_v45, %s10537_s24 }
 0x4f9   :  { %1501 = vrot.lane.b32.xlu1 %v10915_v1, %s13047_s1 }
 0x4fc   :  { %1412 = vrot.lane.b32.xlu0 %v10863_v46, %s10537_s24 }
 0x500   :  { %1408 = vrot.lane.b32.xlu0 %v10885_v56, %s13047_s1 }
 0x504   :  { %1499 = vrot.lane.b32.xlu0 %v10897_v59, %s13047_s1  ;;  %s13076_s1 = smov 72  }
 0x553   :  { %v849_v41 = vpop.xlane.xlu1 %848 }
 0x554   :  { %10199 = vrcp.f32 %v849_v41 }
 0x557   :  { %v843_v48 = vpop.xlane.xlu1 %842 }
 0x558   :  { %v846_v43 = vpop.xlane.xlu0 %845 }
 0x559   :  { %10201 = vrcp.f32 %v846_v43 }
 0x55a   :  { %10203 = vrcp.f32 %v843_v48 }
 0x55c   :  { %v840_v49 = vpop.xlane.xlu0 %839 }
 0x55d   :  { %10205 = vrcp.f32 %v840_v49  ;;  %v861_v50 = vpop.xlane.xlu1 %860 }
 0x55e   :  { %10207 = vrcp.f32 %v861_v50 }
 0x561   :  { %v855_v53 = vpop.xlane.xlu1 %854  ;;  %v10200_v58 = vpop.eup %10199 }
 0x562   :  { %v873_v5 = vmul.f32 %v10200_v58, %v10955_v63 }
 0x563   :  { %v858_v51 = vpop.xlane.xlu0 %857 }
 0x564   :  { %10209 = vrcp.f32 %v858_v51 }
 0x565   :  { %10211 = vrcp.f32 %v855_v53  ;;  %v1318_v19 = vpop.permute.xlu1 %1317 }
 0x566   :  { %v10202_v62 = vpop.eup %10201 }
 0x567   :  { %v852_v2 = vpop.xlane.xlu0 %851  ;;  %v872_v4 = vmul.f32 %v10202_v62, %v10961_v10  ;;  %v10204_v6 = vpop.eup %10203 }
 0x568   :  { %10213 = vrcp.f32 %v852_v2  ;;  %v871_v14 = vmul.f32 %v10204_v6, %v10959_v7 }
 0x569   :  { %9478 = vmatprep.mubr.msk.f32.mxu1 %vm789_vm3, %v872_v4 }
 0x56a   :  { %v10206_v9 = vpop.eup %10205  ;;  %9479 = vmatmul.mubr.msk.f32.vlgmr.msra.gmra.mxu1 %vm789_vm3, %v873_v5 }
 0x56b   :  { %9489 = vmatpush3.msra.mxu1 %v1142_v18  ;;  %v1229_v11 = vpop.permute.xlu0 %1228  ;;  %v870_v61 = vmul.f32 %v10206_v9, %v10190_v16  ;;  %v10208_v10 = vpop.eup %10207 }
 0x56c   :  { %9490 = vmatprep.subr.mxu1 %v1140_v29  ;;  %v1320_v16 = vpop.permute.xlu1 %1319  ;;  %v877_v22 = vmul.f32 %v10208_v10, %v10971_v60 }
 0x56d   :  { %9491 = vmatpush3.msra.mxu1 %v1140_v29  ;;  %9471 = vmatprep.mubr.msk.f32.mxu0 %vm789_vm3, %v870_v61 }
 0x56e   :  { %9502 = vmatprep.subr.msk.mxu1 %vm430_vm2, %v1324_v30  ;;  %9472 = vmatmul.mubr.msk.f32.vlgmr.msra.gmra.mxu0 %vm789_vm3, %v871_v14 }
 0x56f   :  { %9482 = vmatpush3.msra.mxu0 %v10967_v15  ;;  %v1506_v63 = vpop.permute.xlu0 %1505 }
 0x570   :  { %9483 = vmatprep.subr.mxu0 %v1053_v20  ;;  %v1504_v60 = vpop.permute.xlu1 %1503 }
 0x571   :  { %v10210_v3 = vpop.eup %10209  ;;  %9484 = vmatpush3.msra.mxu0 %v1053_v20 }
 0x572   :  { %9495 = vmatprep.subr.msk.mxu0 %vm430_vm2, %v11007_v32  ;;  %v876_v7 = vmul.f32 %v10210_v3, %v10979_v25  ;;  %v10212_v26 = vpop.eup %10211 }
 0x573   :  { %v1413_v18 = vpop.permute.xlu0 %1412  ;;  %v875_v29 = vmul.f32 %v10212_v26, %v10975_v21 }
 0x574   :  { %9492 = vmatprep.mubr.msk.f32.mxu1 %vm789_vm3, %v876_v7  ;;  %v1411_v21 = vpop.permute.xlu1 %1410 }
 0x575   :  { %v10214_v27 = vpop.eup %10213  ;;  %9493 = vmatmul.mubr.msk.f32.vlgmr.msra.gmra.mxu1 %vm789_vm3, %v877_v22 }
 0x576   :  { %9503 = vmatpush3.xpose.msk.msra.mxu1 %vm430_vm2, %v1324_v30  ;;  %9506 = vmatprep.mubr.msk.f32.mxu1 %vm430_vm2, %v1318_v19  ;;  %v874_v15 = vmul.f32 %v10214_v27, %v10983_v12 }
 0x577   :  { %9504 = vmatprep.subr.msk.mxu1 %vm430_vm2, %v11009_v35  ;;  %v1409_v25 = vpop.permute.xlu0 %1408 }
 0x578   :  { %9485 = vmatprep.mubr.msk.f32.mxu0 %vm789_vm3, %v874_v15  ;;  %v1502_v20 = vpop.permute.xlu1 %1501 }
 0x579   :  { %9486 = vmatmul.mubr.msk.f32.vlgmr.msra.gmra.mxu0 %vm789_vm3, %v875_v29 }
 0x57a   :  { %9496 = vmatpush3.xpose.msk.msra.mxu0 %vm430_vm2, %v11007_v32  ;;  %9505 = vmatpush3.xpose.msk.msra.mxu1 %vm430_vm2, %v11009_v35 }
 0x57b   :  { %9497 = vmatprep.subr.msk.mxu0 %vm430_vm2, %v11011_v38  ;;  %9499 = vmatprep.mubr.msk.f32.mxu0 %vm430_vm2, %v1227_v42  ;;  %v1500_v12 = vpop.permute.xlu0 %1499 }
 0x57c   :  { %9516 = vmatprep.subr.msk.mxu1 %vm430_vm2, %v1506_v63 }
 0x57d   :  { %9507 = vmatmul.mubr.msk.f32.vlgmr.msra.gmra.mxu1 %vm430_vm2, %v1320_v16 }
 0x57e   :  { %9498 = vmatpush3.xpose.msk.msra.mxu0 %vm430_vm2, %v11011_v38  ;;  %9517 = vmatpush3.xpose.msk.msra.mxu1 %vm430_vm2, %v1506_v63 }
 0x57f   :  { %9520 = vmatprep.mubr.msk.f32.mxu1 %vm430_vm2, %v1500_v12  ;;  %9509 = vmatprep.subr.msk.mxu0 %vm430_vm2, %v11013_v40 }
 0x580   :  { %9518 = vmatprep.subr.msk.mxu1 %vm430_vm2, %v1504_v60 }
 0x581   :  { %9500 = vmatmul.mubr.msk.f32.vlgmr.msra.gmra.mxu0 %vm430_vm2, %v1229_v11 }
 0x582   :  { %9510 = vmatpush3.xpose.msk.msra.mxu0 %vm430_vm2, %v11013_v40  ;;  %9513 = vmatprep.mubr.msk.f32.mxu0 %vm430_vm2, %v1409_v25 }
 0x583   :  { %9519 = vmatpush3.xpose.msk.msra.mxu1 %vm430_vm2, %v1504_v60  ;;  %9511 = vmatprep.subr.msk.mxu0 %vm430_vm2, %v1413_v18 }
 0x586   :  { %9521 = vmatmul.mubr.msk.f32.vlgmr.msra.gmra.mxu1 %vm430_vm2, %v1502_v20  ;;  %9512 = vmatpush3.xpose.msk.msra.mxu0 %vm430_vm2, %v1413_v18 }
 0x589   :  { %9514 = vmatmul.mubr.msk.f32.vlgmr.msra.gmra.mxu0 %vm430_vm2, %v1411_v21 }
 0x62a   :  { %v11063_v30 = vpop.f32.mrf.mxu1 }
 0x62c   :  { %v11065_v32 = vpop.f32.mrf.mxu1 }
 0x62e   :  { %v11067_v35 = vpop.f32.mrf.mxu0 }
 0x630   :  { %v11071_v40 = vpop.f32.mrf.mxu0 }
 0x635   :  { %v11069_v38 = vpop.f32.mrf.mxu1 }
 0x637   :  { %v11073_v41 = vpop.f32.mrf.mxu1 }
 0x639   :  { %v11075_v42 = vpop.f32.mrf.mxu0 }
 0x63b   :  { %v11078_v49 = vpop.f32.mrf.mxu0 }
 0x63d   :  { %v9508_v43 = vpop.f32.mrf.mxu1 }
 0x63e   :  { %v1599_v48 = vsel %vm789_vm3, %v9508_v43, -inf }
 0x63f   :  { %1600 = vmax.xlane.f32.xlu0 %v1599_v48  ;;  %v1399_v50 = vpop.f32.mrf.mxu1 }
 0x640   :  { %v1596_v53 = vsel %vm789_vm3, %v1399_v50, -inf }
 0x641   :  { %v9501_v51 = vpop.f32.mrf.mxu0 }
 0x642   :  { %v1593_v58 = vsel %vm789_vm3, %v9501_v51, -inf }
 0x643   :  { %1597 = vmax.xlane.f32.xlu0 %v1596_v53  ;;  %1594 = vmax.xlane.f32.xlu1 %v1593_v58  ;;  %v1308_v62 = vpop.f32.mrf.mxu0 }
 0x644   :  { %v1590_v2 = vsel %vm789_vm3, %v1308_v62, -inf }
 0x646   :  { %v9522_v4 = vpop.f32.mrf.mxu1 }
 0x647   :  { %1591 = vmax.xlane.f32.xlu0 %v1590_v2  ;;  %v1611_v14 = vsel %vm789_vm3, %v9522_v4, -inf }
 0x648   :  { %v1581_v61 = vpop.f32.mrf.mxu1 }
 0x649   :  { %v9515_v5 = vpop.f32.mrf.mxu0  ;;  %v1608_v19 = vsel %vm789_vm3, %v1581_v61, -inf }
 0x64a   :  { %v1605_v6 = vsel %vm789_vm3, %v9515_v5, -inf }
 0x64b   :  { %1606 = vmax.xlane.f32.xlu1 %v1605_v6  ;;  %v1490_v9 = vpop.f32.mrf.mxu0 }
 0x64c   :  { %v1602_v11 = vsel %vm789_vm3, %v1490_v9, -inf }
 0x64d   :  { %1603 = vmax.xlane.f32.xlu0 %v1602_v11 }
 0x64f   :  { %1612 = vmax.xlane.f32.xlu1 %v1611_v14 }
 0x651   :  { %1609 = vmax.xlane.f32.xlu0 %v1608_v19 }
 0x660   :  { %1767 = vrot.lane.b32.xlu1 %v10838_v36, %s13045_s30 }
 0x664   :  { %1678 = vrot.lane.b32.xlu1 %v10833_v33, %s13045_s30 }
 0x667   :  { %1680 = vrot.lane.b32.xlu0 %v10845_v39, %s13045_s30 }
 0x668   :  { %1765 = vrot.lane.b32.xlu1 %v10831_v31, %s13045_s30 }
 0x66b   :  { %1854 = vrot.lane.b32.xlu0 %v10855_v44, %s13045_s30 }
 0x66c   :  { %1941 = vrot.lane.b32.xlu1 %v10859_v45, %s13045_s30 }
 0x66f   :  { %1852 = vrot.lane.b32.xlu0 %v10863_v46, %s13045_s30 }
 0x670   :  { %1939 = vrot.lane.b32.xlu1 %v10867_v47, %s13045_s30  ;;  %s13077_s30 = smov 104  }
 0x673   :  { %2032 = vrot.lane.b32.xlu0 %v10845_v39, %s13043_s25 }
 0x674   :  { %2123 = vrot.lane.b32.xlu1 %v10838_v36, %s13043_s25 }
 0x677   :  { %2030 = vrot.lane.b32.xlu0 %v10833_v33, %s13043_s25 }
 0x678   :  { %2121 = vrot.lane.b32.xlu1 %v10831_v31, %s13043_s25 }
 0x67b   :  { %2026 = vrot.lane.b32.xlu0 %v10843_v37, %s13041_s4 }
 0x67c   :  { %2214 = vrot.lane.b32.xlu1 %v10855_v44, %s13043_s25 }
 0x6c8   :  { %v1601_v63 = vpop.xlane.xlu0 %1600 }
 0x6c9   :  { %v1617_v10 = vsub.f32 %v9508_v43, %v1601_v63 }
 0x6cb   :  { %v1628_v3 = vmul.f32 1.442695, %v1617_v10 }
 0x6cc   :  { %v1595_v7 = vpop.xlane.xlu1 %1594  ;;  %v1598_v16 = vpop.xlane.xlu0 %1597 }
 0x6cd   :  { %10215 = vpow2.f32 %v1628_v3  ;;  %v1615_v18 = vsub.f32 %v9501_v51, %v1595_v7  ;;  %v1616_v22 = vsub.f32 %v1399_v50, %v1598_v16 }
 0x6cf   :  { %v1624_v26 = vmul.f32 1.442695, %v1615_v18  ;;  %v1626_v27 = vmul.f32 1.442695, %v1616_v22 }
 0x6d0   :  { %v1592_v15 = vpop.xlane.xlu0 %1591 }
 0x6d1   :  { %10217 = vpow2.f32 %v1624_v26  ;;  %v1614_v25 = vsub.f32 %v1308_v62, %v1592_v15 }
 0x6d2   :  { %10219 = vpow2.f32 %v1626_v27 }
 0x6d3   :  { %v1622_v29 = vmul.f32 1.442695, %v1614_v25 }
 0x6d4   :  { %v1607_v60 = vpop.xlane.xlu1 %1606 }
 0x6d5   :  { %10221 = vpow2.f32 %v1622_v29  ;;  %v1619_v12 = vsub.f32 %v9515_v5, %v1607_v60 }
 0x6d6   :  { %v1604_v21 = vpop.xlane.xlu0 %1603 }
 0x6d7   :  { %v1618_v48 = vsub.f32 %v1490_v9, %v1604_v21  ;;  %v1632_v58 = vmul.f32 1.442695, %v1619_v12 }
 0x6d8   :  { %v1613_v20 = vpop.xlane.xlu1 %1612 }
 0x6d9   :  { %v1621_v43 = vsub.f32 %v9522_v4, %v1613_v20  ;;  %v1630_v62 = vmul.f32 1.442695, %v1618_v48 }
 0x6da   :  { %v11115_v53 = vpop.eup %10215  ;;  %v1610_v2 = vpop.xlane.xlu0 %1609 }
 0x6db   :  { %v1636_v51 = vmul.f32 1.442695, %v1621_v43  ;;  %v1620_v50 = vsub.f32 %v1581_v61, %v1610_v2  ;;  %v1647_v6 = vsel %vm789_vm3, %v11115_v53, 0.0 }
 0x6dc   :  { %v1768_v11 = vpop.permute.xlu1 %1767  ;;  %1648 = vadd.xlane.f32.xlu1 %v1647_v6 }
 0x6dd   :  { %10223 = vpow2.f32 %v1636_v51  ;;  %v1634_v14 = vmul.f32 1.442695, %v1620_v50  ;;  %9530 = vmatprep.subr.mxu1 %v1768_v11 }
 0x6de   :  { %v11119_v5 = vpop.eup %10217  ;;  %10225 = vpow2.f32 %v1632_v58  ;;  %9531 = vmatpush3.msra.mxu1 %v1768_v11  ;;  %v1681_v4 = vpop.permute.xlu0 %1680 }
 0x6df   :  { %v11121_v9 = vpop.eup %10219  ;;  %10227 = vpow2.f32 %v1634_v14  ;;  %9523 = vmatprep.subr.mxu0 %v1681_v4  ;;  %v1641_v61 = vsel %vm789_vm3, %v11119_v5, 0.0 }
 0x6e0   :  { %v1679_v19 = vpop.permute.xlu1 %1678  ;;  %1642 = vadd.xlane.f32.xlu1 %v1641_v61  ;;  %v1644_v63 = vsel %vm789_vm3, %v11121_v9, 0.0  ;;  %9524 = vmatpush3.msra.mxu0 %v1681_v4  ;;  %10229 = vpow2.f32 %v1630_v62 }
 0x6e1   :  { %1645 = vadd.xlane.f32.xlu0 %v1644_v63  ;;  %9525 = vmatprep.subr.mxu0 %v1679_v19 }
 0x6e2   :  { %v11127_v10 = vpop.eup %10221  ;;  %9526 = vmatpush3.msra.mxu0 %v1679_v19  ;;  %v11129_v3 = vpop.permute.xlu0 %1854 }
 0x6e3   :  { %9537 = vmatprep.subr.mxu0 %v11129_v3  ;;  %v1638_v7 = vsel %vm789_vm3, %v11127_v10, 0.0 }
 0x6e4   :  { %v1766_v16 = vpop.permute.xlu1 %1765 }
 0x6e5   :  { %1639 = vadd.xlane.f32.xlu0 %v1638_v7  ;;  %9532 = vmatprep.subr.mxu1 %v1766_v16 }
 0x6e6   :  { %9533 = vmatpush3.msra.mxu1 %v1766_v16  ;;  %v1853_v20 = vpop.permute.xlu0 %1852 }
 0x6e8   :  { %v1942_v18 = vpop.permute.xlu1 %1941 }
 0x6e9   :  { %9544 = vmatprep.subr.mxu1 %v1942_v18 }
 0x6ea   :  { %v11134_v22 = vpop.eup %10223  ;;  %v11170_v43 = vpop.permute.xlu0 %2032 }
 0x6eb   :  { %v11136_v26 = vpop.eup %10225  ;;  %v1659_v27 = vsel %vm789_vm3, %v11134_v22, 0.0 }
 0x6ec   :  { %v11140_v15 = vpop.eup %10227  ;;  %1660 = vadd.xlane.f32.xlu1 %v1659_v27  ;;  %v1653_v60 = vsel %vm789_vm3, %v11136_v26, 0.0  ;;  %v1940_v21 = vpop.permute.xlu1 %1939 }
 0x6ed   :  { %v1656_v25 = vsel %vm789_vm3, %v11140_v15, 0.0  ;;  %v11144_v29 = vpop.eup %10229 }
 0x6ee   :  { %1657 = vadd.xlane.f32.xlu0 %v1656_v25  ;;  %v1650_v12 = vsel %vm789_vm3, %v11144_v29, 0.0  ;;  %v11174_v2 = vpop.permute.xlu0 %2030 }
 0x6f0   :  { %1654 = vadd.xlane.f32.xlu1 %v1653_v60  ;;  %v2124_v48 = vpop.permute.xlu1 %2123 }
 0x6f2   :  { %1651 = vadd.xlane.f32.xlu0 %v1650_v12  ;;  %v2027_v6 = vpop.permute.xlu0 %2026 }
 0x6f4   :  { %v11172_v58 = vpop.permute.xlu1 %2121 }
 0x6f8   :  { %v11176_v51 = vpop.permute.xlu1 %2214 }
 0x701   :  { %2117 = vrot.lane.b32.xlu1 %v10836_v34, %s13041_s4 }
 0x705   :  { %2119 = vrot.lane.b32.xlu1 %v10891_v57, %s13041_s4 }
 0x708   :  { %2028 = vrot.lane.b32.xlu0 %v10881_v52, %s13041_s4 }
 0x709   :  { %2303 = vrot.lane.b32.xlu1 %v10867_v47, %s13043_s25 }
 0x70c   :  { %2305 = vrot.lane.b32.xlu0 %v10859_v45, %s13043_s25 }
 0x70d   :  { %2210 = vrot.lane.b32.xlu1 %v10909_v0, %s13041_s4 }
 0x710   :  { %2212 = vrot.lane.b32.xlu0 %v10863_v46, %s13043_s25 }
 0x711   :  { %2301 = vrot.lane.b32.xlu1 %v10915_v1, %s13041_s4 }
 0x714   :  { %2208 = vrot.lane.b32.xlu0 %v10885_v56, %s13041_s4 }
 0x718   :  { %2299 = vrot.lane.b32.xlu0 %v10897_v59, %s13041_s4 }
 0x765   :  { %v1649_v50 = vpop.xlane.xlu1 %1648 }
 0x766   :  { %10231 = vrcp.f32 %v1649_v50 }
 0x769   :  { %v1643_v62 = vpop.xlane.xlu1 %1642 }
 0x76a   :  { %v1646_v11 = vpop.xlane.xlu0 %1645 }
 0x76b   :  { %10233 = vrcp.f32 %v1646_v11 }
 0x76c   :  { %10235 = vrcp.f32 %v1643_v62 }
 0x76e   :  { %v1640_v14 = vpop.xlane.xlu0 %1639 }
 0x76f   :  { %10237 = vrcp.f32 %v1640_v14 }
 0x773   :  { %v10232_v61 = vpop.eup %10231 }
 0x774   :  { %v1673_v27 = vmul.f32 %v10232_v61, %v11115_v53 }
 0x775   :  { %v1661_v4 = vpop.xlane.xlu1 %1660 }
 0x776   :  { %10239 = vrcp.f32 %v1661_v4 }
 0x777   :  { %v1658_v19 = vpop.xlane.xlu0 %1657 }
 0x778   :  { %v10234_v63 = vpop.eup %10233  ;;  %10241 = vrcp.f32 %v1658_v19 }
 0x779   :  { %v1655_v7 = vpop.xlane.xlu1 %1654  ;;  %v1672_v16 = vmul.f32 %v10234_v63, %v11121_v9  ;;  %v10236_v25 = vpop.eup %10235 }
 0x77a   :  { %10243 = vrcp.f32 %v1655_v7  ;;  %v1671_v11 = vmul.f32 %v10236_v25, %v11119_v5 }
 0x77b   :  { %9534 = vmatprep.mubr.msk.f32.mxu1 %vm789_vm3, %v1672_v16  ;;  %v1652_v60 = vpop.xlane.xlu0 %1651 }
 0x77c   :  { %v10238_v12 = vpop.eup %10237  ;;  %9535 = vmatmul.mubr.msk.f32.vlgmr.msra.gmra.mxu1 %vm789_vm3, %v1673_v27  ;;  %10245 = vrcp.f32 %v1652_v60 }
 0x77d   :  { %9545 = vmatpush3.msra.mxu1 %v1942_v18  ;;  %v1670_v50 = vmul.f32 %v10238_v12, %v11127_v10  ;;  %v2118_v53 = vpop.permute.xlu1 %2117 }
 0x77e   :  { %9546 = vmatprep.subr.mxu1 %v1940_v21 }
 0x77f   :  { %9547 = vmatpush3.msra.mxu1 %v1940_v21  ;;  %9527 = vmatprep.mubr.msk.f32.mxu0 %vm789_vm3, %v1670_v50  ;;  %v2029_v9 = vpop.permute.xlu0 %2028 }
 0x780   :  { %9558 = vmatprep.subr.msk.mxu1 %vm430_vm2, %v2124_v48  ;;  %9528 = vmatmul.mubr.msk.f32.vlgmr.msra.gmra.mxu0 %vm789_vm3, %v1671_v11 }
 0x781   :  { %9538 = vmatpush3.msra.mxu0 %v11129_v3  ;;  %v2120_v21 = vpop.permute.xlu1 %2119 }
 0x782   :  { %9539 = vmatprep.subr.mxu0 %v1853_v20 }
 0x783   :  { %9540 = vmatpush3.msra.mxu0 %v1853_v20  ;;  %v2306_v62 = vpop.permute.xlu0 %2305  ;;  %v10240_v18 = vpop.eup %10239 }
 0x784   :  { %9551 = vmatprep.subr.msk.mxu0 %vm430_vm2, %v11170_v43  ;;  %v1677_v4 = vmul.f32 %v10240_v18, %v11134_v22 }
 0x785   :  { %v10242_v10 = vpop.eup %10241  ;;  %v2304_v22 = vpop.permute.xlu1 %2303 }
 0x786   :  { %v1676_v5 = vmul.f32 %v10242_v10, %v11140_v15 }
 0x787   :  { %v2213_v14 = vpop.permute.xlu0 %2212  ;;  %v10244_v61 = vpop.eup %10243 }
 0x788   :  { %9548 = vmatprep.mubr.msk.f32.mxu1 %vm789_vm3, %v1676_v5  ;;  %v1675_v20 = vmul.f32 %v10244_v61, %v11136_v26 }
 0x789   :  { %v10246_v19 = vpop.eup %10245  ;;  %9549 = vmatmul.mubr.msk.f32.vlgmr.msra.gmra.mxu1 %vm789_vm3, %v1677_v4  ;;  %v2211_v26 = vpop.permute.xlu1 %2210 }
 0x78a   :  { %9559 = vmatpush3.xpose.msk.msra.mxu1 %vm430_vm2, %v2124_v48  ;;  %9562 = vmatprep.mubr.msk.f32.mxu1 %vm430_vm2, %v2118_v53  ;;  %v1674_v3 = vmul.f32 %v10246_v19, %v11144_v29 }
 0x78b   :  { %9560 = vmatprep.subr.msk.mxu1 %vm430_vm2, %v11172_v58  ;;  %v2209_v15 = vpop.permute.xlu0 %2208 }
 0x78c   :  { %9541 = vmatprep.mubr.msk.f32.mxu0 %vm789_vm3, %v1674_v3 }
 0x78d   :  { %9542 = vmatmul.mubr.msk.f32.vlgmr.msra.gmra.mxu0 %vm789_vm3, %v1675_v20  ;;  %v2302_v48 = vpop.permute.xlu1 %2301 }
 0x78e   :  { %9552 = vmatpush3.xpose.msk.msra.mxu0 %vm430_vm2, %v11170_v43  ;;  %9561 = vmatpush3.xpose.msk.msra.mxu1 %vm430_vm2, %v11172_v58 }
 0x78f   :  { %9553 = vmatprep.subr.msk.mxu0 %vm430_vm2, %v11174_v2  ;;  %9555 = vmatprep.mubr.msk.f32.mxu0 %vm430_vm2, %v2027_v6  ;;  %v2300_v29 = vpop.permute.xlu0 %2299 }
 0x790   :  { %9572 = vmatprep.subr.msk.mxu1 %vm430_vm2, %v2306_v62 }
 0x791   :  { %9563 = vmatmul.mubr.msk.f32.vlgmr.msra.gmra.mxu1 %vm430_vm2, %v2120_v21 }
 0x792   :  { %9554 = vmatpush3.xpose.msk.msra.mxu0 %vm430_vm2, %v11174_v2  ;;  %9573 = vmatpush3.xpose.msk.msra.mxu1 %vm430_vm2, %v2306_v62 }
 0x793   :  { %9576 = vmatprep.mubr.msk.f32.mxu1 %vm430_vm2, %v2300_v29  ;;  %9565 = vmatprep.subr.msk.mxu0 %vm430_vm2, %v11176_v51 }
 0x794   :  { %9574 = vmatprep.subr.msk.mxu1 %vm430_vm2, %v2304_v22 }
 0x795   :  { %9556 = vmatmul.mubr.msk.f32.vlgmr.msra.gmra.mxu0 %vm430_vm2, %v2029_v9 }
 0x796   :  { %9566 = vmatpush3.xpose.msk.msra.mxu0 %vm430_vm2, %v11176_v51  ;;  %9569 = vmatprep.mubr.msk.f32.mxu0 %vm430_vm2, %v2209_v15 }
 0x797   :  { %9575 = vmatpush3.xpose.msk.msra.mxu1 %vm430_vm2, %v2304_v22  ;;  %9567 = vmatprep.subr.msk.mxu0 %vm430_vm2, %v2213_v14 }
 0x79a   :  { %9577 = vmatmul.mubr.msk.f32.vlgmr.msra.gmra.mxu1 %vm430_vm2, %v2302_v48  ;;  %9568 = vmatpush3.xpose.msk.msra.mxu0 %vm430_vm2, %v2213_v14 }
 0x79d   :  { %9570 = vmatmul.mubr.msk.f32.vlgmr.msra.gmra.mxu0 %vm430_vm2, %v2211_v26 }
 0x83c   :  { %v11227_v43 = vpop.f32.mrf.mxu1 }
 0x83e   :  { %v11229_v58 = vpop.f32.mrf.mxu1 }
 0x83f   :  { %v10052_v2 = vpack.i.bf16 %v11227_v43, %v11229_v58 }
 0x840   :  { %v11233_v51 = vpop.f32.mrf.mxu0 }
 0x842   :  { %v11235_v6 = vpop.f32.mrf.mxu0 }
 0x849   :  { %v11239_v7 = vpop.f32.mrf.mxu1 }
 0x84b   :  { %v11241_v16 = vpop.f32.mrf.mxu1 }
 0x84d   :  { %v11245_v25 = vpop.f32.mrf.mxu0 }
 0x84f   :  { %v11247_v60 = vpop.f32.mrf.mxu0 }
 0x851   :  { %v9564_v50 = vpop.f32.mrf.mxu1 }
 0x852   :  { %v2399_v11 = vsel %vm789_vm3, %v9564_v50, -inf }
 0x853   :  { %2400 = vmax.xlane.f32.xlu0 %v2399_v11  ;;  %v2199_v9 = vpop.f32.mrf.mxu1 }
 0x854   :  { %v2396_v62 = vsel %vm789_vm3, %v2199_v9, -inf }
 0x855   :  { %v9557_v53 = vpop.f32.mrf.mxu0 }
 0x856   :  { %v2393_v18 = vsel %vm789_vm3, %v9557_v53, -inf }
 0x857   :  { %2397 = vmax.xlane.f32.xlu0 %v2396_v62  ;;  %2394 = vmax.xlane.f32.xlu1 %v2393_v18  ;;  %v2108_v10 = vpop.f32.mrf.mxu0 }
 0x858   :  { %v2390_v5 = vsel %vm789_vm3, %v2108_v10, -inf }
 0x85a   :  { %v9578_v21 = vpop.f32.mrf.mxu1 }
 0x85b   :  { %2391 = vmax.xlane.f32.xlu0 %v2390_v5  ;;  %v2411_v15 = vsel %vm789_vm3, %v9578_v21, -inf }
 0x85c   :  { %v2381_v3 = vpop.f32.mrf.mxu1 }
 0x85d   :  { %v9571_v14 = vpop.f32.mrf.mxu0  ;;  %v2408_v20 = vsel %vm789_vm3, %v2381_v3, -inf }
 0x85e   :  { %v2405_v4 = vsel %vm789_vm3, %v9571_v14, -inf }
 0x85f   :  { %2406 = vmax.xlane.f32.xlu1 %v2405_v4  ;;  %v2290_v61 = vpop.f32.mrf.mxu0 }
 0x860   :  { %v2402_v19 = vsel %vm789_vm3, %v2290_v61, -inf }
 0x861   :  { %2403 = vmax.xlane.f32.xlu0 %v2402_v19 }
 0x863   :  { %2412 = vmax.xlane.f32.xlu1 %v2411_v15 }
 0x865   :  { %2409 = vmax.xlane.f32.xlu0 %v2408_v20 }
 0x874   :  { %2567 = vrot.lane.b32.xlu1 %v10838_v36, %s13039_s0 }
 0x878   :  { %2478 = vrot.lane.b32.xlu1 %v10833_v33, %s13039_s0 }
 0x87b   :  { %2480 = vrot.lane.b32.xlu0 %v10845_v39, %s13039_s0 }
 0x87c   :  { %2565 = vrot.lane.b32.xlu1 %v10831_v31, %s13039_s0 }
 0x87f   :  { %2654 = vrot.lane.b32.xlu0 %v10855_v44, %s13039_s0 }
 0x880   :  { %2741 = vrot.lane.b32.xlu1 %v10859_v45, %s13039_s0 }
 0x883   :  { %2652 = vrot.lane.b32.xlu0 %v10863_v46, %s13039_s0 }
 0x884   :  { %2739 = vrot.lane.b32.xlu1 %v10867_v47, %s13039_s0  ;;  %s13049_s0 = smov 24  }
 0x887   :  { %2832 = vrot.lane.b32.xlu0 %v10845_v39, %s13037_s26 }
 0x888   :  { %2923 = vrot.lane.b32.xlu1 %v10838_v36, %s13037_s26 }
 0x88b   :  { %2830 = vrot.lane.b32.xlu0 %v10833_v33, %s13037_s26 }
 0x88c   :  { %2921 = vrot.lane.b32.xlu1 %v10831_v31, %s13037_s26 }
 0x88f   :  { %2826 = vrot.lane.b32.xlu0 %v10843_v37, %s13035_s2 }
 0x890   :  { %2828 = vrot.lane.b32.xlu1 %v10881_v52, %s13035_s2 }
 0x8dc   :  { %v2401_v22 = vpop.xlane.xlu0 %2400 }
 0x8dd   :  { %v2417_v29 = vsub.f32 %v9564_v50, %v2401_v22 }
 0x8df   :  { %v2428_v26 = vmul.f32 1.442695, %v2417_v29 }
 0x8e0   :  { %v2395_v48 = vpop.xlane.xlu1 %2394  ;;  %v2398_v11 = vpop.xlane.xlu0 %2397 }
 0x8e1   :  { %10247 = vpow2.f32 %v2428_v26  ;;  %v2415_v62 = vsub.f32 %v9557_v53, %v2395_v48  ;;  %v2416_v18 = vsub.f32 %v2199_v9, %v2398_v11 }
 0x8e3   :  { %v2424_v5 = vmul.f32 1.442695, %v2415_v62  ;;  %v2426_v4 = vmul.f32 1.442695, %v2416_v18 }
 0x8e4   :  { %v2392_v19 = vpop.xlane.xlu0 %2391 }
 0x8e5   :  { %10249 = vpow2.f32 %v2424_v5  ;;  %v2414_v15 = vsub.f32 %v2108_v10, %v2392_v19 }
 0x8e6   :  { %10251 = vpow2.f32 %v2426_v4 }
 0x8e7   :  { %v2422_v20 = vmul.f32 1.442695, %v2414_v15 }
 0x8e8   :  { %v2407_v12 = vpop.xlane.xlu1 %2406 }
 0x8e9   :  { %10253 = vpow2.f32 %v2422_v20  ;;  %v2419_v37 = vsub.f32 %v9571_v14, %v2407_v12 }
 0x8ea   :  { %v2404_v27 = vpop.xlane.xlu0 %2403 }
 0x8eb   :  { %v2418_v63 = vsub.f32 %v2290_v61, %v2404_v27  ;;  %v2432_v29 = vmul.f32 1.442695, %v2419_v37 }
 0x8ec   :  { %v2413_v52 = vpop.xlane.xlu1 %2412 }
 0x8ed   :  { %v2421_v50 = vsub.f32 %v9578_v21, %v2413_v52  ;;  %v2430_v10 = vmul.f32 1.442695, %v2418_v63 }
 0x8ee   :  { %v11287_v22 = vpop.eup %10247  ;;  %v2410_v26 = vpop.xlane.xlu0 %2409 }
 0x8ef   :  { %v2436_v53 = vmul.f32 1.442695, %v2421_v50  ;;  %v2420_v9 = vsub.f32 %v2381_v3, %v2410_v26  ;;  %v2447_v48 = vsel %vm789_vm3, %v11287_v22, 0.0 }
 0x8f0   :  { %v2568_v11 = vpop.permute.xlu1 %2567  ;;  %2448 = vadd.xlane.f32.xlu1 %v2447_v48 }
 0x8f1   :  { %10255 = vpow2.f32 %v2436_v53  ;;  %v2434_v62 = vmul.f32 1.442695, %v2420_v9  ;;  %9586 = vmatprep.subr.mxu1 %v2568_v11 }
 0x8f2   :  { %v11291_v12 = vpop.eup %10249  ;;  %10257 = vpow2.f32 %v2432_v29  ;;  %9587 = vmatpush3.msra.mxu1 %v2568_v11  ;;  %v2481_v27 = vpop.permute.xlu0 %2480 }
 0x8f3   :  { %v11293_v21 = vpop.eup %10251  ;;  %10259 = vpow2.f32 %v2434_v62  ;;  %9579 = vmatprep.subr.mxu0 %v2481_v27  ;;  %v2441_v14 = vsel %vm789_vm3, %v11291_v12, 0.0 }
 0x8f4   :  { %v2479_v61 = vpop.permute.xlu1 %2478  ;;  %2442 = vadd.xlane.f32.xlu1 %v2441_v14  ;;  %v2444_v63 = vsel %vm789_vm3, %v11293_v21, 0.0  ;;  %9580 = vmatpush3.msra.mxu0 %v2481_v27  ;;  %10261 = vpow2.f32 %v2430_v10 }
 0x8f5   :  { %2445 = vadd.xlane.f32.xlu0 %v2444_v63  ;;  %9581 = vmatprep.subr.mxu0 %v2479_v61 }
 0x8f6   :  { %v11299_v3 = vpop.eup %10253  ;;  %9582 = vmatpush3.msra.mxu0 %v2479_v61  ;;  %v11301_v18 = vpop.permute.xlu0 %2654 }
 0x8f7   :  { %9593 = vmatprep.subr.mxu0 %v11301_v18  ;;  %v2438_v5 = vsel %vm789_vm3, %v11299_v3, 0.0 }
 0x8f8   :  { %v2566_v4 = vpop.permute.xlu1 %2565 }
 0x8f9   :  { %2439 = vadd.xlane.f32.xlu0 %v2438_v5  ;;  %9588 = vmatprep.subr.mxu1 %v2566_v4 }
 0x8fa   :  { %9589 = vmatpush3.msra.mxu1 %v2566_v4  ;;  %v2653_v9 = vpop.permute.xlu0 %2652 }
 0x8fc   :  { %v2742_v19 = vpop.permute.xlu1 %2741 }
 0x8fd   :  { %9600 = vmatprep.subr.mxu1 %v2742_v19 }
 0x8fe   :  { %v11306_v15 = vpop.eup %10255  ;;  %v11342_v11 = vpop.permute.xlu0 %2832 }
 0x8ff   :  { %v11308_v20 = vpop.eup %10257  ;;  %v2459_v37 = vsel %vm789_vm3, %v11306_v15, 0.0 }
 0x900   :  { %v11312_v52 = vpop.eup %10259  ;;  %2460 = vadd.xlane.f32.xlu1 %v2459_v37  ;;  %v2453_v26 = vsel %vm789_vm3, %v11308_v20, 0.0 }
 0x901   :  { %v2456_v50 = vsel %vm789_vm3, %v11312_v52, 0.0  ;;  %v11316_v29 = vpop.eup %10261 }
 0x902   :  { %2457 = vadd.xlane.f32.xlu0 %v2456_v50  ;;  %v2450_v53 = vsel %vm789_vm3, %v11316_v29, 0.0 }
 0x904   :  { %2454 = vadd.xlane.f32.xlu1 %v2453_v26 }
 0x906   :  { %2451 = vadd.xlane.f32.xlu0 %v2450_v53 }
 0x915   :  { %3014 = vrot.lane.b32.xlu1 %v10855_v44, %s13037_s26 }
 0x919   :  { %3105 = vrot.lane.b32.xlu1 %v10859_v45, %s13037_s26 }
 0x91c   :  { %2917 = vrot.lane.b32.xlu0 %v10836_v34, %s13035_s2  ;;  %v2740_v34 = vpop.permute.xlu1 %2739 }
 0x91d   :  { %3103 = vrot.lane.b32.xlu1 %v10867_v47, %s13037_s26 }
 0x920   :  { %2919 = vrot.lane.b32.xlu0 %v10891_v57, %s13035_s2  ;;  %v2924_v48 = vpop.permute.xlu1 %2923 }
 0x921   :  { %3010 = vrot.lane.b32.xlu1 %v10909_v0, %s13035_s2  ;;  %v11346_v0 = vpop.permute.xlu0 %2830 }
 0x924   :  { %3012 = vrot.lane.b32.xlu0 %v10863_v46, %s13037_s26  ;;  %v11344_v57 = vpop.permute.xlu1 %2921 }
 0x925   :  { %3101 = vrot.lane.b32.xlu1 %v10915_v1, %s13035_s2  ;;  %v2827_v27 = vpop.permute.xlu0 %2826 }
 0x928   :  { %3008 = vrot.lane.b32.xlu0 %v10885_v56, %s13035_s2  ;;  %v11348_v10 = vpop.permute.xlu1 %2828 }
 0x92c   :  { %3099 = vrot.lane.b32.xlu0 %v10897_v59, %s13035_s2  ;;  %s13069_s2 = sld [smem:[#allocation10_spill]] }
 0x979   :  { %v2449_v62 = vpop.xlane.xlu1 %2448 }
 0x97a   :  { %10263 = vrcp.f32 %v2449_v62 }
 0x97d   :  { %v2443_v14 = vpop.xlane.xlu1 %2442 }
 0x97e   :  { %v2446_v1 = vpop.xlane.xlu0 %2445 }
 0x97f   :  { %10265 = vrcp.f32 %v2446_v1 }
 0x980   :  { %10267 = vrcp.f32 %v2443_v14 }
 0x982   :  { %v2440_v56 = vpop.xlane.xlu0 %2439 }
 0x983   :  { %10269 = vrcp.f32 %v2440_v56 }
 0x987   :  { %v10264_v61 = vpop.eup %10263 }
 0x988   :  { %v2473_v50 = vmul.f32 %v10264_v61, %v11287_v22 }
 0x989   :  { %v2461_v59 = vpop.xlane.xlu1 %2460 }
 0x98a   :  { %10271 = vrcp.f32 %v2461_v59 }
 0x98b   :  { %v2458_v63 = vpop.xlane.xlu0 %2457 }
 0x98c   :  { %v10266_v5 = vpop.eup %10265  ;;  %10273 = vrcp.f32 %v2458_v63 }
 0x98d   :  { %v2455_v4 = vpop.xlane.xlu1 %2454  ;;  %v2472_v37 = vmul.f32 %v10266_v5, %v11293_v21  ;;  %v10268_v26 = vpop.eup %10267 }
 0x98e   :  { %10275 = vrcp.f32 %v2455_v4  ;;  %v2471_v14 = vmul.f32 %v10268_v26, %v11291_v12 }
 0x98f   :  { %9590 = vmatprep.mubr.msk.f32.mxu1 %vm789_vm3, %v2472_v37  ;;  %v2452_v53 = vpop.xlane.xlu0 %2451 }
 0x990   :  { %v10270_v62 = vpop.eup %10269  ;;  %9591 = vmatmul.mubr.msk.f32.vlgmr.msra.gmra.mxu1 %vm789_vm3, %v2473_v50  ;;  %10277 = vrcp.f32 %v2452_v53 }
 0x991   :  { %9601 = vmatpush3.msra.mxu1 %v2742_v19  ;;  %v2470_v1 = vmul.f32 %v10270_v62, %v11299_v3  ;;  %v3015_v22 = vpop.permute.xlu1 %3014 }
 0x992   :  { %9602 = vmatprep.subr.mxu1 %v2740_v34 }
 0x993   :  { %9603 = vmatpush3.msra.mxu1 %v2740_v34  ;;  %9583 = vmatprep.mubr.msk.f32.mxu0 %vm789_vm3, %v2470_v1  ;;  %v2918_v21 = vpop.permute.xlu0 %2917 }
 0x994   :  { %9614 = vmatprep.subr.msk.mxu1 %vm430_vm2, %v2924_v48  ;;  %9584 = vmatmul.mubr.msk.f32.vlgmr.msra.gmra.mxu0 %vm789_vm3, %v2471_v14 }
 0x995   :  { %9594 = vmatpush3.msra.mxu0 %v11301_v18  ;;  %v3106_v34 = vpop.permute.xlu1 %3105 }
 0x996   :  { %9595 = vmatprep.subr.mxu0 %v2653_v9 }
 0x997   :  { %9596 = vmatpush3.msra.mxu0 %v2653_v9  ;;  %v2920_v56 = vpop.permute.xlu0 %2919  ;;  %v10272_v19 = vpop.eup %10271 }
 0x998   :  { %9607 = vmatprep.subr.msk.mxu0 %vm430_vm2, %v11342_v11  ;;  %v2477_v61 = vmul.f32 %v10272_v19, %v11306_v15 }
 0x999   :  { %v10274_v3 = vpop.eup %10273  ;;  %v3104_v15 = vpop.permute.xlu1 %3103 }
 0x99a   :  { %v2476_v12 = vmul.f32 %v10274_v3, %v11312_v52 }
 0x99b   :  { %v3013_v59 = vpop.permute.xlu0 %3012  ;;  %v10276_v63 = vpop.eup %10275 }
 0x99c   :  { %9604 = vmatprep.mubr.msk.f32.mxu1 %vm789_vm3, %v2476_v12  ;;  %v2475_v9 = vmul.f32 %v10276_v63, %v11308_v20 }
 0x99d   :  { %v10278_v5 = vpop.eup %10277  ;;  %9605 = vmatmul.mubr.msk.f32.vlgmr.msra.gmra.mxu1 %vm789_vm3, %v2477_v61  ;;  %v3011_v20 = vpop.permute.xlu1 %3010 }
 0x99e   :  { %9615 = vmatpush3.xpose.msk.msra.mxu1 %vm430_vm2, %v2924_v48  ;;  %9618 = vmatprep.mubr.msk.f32.mxu1 %vm430_vm2, %v2918_v21  ;;  %v2474_v18 = vmul.f32 %v10278_v5, %v11316_v29 }
 0x99f   :  { %9616 = vmatprep.subr.msk.mxu1 %vm430_vm2, %v11344_v57  ;;  %v3009_v52 = vpop.permute.xlu0 %3008 }
 0x9a0   :  { %9597 = vmatprep.mubr.msk.f32.mxu0 %vm789_vm3, %v2474_v18 }
 0x9a1   :  { %9598 = vmatmul.mubr.msk.f32.vlgmr.msra.gmra.mxu0 %vm789_vm3, %v2475_v9  ;;  %v3102_v48 = vpop.permute.xlu1 %3101 }
 0x9a2   :  { %9608 = vmatpush3.xpose.msk.msra.mxu0 %vm430_vm2, %v11342_v11  ;;  %9617 = vmatpush3.xpose.msk.msra.mxu1 %vm430_vm2, %v11344_v57 }
 0x9a3   :  { %9609 = vmatprep.subr.msk.mxu0 %vm430_vm2, %v11346_v0  ;;  %9611 = vmatprep.mubr.msk.f32.mxu0 %vm430_vm2, %v2827_v27  ;;  %v3100_v29 = vpop.permute.xlu0 %3099 }
 0x9a4   :  { %9628 = vmatprep.subr.msk.mxu1 %vm430_vm2, %v3106_v34 }
 0x9a5   :  { %9619 = vmatmul.mubr.msk.f32.vlgmr.msra.gmra.mxu1 %vm430_vm2, %v2920_v56 }
 0x9a6   :  { %9610 = vmatpush3.xpose.msk.msra.mxu0 %vm430_vm2, %v11346_v0  ;;  %9629 = vmatpush3.xpose.msk.msra.mxu1 %vm430_vm2, %v3106_v34 }
 0x9a7   :  { %9632 = vmatprep.mubr.msk.f32.mxu1 %vm430_vm2, %v3100_v29  ;;  %9621 = vmatprep.subr.msk.mxu0 %vm430_vm2, %v3015_v22 }
 0x9a8   :  { %9630 = vmatprep.subr.msk.mxu1 %vm430_vm2, %v3104_v15 }
 0x9a9   :  { %9612 = vmatmul.mubr.msk.f32.vlgmr.msra.gmra.mxu0 %vm430_vm2, %v11348_v10 }
 0x9aa   :  { %9622 = vmatpush3.xpose.msk.msra.mxu0 %vm430_vm2, %v3015_v22  ;;  %9625 = vmatprep.mubr.msk.f32.mxu0 %vm430_vm2, %v3009_v52 }
 0x9ab   :  { %9631 = vmatpush3.xpose.msk.msra.mxu1 %vm430_vm2, %v3104_v15  ;;  %9623 = vmatprep.subr.msk.mxu0 %vm430_vm2, %v3013_v59 }
 0x9ae   :  { %9633 = vmatmul.mubr.msk.f32.vlgmr.msra.gmra.mxu1 %vm430_vm2, %v3102_v48  ;;  %9624 = vmatpush3.xpose.msk.msra.mxu0 %vm430_vm2, %v3013_v59 }
 0x9b1   :  { %9626 = vmatmul.mubr.msk.f32.vlgmr.msra.gmra.mxu0 %vm430_vm2, %v3011_v20 }
 0xa50   :  { %v11398_v11 = vpop.f32.mrf.mxu1 }
 0xa52   :  { %v11400_v57 = vpop.f32.mrf.mxu1 }
 0xa53   :  { %v10062_v0 = vpack.i.bf16 %v11398_v11, %v11400_v57 }
 0xa54   :  { %v11404_v10 = vpop.f32.mrf.mxu0 }
 0xa56   :  { %v11406_v27 = vpop.f32.mrf.mxu0 }
 0xa57   :  { %v10057_v4 = vpack.i.bf16 %v11404_v10, %v11406_v27 }
 0xa5d   :  { %v11410_v37 = vpop.f32.mrf.mxu1 }
 0xa5f   :  { %v11412_v50 = vpop.f32.mrf.mxu1 }
 0xa60   :  { %v10092_v26 = vpack.i.bf16 %v11410_v37, %v11412_v50 }
 0xa61   :  { %v11416_v53 = vpop.f32.mrf.mxu0 }
 0xa63   :  { %v11418_v62 = vpop.f32.mrf.mxu0 }
 0xa65   :  { %v9620_v14 = vpop.f32.mrf.mxu1 }
 0xa66   :  { %v3199_v34 = vsel %vm789_vm3, %v9620_v14, -inf }
 0xa67   :  { %v2999_v21 = vpop.f32.mrf.mxu1 }
 0xa68   :  { %v3196_v22 = vsel %vm789_vm3, %v2999_v21, -inf }
 0xa69   :  { %v9613_v56 = vpop.f32.mrf.mxu0  ;;  %3197 = vmax.xlane.f32.xlu0 %v3196_v22 }
 0xa6a   :  { %v3193_v19 = vsel %vm789_vm3, %v9613_v56, -inf }
 0xa6b   :  { %3194 = vmax.xlane.f32.xlu1 %v3193_v19  ;;  %v2908_v3 = vpop.f32.mrf.mxu0 }
 0xa6c   :  { %v3190_v12 = vsel %vm789_vm3, %v2908_v3, -inf }
 0xa6d   :  { %3191 = vmax.xlane.f32.xlu0 %v3190_v12 }
 0xa6e   :  { %v9634_v59 = vpop.f32.mrf.mxu1 }
 0xa6f   :  { %v3211_v9 = vsel %vm789_vm3, %v9634_v59, -inf }
 0xa70   :  { %v3181_v52 = vpop.f32.mrf.mxu1 }
 0xa71   :  { %3200 = vmax.xlane.f32.xlu0 %v3199_v34  ;;  %v9627_v61 = vpop.f32.mrf.mxu0  ;;  %v3208_v15 = vsel %vm789_vm3, %v3181_v52, -inf }
 0xa72   :  { %v3205_v63 = vsel %vm789_vm3, %v9627_v61, -inf }
 0xa73   :  { %3206 = vmax.xlane.f32.xlu1 %v3205_v63  ;;  %v3090_v5 = vpop.f32.mrf.mxu0 }
 0xa74   :  { %v3202_v18 = vsel %vm789_vm3, %v3090_v5, -inf }
 0xa75   :  { %3203 = vmax.xlane.f32.xlu0 %v3202_v18 }
 0xa77   :  { %3212 = vmax.xlane.f32.xlu1 %v3211_v9 }
 0xa79   :  { %3209 = vmax.xlane.f32.xlu0 %v3208_v15 }
 0xa88   :  { %3367 = vrot.lane.b32.xlu1 %v10838_v36, %s13033_s6 }
 0xa8c   :  { %3278 = vrot.lane.b32.xlu1 %v10833_v33, %s13033_s6 }
 0xa8f   :  { %3280 = vrot.lane.b32.xlu0 %v10845_v39, %s13033_s6 }
 0xa90   :  { %3365 = vrot.lane.b32.xlu1 %v10831_v31, %s13033_s6 }
 0xa93   :  { %3454 = vrot.lane.b32.xlu0 %v10855_v44, %s13033_s6 }
 0xa94   :  { %3541 = vrot.lane.b32.xlu1 %v10859_v45, %s13033_s6 }
 0xaf2   :  { %v3198_v29 = vpop.xlane.xlu0 %3197 }
 0xaf3   :  { %v3216_v20 = vsub.f32 %v2999_v21, %v3198_v29 }
 0xaf4   :  { %v3195_v22 = vpop.xlane.xlu1 %3194 }
 0xaf5   :  { %v3226_v48 = vmul.f32 1.442695, %v3216_v20  ;;  %v3215_v33 = vsub.f32 %v9613_v56, %v3195_v22 }
 0xaf6   :  { %v3192_v36 = vpop.xlane.xlu0 %3191 }
 0xaf7   :  { %10279 = vpow2.f32 %v3226_v48  ;;  %v3214_v19 = vsub.f32 %v2908_v3, %v3192_v36  ;;  %v3224_v31 = vmul.f32 1.442695, %v3215_v33 }
 0xaf9   :  { %v3222_v12 = vmul.f32 1.442695, %v3214_v19 }
 0xafa   :  { %v3201_v34 = vpop.xlane.xlu0 %3200 }
 0xafb   :  { %10281 = vpow2.f32 %v3222_v12  ;;  %v3217_v39 = vsub.f32 %v9620_v14, %v3201_v34 }
 0xafc   :  { %v3207_v63 = vpop.xlane.xlu1 %3206 }
 0xafd   :  { %v3228_v18 = vmul.f32 1.442695, %v3217_v39  ;;  %v3219_v44 = vsub.f32 %v9627_v61, %v3207_v63 }
 0xafe   :  { %v3204_v9 = vpop.xlane.xlu0 %3203 }
 0xaff   :  { %10283 = vpow2.f32 %v3228_v18  ;;  %v3218_v45 = vsub.f32 %v3090_v5, %v3204_v9  ;;  %v3232_v56 = vmul.f32 1.442695, %v3219_v44 }
 0xb00   :  { %v3213_v15 = vpop.xlane.xlu1 %3212  ;;  %10285 = vpow2.f32 %v3224_v31 }
 0xb01   :  { %v3221_v21 = vsub.f32 %v9634_v59, %v3213_v15  ;;  %v3230_v22 = vmul.f32 1.442695, %v3218_v45 }
 0xb02   :  { %v3210_v29 = vpop.xlane.xlu0 %3209 }
 0xb03   :  { %v3236_v20 = vmul.f32 1.442695, %v3221_v21  ;;  %v3220_v1 = vsub.f32 %v3181_v52, %v3210_v29 }
 0xb04   :  { %v11442_v48 = vpop.eup %10279  ;;  %v3368_v3 = vpop.permute.xlu1 %3367 }
 0xb05   :  { %10287 = vpow2.f32 %v3236_v20  ;;  %v3234_v14 = vmul.f32 1.442695, %v3220_v1  ;;  %9642 = vmatprep.subr.mxu1 %v3368_v3  ;;  %v3244_v36 = vsel %vm789_vm3, %v11442_v48, 0.0  ;;  %v13066_v20 = vpack.i.bf16 %v11233_v51, %v11235_v6 }
 0xb06   :  { %9643 = vmatpush3.msra.mxu1 %v3368_v3  ;;  %3245 = vadd.xlane.f32.xlu0 %v3244_v36  ;;  %v3281_v61 = vpop.permute.xlu0 %3280 }
 0xb07   :  { %10289 = vpow2.f32 %v3234_v14  ;;  %9635 = vmatprep.subr.mxu0 %v3281_v61 }
 0xb08   :  { %v10282_v59 = vpop.eup %10281  ;;  %10291 = vpow2.f32 %v3232_v56  ;;  %v3279_v5 = vpop.permute.xlu1 %3278  ;;  %9636 = vmatpush3.msra.mxu0 %v3281_v61 }
 0xb09   :  { %10293 = vpow2.f32 %v3230_v22  ;;  %9637 = vmatprep.subr.mxu0 %v3279_v5  ;;  %v3238_v52 = vsel %vm789_vm3, %v10282_v59, 0.0 }
 0xb0a   :  { %3239 = vadd.xlane.f32.xlu0 %v3238_v52  ;;  %9638 = vmatpush3.msra.mxu0 %v3279_v5  ;;  %v11447_v1 = vpop.permute.xlu0 %3454 }
 0xb0b   :  { %9649 = vmatprep.subr.mxu0 %v11447_v1 }
 0xb0c   :  { %v10284_v19 = vpop.eup %10283  ;;  %v3366_v33 = vpop.permute.xlu1 %3365 }
 0xb0d   :  { %9644 = vmatprep.subr.mxu1 %v3366_v33  ;;  %v3247_v12 = vsel %vm789_vm3, %v10284_v19, 0.0  ;;  %v10286_v34 = vpop.eup %10285 }
 0xb0e   :  { %9645 = vmatpush3.msra.mxu1 %v3366_v33  ;;  %3248 = vadd.xlane.f32.xlu1 %v3247_v12  ;;  %v3241_v63 = vsel %vm789_vm3, %v10286_v34, 0.0  ;;  %v3750_v33 = vld [vmem:[%s13069_s2 + $0x18] sm:$0xff] }
 0xb10   :  { %v3542_v39 = vpop.permute.xlu1 %3541 }
 0xb11   :  { %9656 = vmatprep.subr.mxu1 %v3542_v39 }
 0xb12   :  { %v10288_v31 = vpop.eup %10287  ;;  %3242 = vadd.xlane.f32.xlu1 %v3241_v63 }
 0xb13   :  { %v3259_v44 = vsel %vm789_vm3, %v10288_v31, 0.0 }
 0xb14   :  { %v10290_v18 = vpop.eup %10289 }
 0xb15   :  { %v11452_v9 = vpop.eup %10291  ;;  %v3256_v15 = vsel %vm789_vm3, %v10290_v18, 0.0 }
 0xb16   :  { %v10294_v45 = vpop.eup %10293  ;;  %3260 = vadd.xlane.f32.xlu1 %v3259_v44  ;;  %3257 = vadd.xlane.f32.xlu0 %v3256_v15  ;;  %v3253_v21 = vsel %vm789_vm3, %v11452_v9, 0.0 }
 0xb17   :  { %v3250_v29 = vsel %vm789_vm3, %v10294_v45, 0.0 }
 0xb1a   :  { %3254 = vadd.xlane.f32.xlu1 %v3253_v21  ;;  %3251 = vadd.xlane.f32.xlu0 %v3250_v29 }
 0xb2b   :  { %3539 = vrot.lane.b32.xlu1 %v10867_v47, %s13033_s6  ;;  %v13067_v47 = vpack.i.bf16 %v11239_v7, %v11241_v16 }
 0xb2f   :  { %10053 = vrot.lane.b32.xlu1 %v10052_v2, %s13031_s3 }
 0xb30   :  { %3452 = vrot.lane.b32.xlu0 %v10863_v46, %s13033_s6  ;;  %v13068_v46 = vpack.i.bf16 %v11245_v25, %v11247_v60 }
 0xb33   :  { %10063 = vrot.lane.b32.xlu1 %v10062_v0, %s10547_s27 }
 0xb34   :  { %10048 = vrot.lane.b32.xlu0 %v13066_v20, %s13031_s3 }
 0xb37   :  { %10073 = vrot.lane.b32.xlu1 %v13067_v47, %s13031_s3  ;;  %v13070_v47 = vpack.i.bf16 %v11416_v53, %v11418_v62 }
 0xb38   :  { %10058 = vrot.lane.b32.xlu0 %v10057_v4, %s10547_s27 }
 0xb3c   :  { %10068 = vrot.lane.b32.xlu0 %v13068_v46, %s13031_s3  ;;  %s13075_s3 = smov 48  }
 0xb8f   :  { %v3246_v43 = vpop.xlane.xlu0 %3245 }
 0xb90   :  { %10295 = vrcp.f32 %v3246_v43 }
 0xb93   :  { %v3240_v58 = vpop.xlane.xlu0 %3239 }
 0xb94   :  { %10297 = vrcp.f32 %v3240_v58 }
 0xb97   :  { %v3249_v2 = vpop.xlane.xlu1 %3248 }
 0xb98   :  { %10299 = vrcp.f32 %v3249_v2 }
 0xb9b   :  { %v3243_v51 = vpop.xlane.xlu1 %3242 }
 0xb9c   :  { %10301 = vrcp.f32 %v3243_v51 }
 0xb9d   :  { %v10296_v6 = vpop.eup %10295 }
 0xb9e   :  { %v3272_v7 = vmul.f32 %v10296_v6, %v11442_v48 }
 0xb9f   :  { %v3261_v16 = vpop.xlane.xlu1 %3260  ;;  %v3258_v11 = vpop.xlane.xlu0 %3257 }
 0xba0   :  { %10303 = vrcp.f32 %v3261_v16  ;;  %9646 = vmatprep.mubr.msk.f32.mxu1 %vm789_vm3, %v3272_v7 }
 0xba1   :  { %v10298_v57 = vpop.eup %10297  ;;  %10305 = vrcp.f32 %v3258_v11 }
 0xba2   :  { %v3270_v25 = vmul.f32 %v10298_v57, %v10282_v59 }
 0xba3   :  { %v3255_v60 = vpop.xlane.xlu1 %3254  ;;  %v3252_v0 = vpop.xlane.xlu0 %3251 }
 0xba4   :  { %10307 = vrcp.f32 %v3255_v60  ;;  %9639 = vmatprep.mubr.msk.f32.mxu0 %vm789_vm3, %v3270_v25 }
 0xba5   :  { %v10300_v10 = vpop.eup %10299  ;;  %10309 = vrcp.f32 %v3252_v0 }
 0xba6   :  { %v3273_v27 = vmul.f32 %v10300_v10, %v10284_v19 }
 0xba7   :  { %v3540_v4 = vpop.permute.xlu1 %3539  ;;  %v3453_v22 = vpop.permute.xlu0 %3452 }
 0xba8   :  { %9647 = vmatmul.mubr.msk.f32.vlgmr.msra.gmra.mxu1 %vm789_vm3, %v3273_v27 }
 0xba9   :  { %v10302_v48 = vpop.eup %10301  ;;  %9657 = vmatpush3.msra.mxu1 %v3542_v39  ;;  %v3748_v39 = vld [vmem:[%s13069_s2 + $0x8] sm:$0xff] }
 0xbaa   :  { %9658 = vmatprep.subr.mxu1 %v3540_v4  ;;  %v3271_v56 = vmul.f32 %v10302_v48, %v10286_v34  ;;  %v3747_v34 = vld [vmem:[%s13069_s2] sm:$0xff] }
 0xbab   :  { %9659 = vmatpush3.msra.mxu1 %v3540_v4  ;;  %v3755_v63 = vpack.c.bf16 %v3748_v39, %v3747_v34  ;;  %v10054_v2 = vpop.permute.xlu1 %10053  ;;  %v10049_v37 = vpop.permute.xlu0 %10048 }
 0xbac   :  { %9640 = vmatmul.mubr.msk.f32.vlgmr.msra.gmra.mxu0 %vm789_vm3, %v3271_v56  ;;  %v10056_v6 = vunpack.i.h.bf16 %v10054_v2  ;;  %v10055_v7 = vunpack.i.l.bf16 %v10054_v2  ;;  %v10051_v16 = vunpack.i.h.bf16 %v10049_v37  ;;  %v10050_v11 = vunpack.i.l.bf16 %v10049_v37 }
 0xbad   :  { %v10304_v3 = vpop.eup %10303  ;;  %9650 = vmatpush3.msra.mxu0 %v11447_v1  ;;  %v3749_v1 = vld [vmem:[%s13069_s2 + $0x10] sm:$0xff] }
 0xbae   :  { %v10306_v14 = vpop.eup %10305  ;;  %9651 = vmatprep.subr.mxu0 %v3453_v22  ;;  %v3277_v61 = vmul.f32 %v10304_v3, %v10288_v31  ;;  %v3756_v12 = vpack.c.bf16 %v3750_v33, %v3749_v1  ;;  %v3725_v4 = vsel %vm430_vm2, %v11063_v30, %v10056_v6  ;;  %v3724_v48 = vsel %vm430_vm2, %v11065_v32, %v10055_v7 }
 0xbaf   :  { %9652 = vmatpush3.msra.mxu0 %v3453_v22  ;;  %v3276_v36 = vmul.f32 %v10306_v14, %v10290_v18  ;;  %v10064_v50 = vpop.permute.xlu1 %10063  ;;  %v3723_v56 = vsel %vm430_vm2, %v11067_v35, %v10051_v16  ;;  %v3722_v3 = vsel %vm430_vm2, %v11071_v40, %v10050_v11 }
 0xbb0   :  { %9663 = vmatprep.subr.bf16.mxu0 %v3756_v12  ;;  %v10066_v53 = vunpack.i.h.bf16 %v10064_v50  ;;  %v10065_v62 = vunpack.i.l.bf16 %v10064_v50 }
 0xbb1   :  { %v10308_v59 = vpop.eup %10307  ;;  %9660 = vmatprep.mubr.msk.f32.mxu1 %vm789_vm3, %v3276_v36 }
 0xbb2   :  { %v10310_v5 = vpop.eup %10309  ;;  %9661 = vmatmul.mubr.msk.f32.vlgmr.msra.gmra.mxu1 %vm789_vm3, %v3277_v61  ;;  %v3275_v19 = vmul.f32 %v10308_v59, %v11452_v9  ;;  %v3732_v36 = vsel %vm789_vm3, %v3724_v48, %v10065_v62  ;;  %v3733_v61 = vsel %vm789_vm3, %v3725_v4, %v10066_v53 }
 0xbb3   :  { %v3274_v52 = vmul.f32 %v10310_v5, %v10294_v45  ;;  %v10074_v51 = vpop.permute.xlu1 %10073 }
 0xbb4   :  { %v10076_v34 = vunpack.i.h.bf16 %v10074_v51  ;;  %v10075_v39 = vunpack.i.l.bf16 %v10074_v51 }
 0xbb5   :  { %9653 = vmatprep.mubr.msk.f32.mxu0 %vm789_vm3, %v3274_v52 }
 0xbb6   :  { %9654 = vmatmul.mubr.msk.f32.vlgmr.msra.gmra.mxu0 %vm789_vm3, %v3275_v19 }
 0xbb7   :  { %9664 = vmatpush3.bf16.msra.mxu0 %v3756_v12 }
 0xbb8   :  { %9665 = vmatprep.subr.bf16.mxu0 %v3755_v63 }
 0xbbb   :  { %9666 = vmatpush3.bf16.msra.mxu0 %v3755_v63 }
 0xc68   :  { %v9648_v31 = vpop.f32.mrf.mxu1 }
 0xc6a   :  { %v3443_v18 = vpop.f32.mrf.mxu1 }
 0xc6b   :  { %v10077_v9 = vpack.i.bf16 %v9648_v31, %v3443_v18 }
 0xc6c   :  { %v9641_v44 = vpop.f32.mrf.mxu0 }
 0xc6d   :  { %10078 = vrot.lane.b32.xlu1 %v10077_v9, %s13049_s0 }
 0xc6e   :  { %v3356_v15 = vpop.f32.mrf.mxu0 }
 0xc6f   :  { %v10082_v45 = vpack.i.bf16 %v9641_v44, %v3356_v15 }
 0xc71   :  { %10093 = vrot.lane.b32.xlu1 %v10092_v26, %s10547_s27  ;;  %10083 = vrot.lane.b32.xlu0 %v10082_v45, %s13049_s0  ;;  %v10059_v26 = vpop.permute.xlu0 %10058 }
 0xc72   :  { %v9662_v21 = vpop.f32.mrf.mxu1  ;;  %v10061_v60 = vunpack.i.h.bf16 %v10059_v26  ;;  %v10060_v0 = vunpack.i.l.bf16 %v10059_v26 }
 0xc74   :  { %v3617_v29 = vpop.f32.mrf.mxu1  ;;  %v3730_v52 = vsel %vm789_vm3, %v3722_v3, %v10060_v0  ;;  %v3731_v30 = vsel %vm789_vm3, %v3723_v56, %v10061_v60 }
 0xc75   :  { %v10102_v20 = vpack.i.bf16 %v9662_v21, %v3617_v29  ;;  %10088 = vrot.lane.b32.xlu0 %v13070_v47, %s10547_s27  ;;  %v10069_v57 = vpop.permute.xlu0 %10068  ;;  %v3728_v47 = vsel %vm430_vm2, %v11073_v41, %v10075_v39 }
 0xc76   :  { %v9655_v46 = vpop.f32.mrf.mxu0  ;;  %v10071_v63 = vunpack.i.h.bf16 %v10069_v57  ;;  %v10070_v31 = vunpack.i.l.bf16 %v10069_v57  ;;  %v8899_v57 = vld [vmem:[%s13010_s8] ss:$0 sm:$0xff] }
 0xc77   :  { %10103 = vrot.lane.b32.xlu1 %v10102_v20, %s13049_s0  ;;  %v3729_v20 = vsel %vm430_vm2, %v11069_v38, %v10076_v34 }
 0xc78   :  { %v3530_v43 = vpop.f32.mrf.mxu0 }
 0xc79   :  { %v10097_v58 = vpack.i.bf16 %v9655_v46, %v3530_v43  ;;  %v3727_v46 = vsel %vm430_vm2, %v11075_v42, %v10071_v63  ;;  %v3726_v43 = vsel %vm430_vm2, %v11078_v49, %v10070_v31 }
 0xc7b   :  { %10098 = vrot.lane.b32.xlu0 %v10097_v58, %s13049_s0  ;;  %s13079_s0 = smov 8  }
 0xcdf   :  { %v10079_v25 = vpop.permute.xlu1 %10078 }
 0xce0   :  { %v10081_v10 = vunpack.i.h.bf16 %v10079_v25  ;;  %v10080_v27 = vunpack.i.l.bf16 %v10079_v25 }
 0xce2   :  { %v3742_v32 = vsel %vm3738_vm4, %v3733_v61, %v10081_v10  ;;  %v3741_v19 = vsel %vm3738_vm4, %v3732_v36, %v10080_v27 }
 0xce3   :  { %v10094_v22 = vpop.permute.xlu1 %10093  ;;  %v10084_v14 = vpop.permute.xlu0 %10083  ;;  %v3752_v12 = vpack.c.bf16 %v3742_v32, %v3741_v19 }
 0xce4   :  { %v10086_v59 = vunpack.i.h.bf16 %v10084_v14  ;;  %v10085_v5 = vunpack.i.l.bf16 %v10084_v14  ;;  %v10096_v9 = vunpack.i.h.bf16 %v10094_v22  ;;  %v10095_v44 = vunpack.i.l.bf16 %v10094_v22 }
 0xce6   :  { %v3739_v35 = vsel %vm3738_vm4, %v3730_v52, %v10085_v5  ;;  %v3740_v40 = vsel %vm3738_vm4, %v3731_v30, %v10086_v59  ;;  %v3737_v2 = vsel %vm789_vm3, %v3729_v20, %v10096_v9  ;;  %v3736_v37 = vsel %vm789_vm3, %v3728_v47, %v10095_v44 }
 0xce7   :  { %v10089_v1 = vpop.permute.xlu0 %10088  ;;  %v3751_v33 = vpack.c.bf16 %v3740_v40, %v3739_v35 }
 0xce8   :  { %v10091_v15 = vunpack.i.h.bf16 %v10089_v1  ;;  %v10090_v45 = vunpack.i.l.bf16 %v10089_v1 }
 0xce9   :  { %v10104_v18 = vpop.permute.xlu1 %10103  ;;  %9667 = vmatprep.mubr.msk.bf16.mxu0 %vm188_vm1, %v3751_v33 }
 0xcea   :  { %9668 = vmatmul.mubr.msk.bf16.vlgmr.msra.gmra.mxu0 %vm188_vm1, %v3752_v12  ;;  %v10106_v21 = vunpack.i.h.bf16 %v10104_v18  ;;  %v10105_v29 = vunpack.i.l.bf16 %v10104_v18  ;;  %v3734_v51 = vsel %vm789_vm3, %v3726_v43, %v10090_v45  ;;  %v3735_v38 = vsel %vm789_vm3, %v3727_v46, %v10091_v15 }
 0xcec   :  { %v3746_v6 = vsel %vm3738_vm4, %v3737_v2, %v10106_v21  ;;  %v3745_v41 = vsel %vm3738_vm4, %v3736_v37, %v10105_v29 }
 0xced   :  { %v10099_v58 = vpop.permute.xlu0 %10098  ;;  %v3754_v16 = vpack.c.bf16 %v3746_v6, %v3745_v41 }
 0xcee   :  { %v10101_v50 = vunpack.i.h.bf16 %v10099_v58  ;;  %v10100_v26 = vunpack.i.l.bf16 %v10099_v58 }
 0xcf0   :  { %v3743_v42 = vsel %vm3738_vm4, %v3734_v51, %v10100_v26  ;;  %v3744_v7 = vsel %vm3738_vm4, %v3735_v38, %v10101_v50 }
 0xcf1   :  { %v3753_v49 = vpack.c.bf16 %v3744_v7, %v3743_v42 }
 0xcf3   :  { %9671 = vmatprep.mubr.msk.bf16.mxu0 %vm188_vm1, %v3753_v49 }
 0xcf4   :  { %9672 = vmatmul.mubr.msk.bf16.gmra.mxu0 %vm188_vm1, %v3754_v16 }
 0xdaa   :  { %v9669_v11 = vpop.f32.mrf.mxu0 }
 0xdab   :  { %v3819_v53 = vadd.f32 %v9669_v11, %v8899_v57 }
 0xdac   :  { %v3810_v25 = vpop.f32.mrf.mxu0 }
 0xdad   :  { %v3811_v62 = vadd.f32 %v8899_v57, %v3810_v25  ;;  %v3843_v27 = vadd.f32 %v3819_v53, %v10804_v54 }
 0xdae   :  { %v9670_v60 = vpop.f32.mrf.mxu0 }
 0xdaf   :  { %v3841_v0 = vadd.f32 %v3811_v62, %v10795_v55  ;;  %v3822_v4 = vadd.f32 %v9670_v60, %v8899_v57  ;;  %v3857_v61 = vsel %vm188_vm1, %v3843_v27, 0.0 }
 0xdb0   :  { %v3813_v10 = vpop.f32.mrf.mxu0 }
 0xdb1   :  { %v3814_v48 = vadd.f32 %v8899_v57, %v3813_v10  ;;  %v3851_v56 = vsel %vm188_vm1, %v3841_v0, 0.0  ;;  %v3844_v14 = vadd.f32 %v3822_v4, %v10806_v17  ;;  %v3985_v4 = vld [vmem:[%s13011_s11 + $0x10] sm:$0xff] }
 0xdb2   :  { %3852 = vadd.xlane.f32.xlu0 %v3851_v56 }
 0xdb3   :  { %v3842_v3 = vadd.f32 %v3814_v48, %v10797_v8  ;;  %v3860_v30 = vsel %vm188_vm1, %v3844_v14, 0.0  ;;  %v3986_v48 = vld [vmem:[%s13011_s11 + $0x18] sm:$0xff] }
 0xdb4   :  { %v9673_v22 = vpop.f32.mrf.mxu0  ;;  %v3992_v56 = vpack.c.bf16 %v3986_v48, %v3985_v4 }
 0xdb5   :  { %v3854_v36 = vsel %vm188_vm1, %v3842_v3, 0.0  ;;  %v3835_v54 = vadd.f32 %v9673_v22, %v8899_v57  ;;  %v3984_v22 = vld [vmem:[%s13011_s11 + $0x8] sm:$0xff] }
 0xdb6   :  { %v3826_v59 = vpop.f32.mrf.mxu0  ;;  %3855 = vadd.xlane.f32.xlu1 %v3854_v36  ;;  %3858 = vadd.xlane.f32.xlu0 %v3857_v61 }
 0xdb7   :  { %v3827_v55 = vadd.f32 %v8899_v57, %v3826_v59  ;;  %v3847_v17 = vadd.f32 %v3835_v54, %v10821_v13  ;;  %9675 = vmatprep.subr.bf16.mxu1 %v3992_v56 }
 0xdb8   :  { %v9674_v5 = vpop.f32.mrf.mxu0  ;;  %9676 = vmatpush3.bf16.msra.mxu1 %v3992_v56 }
 0xdb9   :  { %v3845_v52 = vadd.f32 %v3827_v55, %v10813_v23  ;;  %v3838_v8 = vadd.f32 %v9674_v5, %v8899_v57  ;;  %v3869_v23 = vsel %vm188_vm1, %v3847_v17, 0.0 }
 0xdba   :  { %v3829_v32 = vpop.f32.mrf.mxu0  ;;  %3861 = vadd.xlane.f32.xlu0 %v3860_v30 }
 0xdbb   :  { %v3830_v19 = vadd.f32 %v8899_v57, %v3829_v32  ;;  %v3863_v40 = vsel %vm188_vm1, %v3845_v52, 0.0  ;;  %v3848_v1 = vadd.f32 %v3838_v8, %v10823_v28 }
 0xdbd   :  { %v3846_v35 = vadd.f32 %v3830_v19, %v10815_v24  ;;  %v3872_v12 = vsel %vm188_vm1, %v3848_v1, 0.0 }
 0xdbe   :  { %3864 = vadd.xlane.f32.xlu0 %v3863_v40 }
 0xdbf   :  { %v3866_v33 = vsel %vm188_vm1, %v3846_v35, 0.0 }
 0xdc0   :  { %3867 = vadd.xlane.f32.xlu1 %v3866_v33 }
 0xdc2   :  { %3870 = vadd.xlane.f32.xlu0 %v3869_v23 }
 0xdc4   :  { %3873 = vadd.xlane.f32.xlu1 %v3872_v12 }
 0xe3b   :  { %v3853_v34 = vpop.xlane.xlu0 %3852 }
 0xe3c   :  { %v3875_v39 = vmul.f32 0.03125, %v3853_v34 }
 0xe3e   :  { %v11577_v63 = vsub.f32 %v3841_v0, %v3875_v39 }
 0xe3f   :  { %v3856_v13 = vpop.xlane.xlu1 %3855  ;;  %v3859_v24 = vpop.xlane.xlu0 %3858 }
 0xe40   :  { %v3876_v31 = vmul.f32 0.03125, %v3856_v13  ;;  %v3877_v18 = vmul.f32 0.03125, %v3859_v24  ;;  %v3891_v28 = vmul.f32 %v11577_v63, %v11577_v63 }
 0xe42   :  { %v11581_v9 = vsub.f32 %v3842_v3, %v3876_v31  ;;  %v11583_v44 = vsub.f32 %v3843_v27, %v3877_v18  ;;  %v3899_v15 = vsel %vm188_vm1, %v3891_v28, 0.0  ;;  %v3983_v3 = vld [vmem:[%s13011_s11] sm:$0xff] }
 0xe43   :  { %3900 = vadd.xlane.f32.xlu0 %v3899_v15  ;;  %v3862_v45 = vpop.xlane.xlu0 %3861  ;;  %v8904_v15 = vld [vmem:[%s13012_s9] ss:$0 sm:$0xff] }
 0xe44   :  { %v3878_v21 = vmul.f32 0.03125, %v3862_v45  ;;  %v3892_v29 = vmul.f32 %v11581_v9, %v11581_v9  ;;  %v3893_v20 = vmul.f32 %v11583_v44, %v11583_v44 }
 0xe46   :  { %v11590_v47 = vsub.f32 %v3844_v14, %v3878_v21  ;;  %v3902_v46 = vsel %vm188_vm1, %v3892_v29, 0.0  ;;  %v3905_v43 = vsel %vm188_vm1, %v3893_v20, 0.0  ;;  %v3991_v14 = vpack.c.bf16 %v3984_v22, %v3983_v3 }
 0xe47   :  { %3903 = vadd.xlane.f32.xlu1 %v3902_v46  ;;  %3906 = vadd.xlane.f32.xlu0 %v3905_v43  ;;  %v3865_v58 = vpop.xlane.xlu0 %3864 }
 0xe48   :  { %v3879_v2 = vmul.f32 0.03125, %v3865_v58  ;;  %v3894_v37 = vmul.f32 %v11590_v47, %v11590_v47  ;;  %9677 = vmatprep.subr.bf16.mxu1 %v3991_v14  ;;  %v8905_v58 = vld [vmem:[%s13013_s10] ss:$0 sm:$0xff] }
 0xe49   :  { %v3868_v50 = vpop.xlane.xlu1 %3867  ;;  %9678 = vmatpush3.bf16.msra.mxu1 %v3991_v14 }
 0xe4a   :  { %v11596_v26 = vsub.f32 %v3845_v52, %v3879_v2  ;;  %v3880_v51 = vmul.f32 0.03125, %v3868_v50  ;;  %v3908_v38 = vsel %vm188_vm1, %v3894_v37, 0.0 }
 0xe4b   :  { %3909 = vadd.xlane.f32.xlu1 %v3908_v38  ;;  %v3871_v6 = vpop.xlane.xlu0 %3870 }
 0xe4c   :  { %v11599_v41 = vsub.f32 %v3846_v35, %v3880_v51  ;;  %v3881_v42 = vmul.f32 0.03125, %v3871_v6  ;;  %v3895_v7 = vmul.f32 %v11596_v26, %v11596_v26 }
 0xe4d   :  { %v3874_v49 = vpop.xlane.xlu1 %3873 }
 0xe4e   :  { %v11603_v16 = vsub.f32 %v3847_v17, %v3881_v42  ;;  %v3882_v11 = vmul.f32 0.03125, %v3874_v49  ;;  %v3911_v57 = vsel %vm188_vm1, %v3895_v7, 0.0  ;;  %v3896_v25 = vmul.f32 %v11599_v41, %v11599_v41 }
 0xe4f   :  { %3912 = vadd.xlane.f32.xlu0 %v3911_v57 }
 0xe50   :  { %v11608_v53 = vsub.f32 %v3848_v1, %v3882_v11  ;;  %v3914_v62 = vsel %vm188_vm1, %v3896_v25, 0.0  ;;  %v3897_v60 = vmul.f32 %v11603_v16, %v11603_v16 }
 0xe51   :  { %3915 = vadd.xlane.f32.xlu1 %v3914_v62 }
 0xe52   :  { %v3917_v0 = vsel %vm188_vm1, %v3897_v60, 0.0  ;;  %v3898_v10 = vmul.f32 %v11608_v53, %v11608_v53 }
 0xe53   :  { %3918 = vadd.xlane.f32.xlu0 %v3917_v0 }
 0xe54   :  { %v3920_v27 = vsel %vm188_vm1, %v3898_v10, 0.0 }
 0xe55   :  { %3921 = vadd.xlane.f32.xlu1 %v3920_v27 }
 0xecc   :  { %v3901_v36 = vpop.xlane.xlu0 %3900 }
 0xecd   :  { %v3923_v61 = vmul.f32 0.03125, %v3901_v36 }
 0xecf   :  { %v3931_v59 = vadd.f32 1e-05, %v3923_v61  ;;  %v4153_v61 = vld [vmem:[%s13014_s13 + $0x20] sm:$0xff] }
 0xed0   :  { %v3904_v55 = vpop.xlane.xlu1 %3903  ;;  %v3907_v5 = vpop.xlane.xlu0 %3906 }
 0xed1   :  { %10311 = vrsqrt.f32 %v3931_v59  ;;  %v3924_v54 = vmul.f32 0.03125, %v3904_v55  ;;  %v3925_v52 = vmul.f32 0.03125, %v3907_v5  ;;  %v4154_v59 = vld [vmem:[%s13014_s13 + $0x28] sm:$0xff]  ;;  %v4151_v5 = vld [vmem:[%s13014_s13 + $0x10] sm:$0xff] }
 0xed2   :  { %v4163_v55 = vpack.c.bf16 %v4154_v59, %v4153_v61 }
 0xed3   :  { %v3932_v30 = vadd.f32 1e-05, %v3924_v54  ;;  %v3933_v32 = vadd.f32 1e-05, %v3925_v52  ;;  %v4152_v54 = vld [vmem:[%s13014_s13 + $0x18] sm:$0xff] }
 0xed4   :  { %v3910_v8 = vpop.xlane.xlu1 %3909  ;;  %v4162_v52 = vpack.c.bf16 %v4152_v54, %v4151_v5 }
 0xed5   :  { %10313 = vrsqrt.f32 %v3932_v30  ;;  %v3926_v19 = vmul.f32 0.03125, %v3910_v8  ;;  %v4149_v30 = vld [vmem:[%s13014_s13] sm:$0xff] }
 0xed6   :  { %10315 = vrsqrt.f32 %v3933_v32  ;;  %v4150_v32 = vld [vmem:[%s13014_s13 + $0x8] sm:$0xff] }
 0xed7   :  { %v3934_v17 = vadd.f32 1e-05, %v3926_v19  ;;  %v4161_v8 = vpack.c.bf16 %v4150_v32, %v4149_v30  ;;  %v8906_v19 = vld [vmem:[%s13015_s12] ss:$0 sm:$0xff] }
 0xed8   :  { %v3913_v35 = vpop.xlane.xlu0 %3912 }
 0xed9   :  { %10317 = vrsqrt.f32 %v3934_v17  ;;  %v3927_v40 = vmul.f32 0.03125, %v3913_v35 }
 0xeda   :  { %v3916_v1 = vpop.xlane.xlu1 %3915 }
 0xedb   :  { %v3935_v33 = vadd.f32 1e-05, %v3927_v40  ;;  %v3928_v23 = vmul.f32 0.03125, %v3916_v1 }
 0xedc   :  { %v3919_v12 = vpop.xlane.xlu0 %3918 }
 0xedd   :  { %10319 = vrsqrt.f32 %v3935_v33  ;;  %v3936_v34 = vadd.f32 1e-05, %v3928_v23  ;;  %v3929_v39 = vmul.f32 0.03125, %v3919_v12 }
 0xede   :  { %v10312_v13 = vpop.eup %10311  ;;  %v3922_v24 = vpop.xlane.xlu1 %3921 }
 0xedf   :  { %10321 = vrsqrt.f32 %v3936_v34  ;;  %v3937_v31 = vadd.f32 1e-05, %v3929_v39  ;;  %v3930_v18 = vmul.f32 0.03125, %v3922_v24  ;;  %v3947_v28 = vmul.f32 %v10312_v13, %v11577_v63 }
 0xee1   :  { %10323 = vrsqrt.f32 %v3937_v31  ;;  %v3938_v45 = vadd.f32 1e-05, %v3930_v18  ;;  %v3961_v46 = vmul.f32 %v8904_v15, %v3947_v28 }
 0xee2   :  { %v10314_v21 = vpop.eup %10313 }
 0xee3   :  { %v10316_v29 = vpop.eup %10315  ;;  %10325 = vrsqrt.f32 %v3938_v45  ;;  %v3948_v20 = vmul.f32 %v10314_v21, %v11581_v9  ;;  %v11639_v50 = vadd.f32 %v8905_v58, %v3961_v46 }
 0xee4   :  { %v3949_v43 = vmul.f32 %v10316_v29, %v11583_v44 }
 0xee5   :  { %v3962_v2 = vmul.f32 %v8904_v15, %v3948_v20 }
 0xee6   :  { %v10318_v63 = vpop.eup %10317  ;;  %v3963_v38 = vmul.f32 %v8904_v15, %v3949_v43 }
 0xee7   :  { %v3950_v37 = vmul.f32 %v10318_v63, %v11590_v47  ;;  %v11641_v51 = vadd.f32 %v8905_v58, %v3962_v2 }
 0xee8   :  { %v11646_v44 = vadd.f32 %v8905_v58, %v3963_v38 }
 0xee9   :  { %v3987_v6 = vpack.c.bf16 %v11641_v51, %v11639_v50  ;;  %v3964_v9 = vmul.f32 %v8904_v15, %v3950_v37 }
 0xeea   :  { %v10320_v42 = vpop.eup %10319 }
 0xeeb   :  { %9679 = vmatprep.mubr.msk.bf16.mxu1 %vm188_vm1, %v3987_v6  ;;  %v11648_v7 = vadd.f32 %v8905_v58, %v3964_v9  ;;  %v3951_v49 = vmul.f32 %v10320_v42, %v11596_v26 }
 0xeec   :  { %v10322_v11 = vpop.eup %10321 }
 0xeed   :  { %v3988_v47 = vpack.c.bf16 %v11648_v7, %v11646_v44  ;;  %v3952_v57 = vmul.f32 %v10322_v11, %v11599_v41  ;;  %v3965_v25 = vmul.f32 %v8904_v15, %v3951_v49 }
 0xeee   :  { %v10324_v62 = vpop.eup %10323 }
 0xeef   :  { %9680 = vmatmul.mubr.msk.bf16.vlgmr.msra.gmra.mxu1 %vm188_vm1, %v3988_v47  ;;  %v3966_v60 = vmul.f32 %v8904_v15, %v3952_v57  ;;  %v11655_v0 = vadd.f32 %v8905_v58, %v3965_v25  ;;  %v3953_v10 = vmul.f32 %v10324_v62, %v11603_v16  ;;  %v4155_v16 = vld [vmem:[%s13014_s13 + $0x30] sm:$0xff] }
 0xef0   :  { %v10326_v27 = vpop.eup %10325 }
 0xef1   :  { %v11658_v4 = vadd.f32 %v8905_v58, %v3966_v60  ;;  %v3954_v26 = vmul.f32 %v10326_v27, %v11608_v53  ;;  %v3967_v48 = vmul.f32 %v8904_v15, %v3953_v10  ;;  %v4156_v53 = vld [vmem:[%s13014_s13 + $0x38] sm:$0xff] }
 0xef2   :  { %v4164_v36 = vpack.c.bf16 %v4156_v53, %v4155_v16 }
 0xef3   :  { %v3989_v56 = vpack.c.bf16 %v11658_v4, %v11655_v0  ;;  %v3968_v3 = vmul.f32 %v8904_v15, %v3954_v26  ;;  %v11663_v41 = vadd.f32 %v8905_v58, %v3967_v48 }
 0xef4   :  { %9687 = vmatprep.subr.bf16.mxu0 %v4164_v36 }
 0xef5   :  { %9683 = vmatprep.mubr.msk.bf16.mxu1 %vm188_vm1, %v3989_v56  ;;  %v11666_v22 = vadd.f32 %v8905_v58, %v3968_v3  ;;  %9688 = vmatpush3.bf16.msra.mxu0 %v4164_v36 }
 0xef6   :  { %9689 = vmatprep.subr.bf16.mxu0 %v4163_v55 }
 0xef7   :  { %v3990_v14 = vpack.c.bf16 %v11666_v22, %v11663_v41 }
 0xef9   :  { %9684 = vmatmul.mubr.msk.bf16.gmra.mxu1 %vm188_vm1, %v3990_v14  ;;  %9690 = vmatpush3.bf16.msra.mxu0 %v4163_v55 }
 0xefa   :  { %9691 = vmatprep.subr.bf16.mxu0 %v4162_v52 }
 0xefd   :  { %9692 = vmatpush3.bf16.msra.mxu0 %v4162_v52 }
 0xefe   :  { %9693 = vmatprep.subr.bf16.mxu0 %v4161_v8 }
 0xf01   :  { %9694 = vmatpush3.bf16.msra.mxu0 %v4161_v8 }
 0xfaf   :  { %v9681_v17 = vpop.f32.mrf.mxu1 }
 0xfb0   :  { %v11698_v35 = vadd.f32 %v9681_v17, %v8906_v19 }
 0xfb1   :  { %v4046_v40 = vpop.f32.mrf.mxu1 }
 0xfb2   :  { %v4079_v1 = vmul.f32 %v11698_v35, %v11698_v35  ;;  %v11702_v33 = vadd.f32 %v8906_v19, %v4046_v40 }
 0xfb3   :  { %v9682_v23 = vpop.f32.mrf.mxu1 }
 0xfb4   :  { %v4087_v12 = vmul.f32 %v4079_v1, %v11698_v35  ;;  %v4077_v34 = vmul.f32 %v11702_v33, %v11702_v33  ;;  %v11707_v39 = vadd.f32 %v9682_v23, %v8906_v19 }
 0xfb5   :  { %v4049_v13 = vpop.f32.mrf.mxu1 }
 0xfb6   :  { %v4095_v24 = vmul.f32 0.044715, %v4087_v12  ;;  %v4085_v31 = vmul.f32 %v4077_v34, %v11702_v33  ;;  %v4080_v18 = vmul.f32 %v11707_v39, %v11707_v39  ;;  %v11712_v28 = vadd.f32 %v8906_v19, %v4049_v13 }
 0xfb8   :  { %v4103_v15 = vadd.f32 %v4095_v24, %v11698_v35  ;;  %v4093_v45 = vmul.f32 0.044715, %v4085_v31  ;;  %v4088_v21 = vmul.f32 %v4080_v18, %v11707_v39  ;;  %v4078_v29 = vmul.f32 %v11712_v28, %v11712_v28 }
 0xfb9   :  { %v9685_v20 = vpop.f32.mrf.mxu1 }
 0xfba   :  { %v4111_v46 = vmul.f32 0.7978846, %v4103_v15  ;;  %v4101_v43 = vadd.f32 %v4093_v45, %v11702_v33  ;;  %v4096_v58 = vmul.f32 0.044715, %v4088_v21  ;;  %v4086_v2 = vmul.f32 %v4078_v29, %v11712_v28 }
 0xfbb   :  { %v11720_v63 = vadd.f32 %v9685_v20, %v8906_v19  ;;  %v4062_v37 = vpop.f32.mrf.mxu1 }
 0xfbc   :  { %v4109_v38 = vmul.f32 0.7978846, %v4101_v43  ;;  %v4104_v6 = vadd.f32 %v4096_v58, %v11707_v39  ;;  %v4094_v9 = vmul.f32 0.044715, %v4086_v2  ;;  %10327 = vtanh.f32 %v4111_v46 }
 0xfbd   :  { %v4083_v42 = vmul.f32 %v11720_v63, %v11720_v63  ;;  %v11725_v49 = vadd.f32 %v8906_v19, %v4062_v37  ;;  %v9686_v11 = vpop.f32.mrf.mxu1 }
 0xfbe   :  { %10329 = vtanh.f32 %v4109_v38  ;;  %v4112_v47 = vmul.f32 0.7978846, %v4104_v6  ;;  %v4102_v57 = vadd.f32 %v4094_v9, %v11712_v28  ;;  %v4074_v25 = vadd.f32 %v9686_v11, %v8906_v19 }
 0xfbf   :  { %v4091_v62 = vmul.f32 %v4083_v42, %v11720_v63  ;;  %v4081_v60 = vmul.f32 %v11725_v49, %v11725_v49  ;;  %v4065_v10 = vpop.f32.mrf.mxu1 }
 0xfc0   :  { %10331 = vtanh.f32 %v4112_v47  ;;  %v4110_v27 = vmul.f32 0.7978846, %v4102_v57  ;;  %v4084_v26 = vmul.f32 %v4074_v25, %v4074_v25  ;;  %v4066_v48 = vadd.f32 %v8906_v19, %v4065_v10 }
 0xfc1   :  { %v4099_v56 = vmul.f32 0.044715, %v4091_v62  ;;  %v4089_v3 = vmul.f32 %v4081_v60, %v11725_v49 }
 0xfc2   :  { %10333 = vtanh.f32 %v4110_v27  ;;  %v4092_v14 = vmul.f32 %v4084_v26, %v4074_v25  ;;  %v4082_v16 = vmul.f32 %v4066_v48, %v4066_v48 }
 0xfc3   :  { %v4107_v53 = vadd.f32 %v4099_v56, %v11720_v63  ;;  %v4097_v36 = vmul.f32 0.044715, %v4089_v3  ;;  %v8911_v3 = vld [vmem:[%s13016_s14] ss:$0 sm:$0xff] }
 0xfc4   :  { %v4100_v61 = vmul.f32 0.044715, %v4092_v14  ;;  %v4090_v59 = vmul.f32 %v4082_v16, %v4066_v48 }
 0xfc5   :  { %v4115_v55 = vmul.f32 0.7978846, %v4107_v53  ;;  %v4105_v5 = vadd.f32 %v4097_v36, %v11725_v49 }
 0xfc6   :  { %v4108_v54 = vadd.f32 %v4100_v61, %v4074_v25  ;;  %v4098_v52 = vmul.f32 0.044715, %v4090_v59 }
 0xfc7   :  { %10335 = vtanh.f32 %v4115_v55  ;;  %v4113_v30 = vmul.f32 0.7978846, %v4105_v5 }
 0xfc8   :  { %v4116_v32 = vmul.f32 0.7978846, %v4108_v54  ;;  %v4106_v8 = vadd.f32 %v4098_v52, %v4066_v48 }
 0xfc9   :  { %10337 = vtanh.f32 %v4113_v30  ;;  %v10328_v19 = vpop.eup %10327 }
 0xfca   :  { %10339 = vtanh.f32 %v4116_v32  ;;  %v4114_v17 = vmul.f32 0.7978846, %v4106_v8  ;;  %v4127_v12 = vadd.f32 1.0, %v10328_v19 }
 0xfcb   :  { %v10330_v40 = vpop.eup %10329 }
 0xfcc   :  { %v4125_v1 = vadd.f32 1.0, %v10330_v40  ;;  %10341 = vtanh.f32 %v4114_v17  ;;  %v4135_v15 = vmul.f32 0.5, %v4127_v12 }
 0xfcd   :  { %v10332_v23 = vpop.eup %10331 }
 0xfce   :  { %v4128_v34 = vadd.f32 1.0, %v10332_v23  ;;  %v4133_v24 = vmul.f32 0.5, %v4125_v1  ;;  %v4143_v43 = vmul.f32 %v4135_v15, %v11698_v35 }
 0xfcf   :  { %v10334_v13 = vpop.eup %10333 }
 0xfd0   :  { %v4136_v31 = vmul.f32 0.5, %v4128_v34  ;;  %v4126_v18 = vadd.f32 1.0, %v10334_v13  ;;  %v4141_v20 = vmul.f32 %v4133_v24, %v11702_v33 }
 0xfd2   :  { %v4134_v45 = vmul.f32 0.5, %v4126_v18  ;;  %v4144_v21 = vmul.f32 %v4136_v31, %v11707_v39 }
 0xfd4   :  { %v10336_v29 = vpop.eup %10335  ;;  %v4142_v46 = vmul.f32 %v4134_v45, %v11712_v28  ;;  %v4158_v38 = vpack.c.bf16 %v4144_v21, %v4143_v43 }
 0xfd5   :  { %v4131_v6 = vadd.f32 1.0, %v10336_v29 }
 0xfd6   :  { %v10338_v58 = vpop.eup %10337  ;;  %v4157_v2 = vpack.c.bf16 %v4142_v46, %v4141_v20 }
 0xfd7   :  { %v10340_v37 = vpop.eup %10339  ;;  %v4129_v9 = vadd.f32 1.0, %v10338_v58  ;;  %v4139_v33 = vmul.f32 0.5, %v4131_v6 }
 0xfd8   :  { %v4132_v42 = vadd.f32 1.0, %v10340_v37  ;;  %9695 = vmatprep.mubr.msk.bf16.mxu0 %vm108_vm0, %v4157_v2 }
 0xfd9   :  { %v10342_v11 = vpop.eup %10341  ;;  %9696 = vmatmul.mubr.msk.bf16.vlgmr.msra.gmra.mxu0 %vm108_vm0, %v4158_v38  ;;  %v4137_v39 = vmul.f32 0.5, %v4129_v9  ;;  %v4147_v10 = vmul.f32 %v4139_v33, %v11720_v63 }
 0xfda   :  { %v4140_v47 = vmul.f32 0.5, %v4132_v42  ;;  %v4130_v57 = vadd.f32 1.0, %v10342_v11 }
 0xfdb   :  { %v4145_v35 = vmul.f32 %v4137_v39, %v11725_v49 }
 0xfdc   :  { %v4138_v62 = vmul.f32 0.5, %v4130_v57  ;;  %v4148_v28 = vmul.f32 %v4140_v47, %v4074_v25 }
 0xfde   :  { %v4146_v60 = vmul.f32 %v4138_v62, %v4066_v48  ;;  %v4160_v26 = vpack.c.bf16 %v4148_v28, %v4147_v10 }
 0xfe0   :  { %v4159_v27 = vpack.c.bf16 %v4146_v60, %v4145_v35 }
 0xfe2   :  { %9699 = vmatprep.mubr.msk.bf16.mxu0 %vm108_vm0, %v4159_v27 }
 0xfe3   :  { %9700 = vmatmul.mubr.msk.bf16.gmra.mxu0 %vm108_vm0, %v4160_v26 }
0x1099   :  { %v9697_v56 = vpop.f32.mrf.mxu0 }
0x109a   :  { %v4227_v16 = vadd.f32 %v9697_v56, %v8911_v3 }
0x109b   :  { %v4218_v14 = vpop.f32.mrf.mxu0 }
0x109c   :  { %v4219_v53 = vadd.f32 %v8911_v3, %v4218_v14  ;;  %v4251_v63 = vadd.f32 %v4227_v16, %v11646_v44 }
0x109d   :  { %v9698_v25 = vpop.f32.mrf.mxu0 }
0x109e   :  { %v4249_v49 = vadd.f32 %v4219_v53, %v11639_v50  ;;  %v4230_v36 = vadd.f32 %v9698_v25, %v8911_v3  ;;  %v4265_v30 = vsel %vm188_vm1, %v4251_v63, 0.0 }
0x109f   :  { %v4221_v48 = vpop.f32.mrf.mxu0 }
0x10a0   :  { %v4222_v61 = vadd.f32 %v8911_v3, %v4221_v48  ;;  %v4259_v59 = vsel %vm188_vm1, %v4249_v49, 0.0  ;;  %v4252_v54 = vadd.f32 %v4230_v36, %v11648_v7  ;;  %v8920_v36 = vld [vmem:[%s13062_s7 + $0x30] sm:$0xff] }
0x10a1   :  { %4260 = vadd.xlane.f32.xlu0 %v4259_v59 }
0x10a2   :  { %v4250_v55 = vadd.f32 %v4222_v61, %v11641_v51  ;;  %v4268_v17 = vsel %vm188_vm1, %v4252_v54, 0.0  ;;  %v8921_v61 = vld [vmem:[%s13062_s7 + $0x38] sm:$0xff] }
0x10a3   :  { %v9701_v5 = vpop.f32.mrf.mxu0  ;;  %v4401_v59 = vpack.c.bf16 %v8921_v61, %v8920_v36 }
0x10a4   :  { %v4262_v52 = vsel %vm188_vm1, %v4250_v55, 0.0  ;;  %v4243_v50 = vadd.f32 %v9701_v5, %v8911_v3  ;;  %v8919_v5 = vld [vmem:[%s13062_s7 + $0x28] sm:$0xff] }
0x10a5   :  { %v4234_v32 = vpop.f32.mrf.mxu0  ;;  %4263 = vadd.xlane.f32.xlu1 %v4262_v52  ;;  %4266 = vadd.xlane.f32.xlu0 %v4265_v30 }
0x10a6   :  { %v4235_v8 = vadd.f32 %v8911_v3, %v4234_v32  ;;  %v4255_v51 = vadd.f32 %v4243_v50, %v11663_v41  ;;  %9703 = vmatprep.subr.bf16.mxu1 %v4401_v59 }
0x10a7   :  { %v9702_v44 = vpop.f32.mrf.mxu0  ;;  %9704 = vmatpush3.bf16.msra.mxu1 %v4401_v59 }
0x10a8   :  { %v4253_v19 = vadd.f32 %v4235_v8, %v11655_v0  ;;  %v4246_v1 = vadd.f32 %v9702_v44, %v8911_v3  ;;  %v4277_v24 = vsel %vm188_vm1, %v4255_v51, 0.0 }
0x10a9   :  { %v4237_v40 = vpop.f32.mrf.mxu0  ;;  %4269 = vadd.xlane.f32.xlu1 %v4268_v17 }
0x10aa   :  { %v4238_v7 = vadd.f32 %v8911_v3, %v4237_v40  ;;  %v4271_v23 = vsel %vm188_vm1, %v4253_v19, 0.0  ;;  %v4256_v34 = vadd.f32 %v4246_v1, %v11666_v22 }
0x10ab   :  { %4272 = vadd.xlane.f32.xlu0 %v4271_v23 }
0x10ac   :  { %v4254_v12 = vadd.f32 %v4238_v7, %v11658_v4  ;;  %v4280_v0 = vsel %vm188_vm1, %v4256_v34, 0.0 }
0x10ae   :  { %v4274_v13 = vsel %vm188_vm1, %v4254_v12, 0.0 }
0x10af   :  { %4275 = vadd.xlane.f32.xlu1 %v4274_v13  ;;  %4278 = vadd.xlane.f32.xlu0 %v4277_v24 }
0x10b3   :  { %4281 = vadd.xlane.f32.xlu1 %v4280_v0 }
0x112a   :  { %v4261_v31 = vpop.xlane.xlu0 %4260 }
0x112b   :  { %v4283_v41 = vmul.f32 0.03125, %v4261_v31 }
0x112d   :  { %v11763_v18 = vsub.f32 %v4249_v49, %v4283_v41 }
0x112e   :  { %v4264_v15 = vpop.xlane.xlu1 %4263  ;;  %v4267_v45 = vpop.xlane.xlu0 %4266 }
0x112f   :  { %v4284_v21 = vmul.f32 0.03125, %v4264_v15  ;;  %v4285_v29 = vmul.f32 0.03125, %v4267_v45  ;;  %v4299_v4 = vmul.f32 %v11763_v18, %v11763_v18 }
0x1131   :  { %v11767_v22 = vsub.f32 %v4250_v55, %v4284_v21  ;;  %v11769_v20 = vsub.f32 %v4251_v63, %v4285_v29  ;;  %v4307_v46 = vsel %vm188_vm1, %v4299_v4, 0.0  ;;  %v8918_v55 = vld [vmem:[%s13062_s7 + $0x20] sm:$0xff]  ;;  %s13078_s7 = smov 40  }
0x1132   :  { %v4270_v43 = vpop.xlane.xlu1 %4269  ;;  %4308 = vadd.xlane.f32.xlu0 %v4307_v46  ;;  %v8916_v46 = vld [vmem:[%s13017_s15] ss:$0 sm:$0xff] }
0x1133   :  { %v4286_v58 = vmul.f32 0.03125, %v4270_v43  ;;  %v4300_v2 = vmul.f32 %v11767_v22, %v11767_v22  ;;  %v4301_v37 = vmul.f32 %v11769_v20, %v11769_v20 }
0x1134   :  { %v4273_v38 = vpop.xlane.xlu0 %4272 }
0x1135   :  { %v11776_v6 = vsub.f32 %v4252_v54, %v4286_v58  ;;  %v4287_v9 = vmul.f32 0.03125, %v4273_v38  ;;  %v4310_v42 = vsel %vm188_vm1, %v4300_v2, 0.0  ;;  %v4313_v11 = vsel %vm188_vm1, %v4301_v37, 0.0 }
0x1136   :  { %4311 = vadd.xlane.f32.xlu1 %v4310_v42  ;;  %4314 = vadd.xlane.f32.xlu0 %v4313_v11  ;;  %v4400_v54 = vpack.c.bf16 %v8919_v5, %v8918_v55  ;;  %v8917_v42 = vld [vmem:[%s13018_s16] ss:$0 sm:$0xff] }
0x1137   :  { %v11780_v39 = vsub.f32 %v4253_v19, %v4287_v9  ;;  %v4302_v47 = vmul.f32 %v11776_v6, %v11776_v6 }
0x1138   :  { %v4276_v57 = vpop.xlane.xlu1 %4275  ;;  %v4279_v33 = vpop.xlane.xlu0 %4278  ;;  %9705 = vmatprep.subr.bf16.mxu1 %v4400_v54 }
0x1139   :  { %v4288_v62 = vmul.f32 0.03125, %v4276_v57  ;;  %v4289_v28 = vmul.f32 0.03125, %v4279_v33  ;;  %v4316_v35 = vsel %vm188_vm1, %v4302_v47, 0.0  ;;  %v4303_v60 = vmul.f32 %v11780_v39, %v11780_v39  ;;  %9706 = vmatpush3.bf16.msra.mxu1 %v4400_v54 }
0x113a   :  { %4317 = vadd.xlane.f32.xlu1 %v4316_v35 }
0x113b   :  { %v11787_v10 = vsub.f32 %v4254_v12, %v4288_v62  ;;  %v11789_v27 = vsub.f32 %v4255_v51, %v4289_v28  ;;  %v4319_v26 = vsel %vm188_vm1, %v4303_v60, 0.0 }
0x113c   :  { %v4282_v56 = vpop.xlane.xlu1 %4281  ;;  %4320 = vadd.xlane.f32.xlu0 %v4319_v26 }
0x113d   :  { %v4290_v3 = vmul.f32 0.03125, %v4282_v56  ;;  %v4304_v14 = vmul.f32 %v11787_v10, %v11787_v10  ;;  %v4305_v16 = vmul.f32 %v11789_v27, %v11789_v27 }
0x113f   :  { %v11796_v53 = vsub.f32 %v4256_v34, %v4290_v3  ;;  %v4322_v25 = vsel %vm188_vm1, %v4304_v14, 0.0  ;;  %v4325_v49 = vsel %vm188_vm1, %v4305_v16, 0.0 }
0x1140   :  { %4323 = vadd.xlane.f32.xlu1 %v4322_v25  ;;  %4326 = vadd.xlane.f32.xlu0 %v4325_v49 }
0x1141   :  { %v4306_v48 = vmul.f32 %v11796_v53, %v11796_v53 }
0x1143   :  { %v4328_v63 = vsel %vm188_vm1, %v4306_v48, 0.0 }
0x1144   :  { %4329 = vadd.xlane.f32.xlu1 %v4328_v63 }
0x11bb   :  { %v4309_v52 = vpop.xlane.xlu0 %4308 }
0x11bc   :  { %v4331_v30 = vmul.f32 0.03125, %v4309_v52 }
0x11be   :  { %v4339_v32 = vadd.f32 1e-05, %v4331_v30 }
0x11bf   :  { %v4312_v50 = vpop.xlane.xlu1 %4311  ;;  %v4315_v8 = vpop.xlane.xlu0 %4314 }
0x11c0   :  { %10343 = vrsqrt.f32 %v4339_v32  ;;  %v4332_v44 = vmul.f32 0.03125, %v4312_v50  ;;  %v4333_v19 = vmul.f32 0.03125, %v4315_v8 }
0x11c2   :  { %v4340_v17 = vadd.f32 1e-05, %v4332_v44  ;;  %v4341_v40 = vadd.f32 1e-05, %v4333_v19 }
0x11c3   :  { %v4318_v51 = vpop.xlane.xlu1 %4317 }
0x11c4   :  { %10345 = vrsqrt.f32 %v4340_v17  ;;  %v4334_v1 = vmul.f32 0.03125, %v4318_v51 }
0x11c5   :  { %10347 = vrsqrt.f32 %v4341_v40  ;;  %v4321_v7 = vpop.xlane.xlu0 %4320 }
0x11c6   :  { %v4342_v23 = vadd.f32 1e-05, %v4334_v1  ;;  %v4335_v12 = vmul.f32 0.03125, %v4321_v7 }
0x11c8   :  { %10349 = vrsqrt.f32 %v4342_v23  ;;  %v4343_v34 = vadd.f32 1e-05, %v4335_v12 }
0x11c9   :  { %v4324_v13 = vpop.xlane.xlu1 %4323  ;;  %v4327_v24 = vpop.xlane.xlu0 %4326 }
0x11ca   :  { %10351 = vrsqrt.f32 %v4343_v34  ;;  %v4336_v0 = vmul.f32 0.03125, %v4324_v13  ;;  %v4337_v31 = vmul.f32 0.03125, %v4327_v24 }
0x11cc   :  { %v4344_v41 = vadd.f32 1e-05, %v4336_v0  ;;  %v4345_v15 = vadd.f32 1e-05, %v4337_v31 }
0x11cd   :  { %v10344_v45 = vpop.eup %10343  ;;  %v4330_v21 = vpop.xlane.xlu1 %4329 }
0x11ce   :  { %10353 = vrsqrt.f32 %v4344_v41  ;;  %v4338_v29 = vmul.f32 0.03125, %v4330_v21  ;;  %v4355_v4 = vmul.f32 %v10344_v45, %v11763_v18 }
0x11cf   :  { %10355 = vrsqrt.f32 %v4345_v15 }
0x11d0   :  { %v4346_v43 = vadd.f32 1e-05, %v4338_v29  ;;  %v4369_v38 = vmul.f32 %v8916_v46, %v4355_v4 }
0x11d1   :  { %v10346_v58 = vpop.eup %10345 }
0x11d2   :  { %v10348_v2 = vpop.eup %10347  ;;  %10357 = vrsqrt.f32 %v4346_v43  ;;  %v4356_v37 = vmul.f32 %v10346_v58, %v11767_v22  ;;  %v11825_v33 = vadd.f32 %v8917_v42, %v4369_v38 }
0x11d3   :  { %v4357_v9 = vmul.f32 %v10348_v2, %v11769_v20 }
0x11d4   :  { %v4370_v11 = vmul.f32 %v8916_v46, %v4356_v37 }
0x11d5   :  { %v10350_v18 = vpop.eup %10349  ;;  %v4371_v47 = vmul.f32 %v8916_v46, %v4357_v9 }
0x11d6   :  { %v4358_v57 = vmul.f32 %v10350_v18, %v11776_v6  ;;  %v11827_v62 = vadd.f32 %v8917_v42, %v4370_v11 }
0x11d7   :  { %v10352_v28 = vpop.eup %10351  ;;  %v11833_v60 = vadd.f32 %v8917_v42, %v4371_v47 }
0x11d8   :  { %v4372_v35 = vmul.f32 %v8916_v46, %v4358_v57  ;;  %v4396_v22 = vpack.c.bf16 %v11827_v62, %v11825_v33  ;;  %v4359_v20 = vmul.f32 %v10352_v28, %v11780_v39 }
0x11da   :  { %9707 = vmatprep.mubr.msk.bf16.mxu1 %vm188_vm1, %v4396_v22  ;;  %v11835_v26 = vadd.f32 %v8917_v42, %v4372_v35  ;;  %v4373_v16 = vmul.f32 %v8916_v46, %v4359_v20 }
0x11db   :  { %v10354_v56 = vpop.eup %10353 }
0x11dc   :  { %v10356_v3 = vpop.eup %10355  ;;  %v4397_v6 = vpack.c.bf16 %v11835_v26, %v11833_v60  ;;  %v4360_v14 = vmul.f32 %v10354_v56, %v11787_v10  ;;  %v11842_v48 = vadd.f32 %v8917_v42, %v4373_v16 }
0x11dd   :  { %v4361_v25 = vmul.f32 %v10356_v3, %v11789_v27 }
0x11de   :  { %9708 = vmatmul.mubr.msk.bf16.vlgmr.msra.gmra.mxu1 %vm188_vm1, %v4397_v6  ;;  %v4374_v49 = vmul.f32 %v8916_v46, %v4360_v14 }
0x11df   :  { %v10358_v39 = vpop.eup %10357  ;;  %v4375_v61 = vmul.f32 %v8916_v46, %v4361_v25 }
0x11e0   :  { %v11844_v63 = vadd.f32 %v8917_v42, %v4374_v49  ;;  %v4362_v36 = vmul.f32 %v10358_v39, %v11796_v53  ;;  %v8923_v53 = vld [vmem:[%s13065_s28 + $0x1] ss:$0 sm:$0xff]  ;;  %s13071_s28 = smov 120  }
0x11e1   :  { %v11850_v10 = vadd.f32 %v8917_v42, %v4375_v61 }
0x11e2   :  { %v4398_v59 = vpack.c.bf16 %v11844_v63, %v11842_v48  ;;  %v4376_v55 = vmul.f32 %v8916_v46, %v4362_v36 }
0x11e4   :  { %9711 = vmatprep.mubr.msk.bf16.mxu1 %vm188_vm1, %v4398_v59  ;;  %v11852_v27 = vadd.f32 %v8917_v42, %v4376_v55 }
0x11e6   :  { %v4399_v5 = vpack.c.bf16 %v11852_v27, %v11850_v10 }
0x11e8   :  { %9712 = vmatmul.mubr.msk.bf16.gmra.mxu1 %vm188_vm1, %v4399_v5 }
0x129e   :  { %v9709_v54 = vpop.f32.mrf.mxu1 }
0x129f   :  { %v11860_v52 = vadd.f32 %v9709_v54, %v8923_v53 }
0x12a0   :  { %v4456_v30 = vpop.f32.mrf.mxu1 }
0x12a1   :  { %v11862_v32 = vadd.f32 %v8923_v53, %v4456_v30  ;;  %v11865_v50 = vmul.f32 0.35355338, %v11860_v52 }
0x12a2   :  { %v9710_v8 = vpop.f32.mrf.mxu1 }
0x12a3   :  { %v11867_v44 = vadd.f32 %v9710_v8, %v8923_v53  ;;  %9726 = vmatprep.mubr.msk.f32.mxu1 %vm430_vm2, %v11865_v50  ;;  %v11872_v19 = vmul.f32 0.35355338, %v11862_v32 }
0x12a4   :  { %v4459_v17 = vpop.f32.mrf.mxu1 }
0x12a5   :  { %v11874_v40 = vadd.f32 %v8923_v53, %v4459_v17  ;;  %4590 = vrot.lane.b32.xlu1 %v11867_v44, %s10535_s29  ;;  %9719 = vmatprep.mubr.msk.f32.mxu0 %vm430_vm2, %v11872_v19  ;;  %v11919_v29 = vmul.f32 0.35355338, %v11867_v44 }
0x12a7   :  { %4499 = vrot.lane.b32.xlu0 %v11874_v40, %s10535_s29  ;;  %v11910_v45 = vmul.f32 0.35355338, %v11874_v40 }
0x12a8   :  { %v9713_v51 = vpop.f32.mrf.mxu1 }
0x12a9   :  { %4497 = vrot.lane.b32.xlu1 %v11862_v32, %s10535_s29  ;;  %v11894_v13 = vadd.f32 %v9713_v51, %v8923_v53 }
0x12aa   :  { %v4472_v1 = vpop.f32.mrf.mxu1 }
0x12ab   :  { %v11896_v24 = vadd.f32 %v8923_v53, %v4472_v1  ;;  %v11927_v43 = vmul.f32 0.35355338, %v11894_v13 }
0x12ac   :  { %v9714_v7 = vpop.f32.mrf.mxu1 }
0x12ad   :  { %4588 = vrot.lane.b32.xlu1 %v11860_v52, %s10535_s29  ;;  %v11886_v12 = vadd.f32 %v9714_v7, %v8923_v53  ;;  %v11914_v21 = vmul.f32 0.35355338, %v11896_v24 }
0x12ae   :  { %v4475_v23 = vpop.f32.mrf.mxu1 }
0x12af   :  { %v11888_v34 = vadd.f32 %v8923_v53, %v4475_v23  ;;  %v11942_v38 = vmul.f32 0.35355338, %v11886_v12 }
0x12b1   :  { %4681 = vrot.lane.b32.xlu0 %v11888_v34, %s10535_s29  ;;  %4772 = vrot.lane.b32.xlu1 %v11886_v12, %s10535_s29  ;;  %v11939_v37 = vmul.f32 0.35355338, %v11888_v34 }
0x12b5   :  { %4679 = vrot.lane.b32.xlu0 %v11896_v24, %s10535_s29  ;;  %4770 = vrot.lane.b32.xlu1 %v11894_v13, %s10535_s29  ;;  %s13072_s29 = smov 56  }
0x1317   :  { %v4591_v0 = vpop.permute.xlu1 %4590 }
0x1318   :  { %9722 = vmatprep.subr.msk.mxu1 %vm430_vm2, %v4591_v0 }
0x1319   :  { %9723 = vmatpush3.xpose.msk.msra.mxu1 %vm430_vm2, %v4591_v0  ;;  %v4500_v31 = vpop.permute.xlu0 %4499 }
0x131a   :  { %9715 = vmatprep.subr.msk.mxu0 %vm430_vm2, %v4500_v31 }
0x131b   :  { %v4498_v41 = vpop.permute.xlu1 %4497  ;;  %9716 = vmatpush3.xpose.msk.msra.mxu0 %vm430_vm2, %v4500_v31 }
0x131c   :  { %9717 = vmatprep.subr.msk.mxu0 %vm430_vm2, %v4498_v41 }
0x131f   :  { %v4589_v15 = vpop.permute.xlu1 %4588  ;;  %9718 = vmatpush3.xpose.msk.msra.mxu0 %vm430_vm2, %v4498_v41 }
0x1320   :  { %9724 = vmatprep.subr.msk.mxu1 %vm430_vm2, %v4589_v15 }
0x1321   :  { %9725 = vmatpush3.xpose.msk.msra.mxu1 %vm430_vm2, %v4589_v15 }
0x1322   :  { %9720 = vmatmul.mubr.msk.f32.vlgmr.msra.gmra.mxu0 %vm430_vm2, %v11910_v45 }
0x1323   :  { %v4682_v4 = vpop.permute.xlu0 %4681  ;;  %v4773_v46 = vpop.permute.xlu1 %4772  ;;  %9733 = vmatprep.mubr.msk.f32.mxu0 %vm430_vm2, %v11914_v21 }
0x1324   :  { %9729 = vmatprep.subr.msk.mxu0 %vm430_vm2, %v4682_v4  ;;  %9727 = vmatmul.mubr.msk.f32.vlgmr.msra.gmra.mxu1 %vm430_vm2, %v11919_v29 }
0x1325   :  { %9730 = vmatpush3.xpose.msk.msra.mxu0 %vm430_vm2, %v4682_v4  ;;  %9736 = vmatprep.subr.msk.mxu1 %vm430_vm2, %v4773_v46 }
0x1326   :  { %9737 = vmatpush3.xpose.msk.msra.mxu1 %vm430_vm2, %v4773_v46  ;;  %9740 = vmatprep.mubr.msk.f32.mxu1 %vm430_vm2, %v11927_v43 }
0x1327   :  { %v4680_v58 = vpop.permute.xlu0 %4679  ;;  %v4771_v2 = vpop.permute.xlu1 %4770 }
0x1328   :  { %9731 = vmatprep.subr.msk.mxu0 %vm430_vm2, %v4680_v58  ;;  %9738 = vmatprep.subr.msk.mxu1 %vm430_vm2, %v4771_v2 }
0x1329   :  { %9732 = vmatpush3.xpose.msk.msra.mxu0 %vm430_vm2, %v4680_v58 }
0x132a   :  { %9739 = vmatpush3.xpose.msk.msra.mxu1 %vm430_vm2, %v4771_v2 }
0x132c   :  { %9734 = vmatmul.mubr.msk.f32.vlgmr.msra.gmra.mxu0 %vm430_vm2, %v11939_v37 }
0x132d   :  { %9741 = vmatmul.mubr.msk.f32.vlgmr.msra.gmra.mxu1 %vm430_vm2, %v11942_v38 }
0x13e2   :  { %v9721_v9 = vpop.f32.mrf.mxu0 }
0x13e3   :  { %v4862_v42 = vsel %vm789_vm3, %v9721_v9, -inf }
0x13e4   :  { %v9728_v11 = vpop.f32.mrf.mxu1  ;;  %4863 = vmax.xlane.f32.xlu1 %v4862_v42  ;;  %v4577_v28 = vpop.f32.mrf.mxu0 }
0x13e5   :  { %v4868_v18 = vsel %vm789_vm3, %v9728_v11, -inf  ;;  %v4859_v20 = vsel %vm789_vm3, %v4577_v28, -inf }
0x13e6   :  { %v4668_v47 = vpop.f32.mrf.mxu1  ;;  %4869 = vmax.xlane.f32.xlu0 %v4868_v18 }
0x13e7   :  { %v4865_v57 = vsel %vm789_vm3, %v4668_v47, -inf }
0x13ea   :  { %4866 = vmax.xlane.f32.xlu0 %v4865_v57 }
0x13ec   :  { %v9735_v35 = vpop.f32.mrf.mxu0 }
0x13ed   :  { %v4874_v22 = vsel %vm789_vm3, %v9735_v35, -inf  ;;  %v9742_v56 = vpop.f32.mrf.mxu1 }
0x13ee   :  { %4875 = vmax.xlane.f32.xlu1 %v4874_v22  ;;  %v4759_v3 = vpop.f32.mrf.mxu0  ;;  %4860 = vmax.xlane.f32.xlu0 %v4859_v20  ;;  %v4880_v6 = vsel %vm789_vm3, %v9742_v56, -inf }
0x13ef   :  { %v4871_v14 = vsel %vm789_vm3, %v4759_v3, -inf  ;;  %v4850_v16 = vpop.f32.mrf.mxu1 }
0x13f0   :  { %v4877_v25 = vsel %vm789_vm3, %v4850_v16, -inf }
0x13f2   :  { %4881 = vmax.xlane.f32.xlu1 %v4880_v6  ;;  %4872 = vmax.xlane.f32.xlu0 %v4871_v14 }
0x13f6   :  { %4878 = vmax.xlane.f32.xlu0 %v4877_v25 }
0x1403   :  { %5036 = vrot.lane.b32.xlu1 %v11867_v44, %s10536_s5 }
0x1407   :  { %4947 = vrot.lane.b32.xlu1 %v11862_v32, %s10536_s5 }
0x140b   :  { %5034 = vrot.lane.b32.xlu1 %v11860_v52, %s10536_s5 }
0x140c   :  { %4949 = vrot.lane.b32.xlu0 %v11874_v40, %s10536_s5 }
0x140f   :  { %5210 = vrot.lane.b32.xlu1 %v11886_v12, %s10536_s5 }
0x1410   :  { %5123 = vrot.lane.b32.xlu0 %v11888_v34, %s10536_s5 }
0x1413   :  { %5208 = vrot.lane.b32.xlu1 %v11894_v13, %s10536_s5 }
0x1414   :  { %5121 = vrot.lane.b32.xlu0 %v11896_v24, %s10536_s5  ;;  %s13073_s5 = smov 80  }
0x1417   :  { %5392 = vrot.lane.b32.xlu1 %v11867_v44, %s10537_s24 }
0x1418   :  { %5301 = vrot.lane.b32.xlu0 %v11874_v40, %s10537_s24 }
0x141b   :  { %5390 = vrot.lane.b32.xlu1 %v11860_v52, %s10537_s24 }
0x141c   :  { %5299 = vrot.lane.b32.xlu0 %v11862_v32, %s10537_s24 }
0x141f   :  { %5483 = vrot.lane.b32.xlu1 %v11888_v34, %s10537_s24 }
0x1420   :  { %5295 = vrot.lane.b32.xlu0 %v11872_v19, %s13071_s28 }
0x146d   :  { %v4864_v49 = vpop.xlane.xlu1 %4863 }
0x146e   :  { %v4884_v39 = vsub.f32 %v9721_v9, %v4864_v49 }
0x146f   :  { %v4870_v36 = vpop.xlane.xlu0 %4869 }
0x1470   :  { %v4886_v61 = vsub.f32 %v9728_v11, %v4870_v36  ;;  %v4893_v59 = vmul.f32 1.442695, %v4884_v39 }
0x1472   :  { %v4897_v55 = vmul.f32 1.442695, %v4886_v61 }
0x1473   :  { %v4867_v5 = vpop.xlane.xlu0 %4866 }
0x1474   :  { %10359 = vpow2.f32 %v4897_v55  ;;  %v4885_v53 = vsub.f32 %v4668_v47, %v4867_v5 }
0x1475   :  { %10361 = vpow2.f32 %v4893_v59 }
0x1476   :  { %v4895_v54 = vmul.f32 1.442695, %v4885_v53 }
0x1477   :  { %v4876_v30 = vpop.xlane.xlu1 %4875  ;;  %v4861_v8 = vpop.xlane.xlu0 %4860 }
0x1478   :  { %10363 = vpow2.f32 %v4895_v54  ;;  %v4883_v17 = vsub.f32 %v4577_v28, %v4861_v8  ;;  %v4888_v51 = vsub.f32 %v9735_v35, %v4876_v30 }
0x147a   :  { %v4891_v1 = vmul.f32 1.442695, %v4883_v17  ;;  %v4901_v31 = vmul.f32 1.442695, %v4888_v51 }
0x147b   :  { %v4882_v7 = vpop.xlane.xlu1 %4881  ;;  %v4873_v23 = vpop.xlane.xlu0 %4872 }
0x147c   :  { %v4890_v0 = vsub.f32 %v9742_v56, %v4882_v7  ;;  %10365 = vpow2.f32 %v4891_v1  ;;  %v4887_v15 = vsub.f32 %v4759_v3, %v4873_v23 }
0x147e   :  { %v4905_v41 = vmul.f32 1.442695, %v4890_v0  ;;  %v4899_v9 = vmul.f32 1.442695, %v4887_v15 }
0x147f   :  { %v5037_v4 = vpop.permute.xlu1 %5036  ;;  %v4879_v46 = vpop.xlane.xlu0 %4878 }
0x1480   :  { %10367 = vpow2.f32 %v4905_v41  ;;  %9750 = vmatprep.subr.mxu1 %v5037_v4  ;;  %v4889_v58 = vsub.f32 %v4850_v16, %v4879_v46 }
0x1481   :  { %v11984_v2 = vpop.eup %10359  ;;  %9751 = vmatpush3.msra.mxu1 %v5037_v4  ;;  %10369 = vpow2.f32 %v4901_v31 }
0x1482   :  { %v4903_v42 = vmul.f32 1.442695, %v4889_v58  ;;  %v4916_v11 = vsel %vm789_vm3, %v11984_v2, 0.0  ;;  %v11988_v18 = vpop.eup %10361 }
0x1483   :  { %v4948_v47 = vpop.permute.xlu1 %4947  ;;  %4917 = vadd.xlane.f32.xlu1 %v4916_v11  ;;  %v4950_v57 = vpop.permute.xlu0 %4949  ;;  %v4910_v35 = vsel %vm789_vm3, %v11988_v18, 0.0 }
0x1484   :  { %10371 = vpow2.f32 %v4903_v42  ;;  %9743 = vmatprep.subr.mxu0 %v4950_v57 }
0x1485   :  { %v11990_v28 = vpop.eup %10363  ;;  %9744 = vmatpush3.msra.mxu0 %v4950_v57  ;;  %10373 = vpow2.f32 %v4899_v9 }
0x1486   :  { %9745 = vmatprep.subr.mxu0 %v4948_v47  ;;  %v4913_v22 = vsel %vm789_vm3, %v11990_v28, 0.0 }
0x1487   :  { %v5035_v20 = vpop.permute.xlu1 %5034  ;;  %4911 = vadd.xlane.f32.xlu1 %v4910_v35  ;;  %4914 = vadd.xlane.f32.xlu0 %v4913_v22  ;;  %v11996_v56 = vpop.permute.xlu0 %5123 }
0x1488   :  { %9752 = vmatprep.subr.mxu1 %v5035_v20  ;;  %9746 = vmatpush3.msra.mxu0 %v4948_v47 }
0x1489   :  { %9753 = vmatpush3.msra.mxu1 %v5035_v20  ;;  %9757 = vmatprep.subr.mxu0 %v11996_v56  ;;  %v10366_v3 = vpop.eup %10365 }
0x148a   :  { %v4907_v14 = vsel %vm789_vm3, %v10366_v3, 0.0 }
0x148b   :  { %v5211_v6 = vpop.permute.xlu1 %5210  ;;  %4908 = vadd.xlane.f32.xlu0 %v4907_v14  ;;  %v5122_v53 = vpop.permute.xlu0 %5121 }
0x148c   :  { %9764 = vmatprep.subr.mxu1 %v5211_v6 }
0x148d   :  { %v12000_v16 = vpop.eup %10367 }
0x148e   :  { %v4928_v25 = vsel %vm789_vm3, %v12000_v16, 0.0  ;;  %v12004_v49 = vpop.eup %10369 }
0x148f   :  { %4929 = vadd.xlane.f32.xlu1 %v4928_v25  ;;  %v4922_v36 = vsel %vm789_vm3, %v12004_v49, 0.0  ;;  %v5209_v5 = vpop.permute.xlu1 %5208  ;;  %v12036_v30 = vpop.permute.xlu0 %5301 }
0x1491   :  { %v12006_v39 = vpop.eup %10371 }
0x1492   :  { %v4925_v61 = vsel %vm789_vm3, %v12006_v39, 0.0  ;;  %v12012_v59 = vpop.eup %10373 }
0x1493   :  { %4923 = vadd.xlane.f32.xlu1 %v4922_v36  ;;  %4926 = vadd.xlane.f32.xlu0 %v4925_v61  ;;  %v4919_v55 = vsel %vm789_vm3, %v12012_v59, 0.0  ;;  %v5393_v54 = vpop.permute.xlu1 %5392  ;;  %v12040_v17 = vpop.permute.xlu0 %5299 }
0x1497   :  { %4920 = vadd.xlane.f32.xlu0 %v4919_v55  ;;  %v12038_v8 = vpop.permute.xlu1 %5390  ;;  %v5296_v1 = vpop.permute.xlu0 %5295 }
0x149b   :  { %v12042_v51 = vpop.permute.xlu1 %5483 }
0x14a4   :  { %5386 = vrot.lane.b32.xlu1 %v11865_v50, %s13071_s28 }
0x14a8   :  { %5388 = vrot.lane.b32.xlu1 %v11919_v29, %s13071_s28 }
0x14ac   :  { %5572 = vrot.lane.b32.xlu1 %v11894_v13, %s10537_s24 }
0x14ad   :  { %5297 = vrot.lane.b32.xlu0 %v11910_v45, %s13071_s28 }
0x14b0   :  { %5479 = vrot.lane.b32.xlu1 %v11939_v37, %s13071_s28 }
0x14b1   :  { %5574 = vrot.lane.b32.xlu0 %v11886_v12, %s10537_s24 }
0x14b4   :  { %5570 = vrot.lane.b32.xlu1 %v11942_v38, %s13071_s28 }
0x14b5   :  { %5481 = vrot.lane.b32.xlu0 %v11896_v24, %s10537_s24  ;;  %s13074_s24 = smov 112  }
0x14b9   :  { %5477 = vrot.lane.b32.xlu0 %v11914_v21, %s13071_s28 }
0x14bd   :  { %5568 = vrot.lane.b32.xlu0 %v11927_v43, %s13071_s28 }
0x150c   :  { %v4918_v7 = vpop.xlane.xlu1 %4917 }
0x150d   :  { %10375 = vrcp.f32 %v4918_v7 }
0x1510   :  { %v4915_v23 = vpop.xlane.xlu0 %4914  ;;  %v4912_v0 = vpop.xlane.xlu1 %4911 }
0x1511   :  { %10377 = vrcp.f32 %v4915_v23 }
0x1512   :  { %10379 = vrcp.f32 %v4912_v0 }
0x1514   :  { %v4909_v31 = vpop.xlane.xlu0 %4908 }
0x1515   :  { %10381 = vrcp.f32 %v4909_v31 }
0x1518   :  { %v4930_v41 = vpop.xlane.xlu1 %4929 }
0x1519   :  { %10383 = vrcp.f32 %v4930_v41 }
0x151a   :  { %v10376_v46 = vpop.eup %10375 }
0x151b   :  { %v4942_v11 = vmul.f32 %v10376_v46, %v11984_v2 }
0x151c   :  { %v4927_v15 = vpop.xlane.xlu0 %4926  ;;  %v4924_v4 = vpop.xlane.xlu1 %4923 }
0x151d   :  { %10385 = vrcp.f32 %v4927_v15 }
0x151e   :  { %v10378_v58 = vpop.eup %10377  ;;  %10387 = vrcp.f32 %v4924_v4 }
0x151f   :  { %v4941_v42 = vmul.f32 %v10378_v58, %v11990_v28  ;;  %v10380_v47 = vpop.eup %10379 }
0x1520   :  { %v4921_v9 = vpop.xlane.xlu0 %4920  ;;  %v4940_v20 = vmul.f32 %v10380_v47, %v11988_v18  ;;  %v5387_v14 = vpop.permute.xlu1 %5386 }
0x1521   :  { %10389 = vrcp.f32 %v4921_v9  ;;  %9754 = vmatprep.mubr.msk.f32.mxu1 %vm789_vm3, %v4941_v42 }
0x1522   :  { %v10382_v57 = vpop.eup %10381  ;;  %9755 = vmatmul.mubr.msk.f32.vlgmr.msra.gmra.mxu1 %vm789_vm3, %v4942_v11 }
0x1523   :  { %9765 = vmatpush3.msra.mxu1 %v5211_v6  ;;  %v4939_v22 = vmul.f32 %v10382_v57, %v10366_v3 }
0x1524   :  { %v5298_v35 = vpop.permute.xlu0 %5297  ;;  %9766 = vmatprep.subr.mxu1 %v5209_v5  ;;  %v5389_v3 = vpop.permute.xlu1 %5388 }
0x1525   :  { %9767 = vmatpush3.msra.mxu1 %v5209_v5  ;;  %9747 = vmatprep.mubr.msk.f32.mxu0 %vm789_vm3, %v4939_v22 }
0x1526   :  { %9778 = vmatprep.subr.msk.mxu1 %vm430_vm2, %v5393_v54  ;;  %9748 = vmatmul.mubr.msk.f32.vlgmr.msra.gmra.mxu0 %vm789_vm3, %v4940_v20  ;;  %v10384_v28 = vpop.eup %10383 }
0x1527   :  { %9758 = vmatpush3.msra.mxu0 %v11996_v56  ;;  %v4946_v61 = vmul.f32 %v10384_v28, %v12000_v16 }
0x1528   :  { %v5575_v2 = vpop.permute.xlu0 %5574  ;;  %9759 = vmatprep.subr.mxu0 %v5122_v53  ;;  %v5573_v16 = vpop.permute.xlu1 %5572 }
0x1529   :  { %9760 = vmatpush3.msra.mxu0 %v5122_v53 }
0x152a   :  { %v10386_v6 = vpop.eup %10385  ;;  %9771 = vmatprep.subr.msk.mxu0 %vm430_vm2, %v12036_v30 }
0x152b   :  { %v4945_v25 = vmul.f32 %v10386_v6, %v12006_v39  ;;  %v10388_v36 = vpop.eup %10387 }
0x152c   :  { %v5482_v18 = vpop.permute.xlu0 %5481  ;;  %v4944_v53 = vmul.f32 %v10388_v36, %v12004_v49  ;;  %v5480_v39 = vpop.permute.xlu1 %5479 }
0x152d   :  { %9768 = vmatprep.mubr.msk.f32.mxu1 %vm789_vm3, %v4945_v25 }
0x152e   :  { %v10390_v55 = vpop.eup %10389  ;;  %9769 = vmatmul.mubr.msk.f32.vlgmr.msra.gmra.mxu1 %vm789_vm3, %v4946_v61 }
0x152f   :  { %v4943_v56 = vmul.f32 %v10390_v55, %v12012_v59  ;;  %9779 = vmatpush3.xpose.msk.msra.mxu1 %vm430_vm2, %v5393_v54  ;;  %9782 = vmatprep.mubr.msk.f32.mxu1 %vm430_vm2, %v5387_v14 }
0x1530   :  { %v5478_v5 = vpop.permute.xlu0 %5477  ;;  %9780 = vmatprep.subr.msk.mxu1 %vm430_vm2, %v12038_v8  ;;  %v5571_v59 = vpop.permute.xlu1 %5570 }
0x1531   :  { %9761 = vmatprep.mubr.msk.f32.mxu0 %vm789_vm3, %v4943_v56 }
0x1532   :  { %9762 = vmatmul.mubr.msk.f32.vlgmr.msra.gmra.mxu0 %vm789_vm3, %v4944_v53 }
0x1533   :  { %9772 = vmatpush3.xpose.msk.msra.mxu0 %vm430_vm2, %v12036_v30  ;;  %9775 = vmatprep.mubr.msk.f32.mxu0 %vm430_vm2, %v5296_v1 }
0x1534   :  { %9781 = vmatpush3.xpose.msk.msra.mxu1 %vm430_vm2, %v12038_v8  ;;  %9773 = vmatprep.subr.msk.mxu0 %vm430_vm2, %v12040_v17  ;;  %v5569_v49 = vpop.permute.xlu0 %5568 }
0x1535   :  { %9792 = vmatprep.subr.msk.mxu1 %vm430_vm2, %v5575_v2 }
0x1537   :  { %9783 = vmatmul.mubr.msk.f32.vlgmr.msra.gmra.mxu1 %vm430_vm2, %v5389_v3  ;;  %9774 = vmatpush3.xpose.msk.msra.mxu0 %vm430_vm2, %v12040_v17 }
0x1538   :  { %9793 = vmatpush3.xpose.msk.msra.mxu1 %vm430_vm2, %v5575_v2  ;;  %9796 = vmatprep.mubr.msk.f32.mxu1 %vm430_vm2, %v5569_v49 }
0x1539   :  { %9785 = vmatprep.subr.msk.mxu0 %vm430_vm2, %v12042_v51  ;;  %9794 = vmatprep.subr.msk.mxu1 %vm430_vm2, %v5573_v16 }
0x153a   :  { %9776 = vmatmul.mubr.msk.f32.vlgmr.msra.gmra.mxu0 %vm430_vm2, %v5298_v35 }
0x153b   :  { %9786 = vmatpush3.xpose.msk.msra.mxu0 %vm430_vm2, %v12042_v51  ;;  %9789 = vmatprep.mubr.msk.f32.mxu0 %vm430_vm2, %v5478_v5 }
0x153c   :  { %9795 = vmatpush3.xpose.msk.msra.mxu1 %vm430_vm2, %v5573_v16  ;;  %9787 = vmatprep.subr.msk.mxu0 %vm430_vm2, %v5482_v18 }
0x153f   :  { %9797 = vmatmul.mubr.msk.f32.vlgmr.msra.gmra.mxu1 %vm430_vm2, %v5571_v59  ;;  %9788 = vmatpush3.xpose.msk.msra.mxu0 %vm430_vm2, %v5482_v18 }
0x1542   :  { %9790 = vmatmul.mubr.msk.f32.vlgmr.msra.gmra.mxu0 %vm430_vm2, %v5480_v39 }
0x15e2   :  { %v12092_v54 = vpop.f32.mrf.mxu1 }
0x15e4   :  { %v12096_v8 = vpop.f32.mrf.mxu1 }
0x15e6   :  { %v12094_v30 = vpop.f32.mrf.mxu0 }
0x15e8   :  { %v12100_v51 = vpop.f32.mrf.mxu0 }
0x15ee   :  { %v12098_v17 = vpop.f32.mrf.mxu1 }
0x15f0   :  { %v12104_v7 = vpop.f32.mrf.mxu1 }
0x15f2   :  { %v12102_v1 = vpop.f32.mrf.mxu0 }
0x15f4   :  { %v12106_v0 = vpop.f32.mrf.mxu0 }
0x15f7   :  { %v9784_v23 = vpop.f32.mrf.mxu1 }
0x15f8   :  { %v5668_v31 = vsel %vm789_vm3, %v9784_v23, -inf }
0x15f9   :  { %5669 = vmax.xlane.f32.xlu0 %v5668_v31  ;;  %v5468_v41 = vpop.f32.mrf.mxu1 }
0x15fa   :  { %v9777_v15 = vpop.f32.mrf.mxu0  ;;  %v5665_v46 = vsel %vm789_vm3, %v5468_v41, -inf }
0x15fb   :  { %v5662_v4 = vsel %vm789_vm3, %v9777_v15, -inf }
0x15fc   :  { %5663 = vmax.xlane.f32.xlu1 %v5662_v4  ;;  %v5377_v58 = vpop.f32.mrf.mxu0 }
0x15fd   :  { %5666 = vmax.xlane.f32.xlu0 %v5665_v46  ;;  %v5659_v9 = vsel %vm789_vm3, %v5377_v58, -inf }
0x15ff   :  { %v9798_v42 = vpop.f32.mrf.mxu1 }
0x1600   :  { %v5680_v20 = vsel %vm789_vm3, %v9798_v42, -inf }
0x1601   :  { %5660 = vmax.xlane.f32.xlu0 %v5659_v9  ;;  %v5650_v22 = vpop.f32.mrf.mxu1 }
0x1602   :  { %v9791_v11 = vpop.f32.mrf.mxu0  ;;  %v5677_v14 = vsel %vm789_vm3, %v5650_v22, -inf }
0x1603   :  { %v5674_v47 = vsel %vm789_vm3, %v9791_v11, -inf }
0x1604   :  { %5675 = vmax.xlane.f32.xlu1 %v5674_v47  ;;  %v5559_v57 = vpop.f32.mrf.mxu0 }
0x1605   :  { %v5671_v35 = vsel %vm789_vm3, %v5559_v57, -inf }
0x1606   :  { %5672 = vmax.xlane.f32.xlu0 %v5671_v35 }
0x1608   :  { %5681 = vmax.xlane.f32.xlu1 %v5680_v20 }
0x160a   :  { %5678 = vmax.xlane.f32.xlu0 %v5677_v14 }
0x1619   :  { %5836 = vrot.lane.b32.xlu1 %v11867_v44, %s13072_s29 }
0x161d   :  { %5747 = vrot.lane.b32.xlu1 %v11862_v32, %s13072_s29 }
0x1620   :  { %5749 = vrot.lane.b32.xlu0 %v11874_v40, %s13072_s29 }
0x1621   :  { %5834 = vrot.lane.b32.xlu1 %v11860_v52, %s13072_s29 }
0x1624   :  { %5923 = vrot.lane.b32.xlu0 %v11888_v34, %s13072_s29 }
0x1625   :  { %6010 = vrot.lane.b32.xlu1 %v11886_v12, %s13072_s29 }
0x1628   :  { %5921 = vrot.lane.b32.xlu0 %v11896_v24, %s13072_s29 }
0x1629   :  { %6008 = vrot.lane.b32.xlu1 %v11894_v13, %s13072_s29 }
0x162c   :  { %6101 = vrot.lane.b32.xlu0 %v11874_v40, %s13073_s5 }
0x162d   :  { %6192 = vrot.lane.b32.xlu1 %v11867_v44, %s13073_s5 }
0x1630   :  { %6099 = vrot.lane.b32.xlu0 %v11862_v32, %s13073_s5 }
0x1631   :  { %6190 = vrot.lane.b32.xlu1 %v11860_v52, %s13073_s5 }
0x1634   :  { %6095 = vrot.lane.b32.xlu0 %v11872_v19, %s13074_s24 }
0x1635   :  { %6283 = vrot.lane.b32.xlu1 %v11888_v34, %s13073_s5 }
0x1682   :  { %v5670_v2 = vpop.xlane.xlu0 %5669 }
0x1683   :  { %v5686_v28 = vsub.f32 %v9784_v23, %v5670_v2 }
0x1685   :  { %v5697_v6 = vmul.f32 1.442695, %v5686_v28  ;;  %v5664_v3 = vpop.xlane.xlu1 %5663 }
0x1686   :  { %v5684_v18 = vsub.f32 %v9777_v15, %v5664_v3  ;;  %v5667_v25 = vpop.xlane.xlu0 %5666 }
0x1687   :  { %10391 = vpow2.f32 %v5697_v6  ;;  %v5685_v36 = vsub.f32 %v5468_v41, %v5667_v25 }
0x1688   :  { %v5693_v61 = vmul.f32 1.442695, %v5684_v18 }
0x1689   :  { %v5695_v55 = vmul.f32 1.442695, %v5685_v36 }
0x168a   :  { %10393 = vpow2.f32 %v5693_v61  ;;  %v5661_v56 = vpop.xlane.xlu0 %5660 }
0x168b   :  { %10395 = vpow2.f32 %v5695_v55  ;;  %v5683_v5 = vsub.f32 %v5377_v58, %v5661_v56 }
0x168d   :  { %v5691_v53 = vmul.f32 1.442695, %v5683_v5  ;;  %v5676_v16 = vpop.xlane.xlu1 %5675 }
0x168e   :  { %v5688_v49 = vsub.f32 %v9791_v11, %v5676_v16 }
0x168f   :  { %10397 = vpow2.f32 %v5691_v53  ;;  %v5673_v39 = vpop.xlane.xlu0 %5672 }
0x1690   :  { %v5687_v31 = vsub.f32 %v5559_v57, %v5673_v39  ;;  %v5701_v4 = vmul.f32 1.442695, %v5688_v49 }
0x1691   :  { %v5682_v59 = vpop.xlane.xlu1 %5681 }
0x1692   :  { %v5690_v23 = vsub.f32 %v9798_v42, %v5682_v59  ;;  %v5699_v20 = vmul.f32 1.442695, %v5687_v31 }
0x1693   :  { %v5679_v46 = vpop.xlane.xlu0 %5678 }
0x1694   :  { %v12144_v15 = vpop.eup %10391  ;;  %v5705_v9 = vmul.f32 1.442695, %v5690_v23  ;;  %v5689_v41 = vsub.f32 %v5650_v22, %v5679_v46 }
0x1695   :  { %v5837_v47 = vpop.permute.xlu1 %5836  ;;  %v5716_v35 = vsel %vm789_vm3, %v12144_v15, 0.0 }
0x1696   :  { %10399 = vpow2.f32 %v5705_v9  ;;  %v5703_v58 = vmul.f32 1.442695, %v5689_v41  ;;  %5717 = vadd.xlane.f32.xlu1 %v5716_v35  ;;  %9806 = vmatprep.subr.mxu1 %v5837_v47 }
0x1697   :  { %v12148_v11 = vpop.eup %10393  ;;  %10401 = vpow2.f32 %v5701_v4  ;;  %9807 = vmatpush3.msra.mxu1 %v5837_v47  ;;  %v5750_v42 = vpop.permute.xlu0 %5749 }
0x1698   :  { %v12150_v57 = vpop.eup %10395  ;;  %10403 = vpow2.f32 %v5703_v58  ;;  %9799 = vmatprep.subr.mxu0 %v5750_v42  ;;  %v5710_v22 = vsel %vm789_vm3, %v12148_v11, 0.0 }
0x1699   :  { %v5748_v14 = vpop.permute.xlu1 %5747  ;;  %v5713_v2 = vsel %vm789_vm3, %v12150_v57, 0.0  ;;  %9800 = vmatpush3.msra.mxu0 %v5750_v42  ;;  %10405 = vpow2.f32 %v5699_v20 }
0x169a   :  { %5711 = vadd.xlane.f32.xlu1 %v5710_v22  ;;  %5714 = vadd.xlane.f32.xlu0 %v5713_v2 }
0x169b   :  { %9801 = vmatprep.subr.mxu0 %v5748_v14  ;;  %v12156_v28 = vpop.permute.xlu0 %5923 }
0x169c   :  { %v12158_v6 = vpop.eup %10397  ;;  %9802 = vmatpush3.msra.mxu0 %v5748_v14 }
0x169d   :  { %9813 = vmatprep.subr.mxu0 %v12156_v28  ;;  %v5835_v3 = vpop.permute.xlu1 %5834  ;;  %v5707_v18 = vsel %vm789_vm3, %v12158_v6, 0.0 }
0x169e   :  { %5708 = vadd.xlane.f32.xlu0 %v5707_v18  ;;  %9808 = vmatprep.subr.mxu1 %v5835_v3 }
0x169f   :  { %9809 = vmatpush3.msra.mxu1 %v5835_v3  ;;  %v5922_v59 = vpop.permute.xlu0 %5921 }
0x16a1   :  { %v6011_v25 = vpop.permute.xlu1 %6010 }
0x16a2   :  { %9820 = vmatprep.subr.mxu1 %v6011_v25 }
0x16a3   :  { %v12163_v36 = vpop.eup %10399  ;;  %v12199_v23 = vpop.permute.xlu0 %6101 }
0x16a4   :  { %v12165_v61 = vpop.eup %10401  ;;  %v5728_v55 = vsel %vm789_vm3, %v12163_v36, 0.0 }
0x16a5   :  { %v12169_v56 = vpop.eup %10403  ;;  %5729 = vadd.xlane.f32.xlu1 %v5728_v55  ;;  %v5722_v16 = vsel %vm789_vm3, %v12165_v61, 0.0  ;;  %v6009_v39 = vpop.permute.xlu1 %6008 }
0x16a6   :  { %v5725_v5 = vsel %vm789_vm3, %v12169_v56, 0.0  ;;  %v12173_v53 = vpop.eup %10405 }
0x16a7   :  { %5726 = vadd.xlane.f32.xlu0 %v5725_v5  ;;  %v5719_v49 = vsel %vm789_vm3, %v12173_v53, 0.0  ;;  %v12203_v46 = vpop.permute.xlu0 %6099 }
0x16a9   :  { %5723 = vadd.xlane.f32.xlu1 %v5722_v16  ;;  %v6193_v31 = vpop.permute.xlu1 %6192 }
0x16ab   :  { %5720 = vadd.xlane.f32.xlu0 %v5719_v49  ;;  %v6096_v41 = vpop.permute.xlu0 %6095 }
0x16ad   :  { %v12201_v4 = vpop.permute.xlu1 %6190 }
0x16b1   :  { %v12205_v9 = vpop.permute.xlu1 %6283 }
0x16ba   :  { %6186 = vrot.lane.b32.xlu1 %v11865_v50, %s13074_s24 }
0x16be   :  { %6188 = vrot.lane.b32.xlu1 %v11919_v29, %s13074_s24 }
0x16c1   :  { %6097 = vrot.lane.b32.xlu0 %v11910_v45, %s13074_s24 }
0x16c2   :  { %6372 = vrot.lane.b32.xlu1 %v11894_v13, %s13073_s5 }
0x16c5   :  { %6374 = vrot.lane.b32.xlu0 %v11886_v12, %s13073_s5 }
0x16c6   :  { %6279 = vrot.lane.b32.xlu1 %v11939_v37, %s13074_s24 }
0x16c9   :  { %6281 = vrot.lane.b32.xlu0 %v11896_v24, %s13073_s5 }
0x16ca   :  { %6370 = vrot.lane.b32.xlu1 %v11942_v38, %s13074_s24 }
0x16cd   :  { %6277 = vrot.lane.b32.xlu0 %v11914_v21, %s13074_s24 }
0x16d1   :  { %6368 = vrot.lane.b32.xlu0 %v11927_v43, %s13074_s24 }
0x171f   :  { %v5718_v47 = vpop.xlane.xlu1 %5717 }
0x1720   :  { %10407 = vrcp.f32 %v5718_v47 }
0x1723   :  { %v5715_v35 = vpop.xlane.xlu0 %5714  ;;  %v5712_v20 = vpop.xlane.xlu1 %5711 }
0x1724   :  { %10409 = vrcp.f32 %v5715_v35 }
0x1725   :  { %10411 = vrcp.f32 %v5712_v20 }
0x1727   :  { %v5709_v58 = vpop.xlane.xlu0 %5708 }
0x1728   :  { %10413 = vrcp.f32 %v5709_v58 }
0x172d   :  { %v10408_v14 = vpop.eup %10407 }
0x172e   :  { %v5730_v42 = vpop.xlane.xlu1 %5729  ;;  %v5742_v5 = vmul.f32 %v10408_v14, %v12144_v15 }
0x172f   :  { %10415 = vrcp.f32 %v5730_v42 }
0x1730   :  { %v5727_v22 = vpop.xlane.xlu0 %5726 }
0x1731   :  { %10417 = vrcp.f32 %v5727_v22  ;;  %v10410_v2 = vpop.eup %10409 }
0x1732   :  { %v5724_v3 = vpop.xlane.xlu1 %5723  ;;  %v5741_v18 = vmul.f32 %v10410_v2, %v12150_v57  ;;  %v10412_v55 = vpop.eup %10411 }
0x1733   :  { %10419 = vrcp.f32 %v5724_v3  ;;  %v5740_v35 = vmul.f32 %v10412_v55, %v12148_v11 }
0x1734   :  { %v5721_v16 = vpop.xlane.xlu0 %5720  ;;  %9810 = vmatprep.mubr.msk.f32.mxu1 %vm789_vm3, %v5741_v18 }
0x1735   :  { %v10414_v49 = vpop.eup %10413  ;;  %10421 = vrcp.f32 %v5721_v16  ;;  %9811 = vmatmul.mubr.msk.f32.vlgmr.msra.gmra.mxu1 %vm789_vm3, %v5742_v5 }
0x1736   :  { %v5739_v47 = vmul.f32 %v10414_v49, %v12158_v6  ;;  %9821 = vmatpush3.msra.mxu1 %v6011_v25  ;;  %v6187_v15 = vpop.permute.xlu1 %6186 }
0x1737   :  { %9822 = vmatprep.subr.mxu1 %v6009_v39 }
0x1738   :  { %9803 = vmatprep.mubr.msk.f32.mxu0 %vm789_vm3, %v5739_v47  ;;  %v6098_v57 = vpop.permute.xlu0 %6097  ;;  %9823 = vmatpush3.msra.mxu1 %v6009_v39 }
0x1739   :  { %9804 = vmatmul.mubr.msk.f32.vlgmr.msra.gmra.mxu0 %vm789_vm3, %v5740_v35  ;;  %9834 = vmatprep.subr.msk.mxu1 %vm430_vm2, %v6193_v31 }
0x173a   :  { %9814 = vmatpush3.msra.mxu0 %v12156_v28  ;;  %v6189_v25 = vpop.permute.xlu1 %6188 }
0x173b   :  { %9815 = vmatprep.subr.mxu0 %v5922_v59 }
0x173c   :  { %9816 = vmatpush3.msra.mxu0 %v5922_v59  ;;  %v6375_v20 = vpop.permute.xlu0 %6374  ;;  %v10416_v58 = vpop.eup %10415 }
0x173d   :  { %9827 = vmatprep.subr.msk.mxu0 %vm430_vm2, %v12199_v23  ;;  %v5746_v39 = vmul.f32 %v10416_v58, %v12163_v36 }
0x173e   :  { %v10418_v11 = vpop.eup %10417  ;;  %v6373_v36 = vpop.permute.xlu1 %6372 }
0x173f   :  { %v5745_v6 = vmul.f32 %v10418_v11, %v12169_v56 }
0x1740   :  { %v6282_v42 = vpop.permute.xlu0 %6281  ;;  %v10420_v22 = vpop.eup %10419 }
0x1741   :  { %9824 = vmatprep.mubr.msk.f32.mxu1 %vm789_vm3, %v5745_v6  ;;  %v5744_v59 = vmul.f32 %v10420_v22, %v12165_v61 }
0x1742   :  { %v10422_v14 = vpop.eup %10421  ;;  %9825 = vmatmul.mubr.msk.f32.vlgmr.msra.gmra.mxu1 %vm789_vm3, %v5746_v39  ;;  %v6280_v61 = vpop.permute.xlu1 %6279 }
0x1743   :  { %9835 = vmatpush3.xpose.msk.msra.mxu1 %vm430_vm2, %v6193_v31  ;;  %9838 = vmatprep.mubr.msk.f32.mxu1 %vm430_vm2, %v6187_v15  ;;  %v5743_v28 = vmul.f32 %v10422_v14, %v12173_v53 }
0x1744   :  { %9836 = vmatprep.subr.msk.mxu1 %vm430_vm2, %v12201_v4  ;;  %v6278_v56 = vpop.permute.xlu0 %6277 }
0x1745   :  { %9817 = vmatprep.mubr.msk.f32.mxu0 %vm789_vm3, %v5743_v28 }
0x1746   :  { %9818 = vmatmul.mubr.msk.f32.vlgmr.msra.gmra.mxu0 %vm789_vm3, %v5744_v59  ;;  %v6371_v31 = vpop.permute.xlu1 %6370 }
0x1747   :  { %9828 = vmatpush3.xpose.msk.msra.mxu0 %vm430_vm2, %v12199_v23  ;;  %9837 = vmatpush3.xpose.msk.msra.mxu1 %vm430_vm2, %v12201_v4 }
0x1748   :  { %9829 = vmatprep.subr.msk.mxu0 %vm430_vm2, %v12203_v46  ;;  %9831 = vmatprep.mubr.msk.f32.mxu0 %vm430_vm2, %v6096_v41  ;;  %v6369_v53 = vpop.permute.xlu0 %6368 }
0x1749   :  { %9848 = vmatprep.subr.msk.mxu1 %vm430_vm2, %v6375_v20 }
0x174a   :  { %9839 = vmatmul.mubr.msk.f32.vlgmr.msra.gmra.mxu1 %vm430_vm2, %v6189_v25 }
0x174b   :  { %9830 = vmatpush3.xpose.msk.msra.mxu0 %vm430_vm2, %v12203_v46  ;;  %9849 = vmatpush3.xpose.msk.msra.mxu1 %vm430_vm2, %v6375_v20 }
0x174c   :  { %9852 = vmatprep.mubr.msk.f32.mxu1 %vm430_vm2, %v6369_v53  ;;  %9841 = vmatprep.subr.msk.mxu0 %vm430_vm2, %v12205_v9 }
0x174d   :  { %9850 = vmatprep.subr.msk.mxu1 %vm430_vm2, %v6373_v36 }
0x174e   :  { %9832 = vmatmul.mubr.msk.f32.vlgmr.msra.gmra.mxu0 %vm430_vm2, %v6098_v57 }
0x174f   :  { %9842 = vmatpush3.xpose.msk.msra.mxu0 %vm430_vm2, %v12205_v9  ;;  %9845 = vmatprep.mubr.msk.f32.mxu0 %vm430_vm2, %v6278_v56 }
0x1750   :  { %9851 = vmatpush3.xpose.msk.msra.mxu1 %vm430_vm2, %v6373_v36  ;;  %9843 = vmatprep.subr.msk.mxu0 %vm430_vm2, %v6282_v42 }
0x1753   :  { %9853 = vmatmul.mubr.msk.f32.vlgmr.msra.gmra.mxu1 %vm430_vm2, %v6371_v31  ;;  %9844 = vmatpush3.xpose.msk.msra.mxu0 %vm430_vm2, %v6282_v42 }
0x1756   :  { %9846 = vmatmul.mubr.msk.f32.vlgmr.msra.gmra.mxu0 %vm430_vm2, %v6280_v61 }
0x17f5   :  { %v12256_v23 = vpop.f32.mrf.mxu1 }
0x17f7   :  { %v12258_v4 = vpop.f32.mrf.mxu1 }
0x17f8   :  { %v10112_v46 = vpack.i.bf16 %v12256_v23, %v12258_v4 }
0x17f9   :  { %v12262_v9 = vpop.f32.mrf.mxu0 }
0x17fb   :  { %v12264_v41 = vpop.f32.mrf.mxu0 }
0x1802   :  { %v12268_v3 = vpop.f32.mrf.mxu1 }
0x1804   :  { %v12270_v18 = vpop.f32.mrf.mxu1 }
0x1806   :  { %v12274_v5 = vpop.f32.mrf.mxu0 }
0x1808   :  { %v12276_v16 = vpop.f32.mrf.mxu0 }
0x180a   :  { %v9840_v47 = vpop.f32.mrf.mxu1 }
0x180b   :  { %v6468_v35 = vsel %vm789_vm3, %v9840_v47, -inf }
0x180c   :  { %6469 = vmax.xlane.f32.xlu0 %v6468_v35  ;;  %v6268_v57 = vpop.f32.mrf.mxu1 }
0x180d   :  { %v6465_v20 = vsel %vm789_vm3, %v6268_v57, -inf }
0x180e   :  { %v9833_v15 = vpop.f32.mrf.mxu0 }
0x180f   :  { %v6462_v58 = vsel %vm789_vm3, %v9833_v15, -inf }
0x1810   :  { %6466 = vmax.xlane.f32.xlu0 %v6465_v20  ;;  %6463 = vmax.xlane.f32.xlu1 %v6462_v58  ;;  %v6177_v11 = vpop.f32.mrf.mxu0 }
0x1811   :  { %v6459_v6 = vsel %vm789_vm3, %v6177_v11, -inf }
0x1813   :  { %v9854_v25 = vpop.f32.mrf.mxu1 }
0x1814   :  { %6460 = vmax.xlane.f32.xlu0 %v6459_v6  ;;  %v6480_v56 = vsel %vm789_vm3, %v9854_v25, -inf }
0x1815   :  { %v6450_v28 = vpop.f32.mrf.mxu1 }
0x1816   :  { %v9847_v42 = vpop.f32.mrf.mxu0  ;;  %v6477_v59 = vsel %vm789_vm3, %v6450_v28, -inf }
0x1817   :  { %v6474_v39 = vsel %vm789_vm3, %v9847_v42, -inf }
0x1818   :  { %6475 = vmax.xlane.f32.xlu1 %v6474_v39  ;;  %v6359_v22 = vpop.f32.mrf.mxu0 }
0x1819   :  { %v6471_v14 = vsel %vm789_vm3, %v6359_v22, -inf }
0x181a   :  { %6472 = vmax.xlane.f32.xlu0 %v6471_v14 }
0x181c   :  { %6481 = vmax.xlane.f32.xlu1 %v6480_v56 }
0x181e   :  { %6478 = vmax.xlane.f32.xlu0 %v6477_v59 }
0x182d   :  { %6636 = vrot.lane.b32.xlu1 %v11867_v44, %s13075_s3 }
0x1831   :  { %6547 = vrot.lane.b32.xlu1 %v11862_v32, %s13075_s3 }
0x1834   :  { %6549 = vrot.lane.b32.xlu0 %v11874_v40, %s13075_s3 }
0x1835   :  { %6634 = vrot.lane.b32.xlu1 %v11860_v52, %s13075_s3 }
0x1838   :  { %6723 = vrot.lane.b32.xlu0 %v11888_v34, %s13075_s3 }
0x1839   :  { %6810 = vrot.lane.b32.xlu1 %v11886_v12, %s13075_s3 }
0x183c   :  { %6721 = vrot.lane.b32.xlu0 %v11896_v24, %s13075_s3 }
0x183d   :  { %6808 = vrot.lane.b32.xlu1 %v11894_v13, %s13075_s3  ;;  %s13083_s3 = smov 24  }
0x1840   :  { %6901 = vrot.lane.b32.xlu0 %v11874_v40, %s13076_s1 }
0x1841   :  { %6992 = vrot.lane.b32.xlu1 %v11867_v44, %s13076_s1 }
0x1844   :  { %6899 = vrot.lane.b32.xlu0 %v11862_v32, %s13076_s1 }
0x1845   :  { %6990 = vrot.lane.b32.xlu1 %v11860_v52, %s13076_s1 }
0x1848   :  { %6895 = vrot.lane.b32.xlu0 %v11872_v19, %s13077_s30 }
0x1849   :  { %6897 = vrot.lane.b32.xlu1 %v11910_v45, %s13077_s30 }
0x1895   :  { %v6470_v36 = vpop.xlane.xlu0 %6469 }
0x1896   :  { %v6486_v53 = vsub.f32 %v9840_v47, %v6470_v36 }
0x1898   :  { %v6497_v61 = vmul.f32 1.442695, %v6486_v53 }
0x1899   :  { %v6464_v31 = vpop.xlane.xlu1 %6463  ;;  %v6467_v35 = vpop.xlane.xlu0 %6466 }
0x189a   :  { %10423 = vpow2.f32 %v6497_v61  ;;  %v6484_v20 = vsub.f32 %v9833_v15, %v6464_v31  ;;  %v6485_v58 = vsub.f32 %v6268_v57, %v6467_v35 }
0x189c   :  { %v6493_v6 = vmul.f32 1.442695, %v6484_v20  ;;  %v6495_v39 = vmul.f32 1.442695, %v6485_v58 }
0x189d   :  { %v6461_v14 = vpop.xlane.xlu0 %6460 }
0x189e   :  { %10425 = vpow2.f32 %v6493_v6  ;;  %v6483_v56 = vsub.f32 %v6177_v11, %v6461_v14 }
0x189f   :  { %10427 = vpow2.f32 %v6495_v39 }
0x18a0   :  { %v6491_v59 = vmul.f32 1.442695, %v6483_v56 }
0x18a1   :  { %v6476_v49 = vpop.xlane.xlu1 %6475 }
0x18a2   :  { %10429 = vpow2.f32 %v6491_v59  ;;  %v6488_v19 = vsub.f32 %v9847_v42, %v6476_v49 }
0x18a3   :  { %v6473_v55 = vpop.xlane.xlu0 %6472 }
0x18a4   :  { %v6487_v2 = vsub.f32 %v6359_v22, %v6473_v55  ;;  %v6501_v53 = vmul.f32 1.442695, %v6488_v19 }
0x18a5   :  { %v6482_v45 = vpop.xlane.xlu1 %6481 }
0x18a6   :  { %v6490_v47 = vsub.f32 %v9854_v25, %v6482_v45  ;;  %v6499_v11 = vmul.f32 1.442695, %v6487_v2 }
0x18a7   :  { %v12316_v36 = vpop.eup %10423  ;;  %v6479_v61 = vpop.xlane.xlu0 %6478 }
0x18a8   :  { %v6505_v15 = vmul.f32 1.442695, %v6490_v47  ;;  %v6489_v57 = vsub.f32 %v6450_v28, %v6479_v61  ;;  %v6516_v31 = vsel %vm789_vm3, %v12316_v36, 0.0 }
0x18a9   :  { %v6637_v35 = vpop.permute.xlu1 %6636  ;;  %6517 = vadd.xlane.f32.xlu1 %v6516_v31 }
0x18aa   :  { %10431 = vpow2.f32 %v6505_v15  ;;  %v6503_v20 = vmul.f32 1.442695, %v6489_v57  ;;  %9862 = vmatprep.subr.mxu1 %v6637_v35 }
0x18ab   :  { %v12320_v49 = vpop.eup %10425  ;;  %10433 = vpow2.f32 %v6501_v53  ;;  %9863 = vmatpush3.msra.mxu1 %v6637_v35  ;;  %v6550_v55 = vpop.permute.xlu0 %6549 }
0x18ac   :  { %v12322_v25 = vpop.eup %10427  ;;  %10435 = vpow2.f32 %v6503_v20  ;;  %9855 = vmatprep.subr.mxu0 %v6550_v55  ;;  %v6510_v42 = vsel %vm789_vm3, %v12320_v49, 0.0 }
0x18ad   :  { %v6548_v22 = vpop.permute.xlu1 %6547  ;;  %6511 = vadd.xlane.f32.xlu1 %v6510_v42  ;;  %v6513_v2 = vsel %vm789_vm3, %v12322_v25, 0.0  ;;  %9856 = vmatpush3.msra.mxu0 %v6550_v55  ;;  %10437 = vpow2.f32 %v6499_v11 }
0x18ae   :  { %6514 = vadd.xlane.f32.xlu0 %v6513_v2  ;;  %9857 = vmatprep.subr.mxu0 %v6548_v22 }
0x18af   :  { %v12328_v28 = vpop.eup %10429  ;;  %9858 = vmatpush3.msra.mxu0 %v6548_v22  ;;  %v12330_v58 = vpop.permute.xlu0 %6723 }
0x18b0   :  { %9869 = vmatprep.subr.mxu0 %v12330_v58  ;;  %v6507_v6 = vsel %vm789_vm3, %v12328_v28, 0.0 }
0x18b1   :  { %v6635_v39 = vpop.permute.xlu1 %6634 }
0x18b2   :  { %6508 = vadd.xlane.f32.xlu0 %v6507_v6  ;;  %9864 = vmatprep.subr.mxu1 %v6635_v39 }
0x18b3   :  { %9865 = vmatpush3.msra.mxu1 %v6635_v39  ;;  %v6722_v57 = vpop.permute.xlu0 %6721 }
0x18b5   :  { %v6811_v14 = vpop.permute.xlu1 %6810 }
0x18b6   :  { %9876 = vmatprep.subr.mxu1 %v6811_v14 }
0x18b7   :  { %v12335_v56 = vpop.eup %10431  ;;  %v12371_v35 = vpop.permute.xlu0 %6901 }
0x18b8   :  { %v12337_v59 = vpop.eup %10433  ;;  %v6528_v19 = vsel %vm789_vm3, %v12335_v56, 0.0 }
0x18b9   :  { %v12341_v45 = vpop.eup %10435  ;;  %6529 = vadd.xlane.f32.xlu1 %v6528_v19  ;;  %v6522_v61 = vsel %vm789_vm3, %v12337_v59, 0.0 }
0x18ba   :  { %v6525_v47 = vsel %vm789_vm3, %v12341_v45, 0.0  ;;  %v12345_v53 = vpop.eup %10437 }
0x18bb   :  { %6526 = vadd.xlane.f32.xlu0 %v6525_v47  ;;  %v6519_v15 = vsel %vm789_vm3, %v12345_v53, 0.0 }
0x18bd   :  { %6523 = vadd.xlane.f32.xlu1 %v6522_v61 }
0x18bf   :  { %6520 = vadd.xlane.f32.xlu0 %v6519_v15 }
0x18ce   :  { %7083 = vrot.lane.b32.xlu1 %v11888_v34, %s13076_s1 }
0x18d2   :  { %7174 = vrot.lane.b32.xlu1 %v11886_v12, %s13076_s1 }
0x18d5   :  { %6986 = vrot.lane.b32.xlu0 %v11865_v50, %s13077_s30  ;;  %v6809_v50 = vpop.permute.xlu1 %6808 }
0x18d6   :  { %7172 = vrot.lane.b32.xlu1 %v11894_v13, %s13076_s1 }
0x18d9   :  { %6988 = vrot.lane.b32.xlu0 %v11919_v29, %s13077_s30  ;;  %v6993_v31 = vpop.permute.xlu1 %6992 }
0x18da   :  { %7079 = vrot.lane.b32.xlu1 %v11939_v37, %s13077_s30  ;;  %v12375_v37 = vpop.permute.xlu0 %6899 }
0x18dd   :  { %7081 = vrot.lane.b32.xlu0 %v11896_v24, %s13076_s1  ;;  %v12373_v29 = vpop.permute.xlu1 %6990 }
0x18de   :  { %7170 = vrot.lane.b32.xlu1 %v11942_v38, %s13077_s30  ;;  %v6896_v55 = vpop.permute.xlu0 %6895 }
0x18e1   :  { %7077 = vrot.lane.b32.xlu0 %v11914_v21, %s13077_s30  ;;  %v12377_v11 = vpop.permute.xlu1 %6897 }
0x18e5   :  { %7168 = vrot.lane.b32.xlu0 %v11927_v43, %s13077_s30 }
0x1932   :  { %v6518_v20 = vpop.xlane.xlu1 %6517 }
0x1933   :  { %10439 = vrcp.f32 %v6518_v20 }
0x1936   :  { %v6512_v42 = vpop.xlane.xlu1 %6511 }
0x1937   :  { %v6515_v38 = vpop.xlane.xlu0 %6514 }
0x1938   :  { %10441 = vrcp.f32 %v6515_v38 }
0x1939   :  { %10443 = vrcp.f32 %v6512_v42 }
0x193b   :  { %v6509_v21 = vpop.xlane.xlu0 %6508 }
0x193c   :  { %10445 = vrcp.f32 %v6509_v21 }
0x1940   :  { %v10440_v22 = vpop.eup %10439 }
0x1941   :  { %v6542_v47 = vmul.f32 %v10440_v22, %v12316_v36 }
0x1942   :  { %v6530_v43 = vpop.xlane.xlu1 %6529 }
0x1943   :  { %10447 = vrcp.f32 %v6530_v43 }
0x1944   :  { %v6527_v2 = vpop.xlane.xlu0 %6526 }
0x1945   :  { %v10442_v6 = vpop.eup %10441  ;;  %10449 = vrcp.f32 %v6527_v2 }
0x1946   :  { %v6524_v39 = vpop.xlane.xlu1 %6523  ;;  %v6541_v19 = vmul.f32 %v10442_v6, %v12322_v25  ;;  %v10444_v61 = vpop.eup %10443 }
0x1947   :  { %10451 = vrcp.f32 %v6524_v39  ;;  %v6540_v42 = vmul.f32 %v10444_v61, %v12320_v49 }
0x1948   :  { %9866 = vmatprep.mubr.msk.f32.mxu1 %vm789_vm3, %v6541_v19  ;;  %v6521_v15 = vpop.xlane.xlu0 %6520 }
0x1949   :  { %v10446_v20 = vpop.eup %10445  ;;  %9867 = vmatmul.mubr.msk.f32.vlgmr.msra.gmra.mxu1 %vm789_vm3, %v6542_v47  ;;  %10453 = vrcp.f32 %v6521_v15 }
0x194a   :  { %9877 = vmatpush3.msra.mxu1 %v6811_v14  ;;  %v6539_v38 = vmul.f32 %v10446_v20, %v12328_v28  ;;  %v7084_v36 = vpop.permute.xlu1 %7083 }
0x194b   :  { %9878 = vmatprep.subr.mxu1 %v6809_v50 }
0x194c   :  { %9879 = vmatpush3.msra.mxu1 %v6809_v50  ;;  %9859 = vmatprep.mubr.msk.f32.mxu0 %vm789_vm3, %v6539_v38  ;;  %v6987_v25 = vpop.permute.xlu0 %6986 }
0x194d   :  { %9890 = vmatprep.subr.msk.mxu1 %vm430_vm2, %v6993_v31  ;;  %9860 = vmatmul.mubr.msk.f32.vlgmr.msra.gmra.mxu0 %vm789_vm3, %v6540_v42 }
0x194e   :  { %9870 = vmatpush3.msra.mxu0 %v12330_v58  ;;  %v7175_v50 = vpop.permute.xlu1 %7174 }
0x194f   :  { %9871 = vmatprep.subr.mxu0 %v6722_v57 }
0x1950   :  { %9872 = vmatpush3.msra.mxu0 %v6722_v57  ;;  %v6989_v21 = vpop.permute.xlu0 %6988  ;;  %v10448_v14 = vpop.eup %10447 }
0x1951   :  { %9883 = vmatprep.subr.msk.mxu0 %vm430_vm2, %v12371_v35  ;;  %v6546_v22 = vmul.f32 %v10448_v14, %v12335_v56 }
0x1952   :  { %v10450_v28 = vpop.eup %10449  ;;  %v7173_v56 = vpop.permute.xlu1 %7172 }
0x1953   :  { %v6545_v49 = vmul.f32 %v10450_v28, %v12341_v45 }
0x1954   :  { %v7082_v43 = vpop.permute.xlu0 %7081  ;;  %v10452_v2 = vpop.eup %10451 }
0x1955   :  { %9880 = vmatprep.mubr.msk.f32.mxu1 %vm789_vm3, %v6545_v49  ;;  %v6544_v57 = vmul.f32 %v10452_v2, %v12337_v59 }
0x1956   :  { %v10454_v6 = vpop.eup %10453  ;;  %9881 = vmatmul.mubr.msk.f32.vlgmr.msra.gmra.mxu1 %vm789_vm3, %v6546_v22  ;;  %v7080_v59 = vpop.permute.xlu1 %7079 }
0x1957   :  { %9891 = vmatpush3.xpose.msk.msra.mxu1 %vm430_vm2, %v6993_v31  ;;  %9894 = vmatprep.mubr.msk.f32.mxu1 %vm430_vm2, %v6987_v25  ;;  %v6543_v58 = vmul.f32 %v10454_v6, %v12345_v53 }
0x1958   :  { %9892 = vmatprep.subr.msk.mxu1 %vm430_vm2, %v12373_v29  ;;  %v7078_v45 = vpop.permute.xlu0 %7077 }
0x1959   :  { %9873 = vmatprep.mubr.msk.f32.mxu0 %vm789_vm3, %v6543_v58 }
0x195a   :  { %9874 = vmatmul.mubr.msk.f32.vlgmr.msra.gmra.mxu0 %vm789_vm3, %v6544_v57  ;;  %v7171_v31 = vpop.permute.xlu1 %7170 }
0x195b   :  { %9884 = vmatpush3.xpose.msk.msra.mxu0 %vm430_vm2, %v12371_v35  ;;  %9893 = vmatpush3.xpose.msk.msra.mxu1 %vm430_vm2, %v12373_v29 }
0x195c   :  { %9885 = vmatprep.subr.msk.mxu0 %vm430_vm2, %v12375_v37  ;;  %9887 = vmatprep.mubr.msk.f32.mxu0 %vm430_vm2, %v6896_v55  ;;  %v7169_v53 = vpop.permute.xlu0 %7168 }
0x195d   :  { %9904 = vmatprep.subr.msk.mxu1 %vm430_vm2, %v7175_v50 }
0x195e   :  { %9895 = vmatmul.mubr.msk.f32.vlgmr.msra.gmra.mxu1 %vm430_vm2, %v6989_v21 }
0x195f   :  { %9886 = vmatpush3.xpose.msk.msra.mxu0 %vm430_vm2, %v12375_v37  ;;  %9905 = vmatpush3.xpose.msk.msra.mxu1 %vm430_vm2, %v7175_v50 }
0x1960   :  { %9908 = vmatprep.mubr.msk.f32.mxu1 %vm430_vm2, %v7169_v53  ;;  %9897 = vmatprep.subr.msk.mxu0 %vm430_vm2, %v7084_v36 }
0x1961   :  { %9906 = vmatprep.subr.msk.mxu1 %vm430_vm2, %v7173_v56 }
0x1962   :  { %9888 = vmatmul.mubr.msk.f32.vlgmr.msra.gmra.mxu0 %vm430_vm2, %v12377_v11 }
0x1963   :  { %9898 = vmatpush3.xpose.msk.msra.mxu0 %vm430_vm2, %v7084_v36  ;;  %9901 = vmatprep.mubr.msk.f32.mxu0 %vm430_vm2, %v7078_v45 }
0x1964   :  { %9907 = vmatpush3.xpose.msk.msra.mxu1 %vm430_vm2, %v7173_v56  ;;  %9899 = vmatprep.subr.msk.mxu0 %vm430_vm2, %v7082_v43 }
0x1967   :  { %9909 = vmatmul.mubr.msk.f32.vlgmr.msra.gmra.mxu1 %vm430_vm2, %v7171_v31  ;;  %9900 = vmatpush3.xpose.msk.msra.mxu0 %vm430_vm2, %v7082_v43 }
0x196a   :  { %9902 = vmatmul.mubr.msk.f32.vlgmr.msra.gmra.mxu0 %vm430_vm2, %v7080_v59 }
0x1a09   :  { %v12427_v35 = vpop.f32.mrf.mxu1 }
0x1a0b   :  { %v12429_v29 = vpop.f32.mrf.mxu1 }
0x1a0c   :  { %v10122_v37 = vpack.i.bf16 %v12427_v35, %v12429_v29 }
0x1a0d   :  { %v12433_v11 = vpop.f32.mrf.mxu0 }
0x1a0f   :  { %v12435_v55 = vpop.f32.mrf.mxu0 }
0x1a10   :  { %v10117_v39 = vpack.i.bf16 %v12433_v11, %v12435_v55 }
0x1a16   :  { %v12439_v19 = vpop.f32.mrf.mxu1 }
0x1a18   :  { %v12441_v47 = vpop.f32.mrf.mxu1 }
0x1a19   :  { %v10152_v61 = vpack.i.bf16 %v12439_v19, %v12441_v47 }
0x1a1a   :  { %v12445_v15 = vpop.f32.mrf.mxu0 }
0x1a1c   :  { %v12447_v20 = vpop.f32.mrf.mxu0 }
0x1a1e   :  { %v9896_v42 = vpop.f32.mrf.mxu1 }
0x1a1f   :  { %v7268_v50 = vsel %vm789_vm3, %v9896_v42, -inf }
0x1a20   :  { %v7068_v25 = vpop.f32.mrf.mxu1 }
0x1a21   :  { %v7265_v36 = vsel %vm789_vm3, %v7068_v25, -inf }
0x1a22   :  { %v9889_v21 = vpop.f32.mrf.mxu0  ;;  %7266 = vmax.xlane.f32.xlu0 %v7265_v36 }
0x1a23   :  { %v7262_v14 = vsel %vm789_vm3, %v9889_v21, -inf }
0x1a24   :  { %7263 = vmax.xlane.f32.xlu1 %v7262_v14  ;;  %v6977_v28 = vpop.f32.mrf.mxu0 }
0x1a25   :  { %v7259_v49 = vsel %vm789_vm3, %v6977_v28, -inf }
0x1a26   :  { %7260 = vmax.xlane.f32.xlu0 %v7259_v49 }
0x1a27   :  { %v9910_v43 = vpop.f32.mrf.mxu1 }
0x1a28   :  { %v7280_v57 = vsel %vm789_vm3, %v9910_v43, -inf }
0x1a29   :  { %v7250_v45 = vpop.f32.mrf.mxu1 }
0x1a2a   :  { %7269 = vmax.xlane.f32.xlu0 %v7268_v50  ;;  %v9903_v22 = vpop.f32.mrf.mxu0  ;;  %v7277_v56 = vsel %vm789_vm3, %v7250_v45, -inf }
0x1a2b   :  { %v7274_v2 = vsel %vm789_vm3, %v9903_v22, -inf }
0x1a2c   :  { %7275 = vmax.xlane.f32.xlu1 %v7274_v2  ;;  %v7159_v6 = vpop.f32.mrf.mxu0 }
0x1a2d   :  { %v7271_v58 = vsel %vm789_vm3, %v7159_v6, -inf }
0x1a2e   :  { %7272 = vmax.xlane.f32.xlu0 %v7271_v58 }
0x1a30   :  { %7281 = vmax.xlane.f32.xlu1 %v7280_v57 }
0x1a32   :  { %7278 = vmax.xlane.f32.xlu0 %v7277_v56 }
0x1a41   :  { %7436 = vrot.lane.b32.xlu1 %v11867_v44, %s13078_s7 }
0x1a45   :  { %7347 = vrot.lane.b32.xlu1 %v11862_v32, %s13078_s7 }
0x1a48   :  { %7349 = vrot.lane.b32.xlu0 %v11874_v40, %s13078_s7 }
0x1a49   :  { %7434 = vrot.lane.b32.xlu1 %v11860_v52, %s13078_s7 }
0x1a4c   :  { %7523 = vrot.lane.b32.xlu0 %v11888_v34, %s13078_s7 }
0x1a4d   :  { %7610 = vrot.lane.b32.xlu1 %v11886_v12, %s13078_s7 }
0x1aab   :  { %v7267_v53 = vpop.xlane.xlu0 %7266 }
0x1aac   :  { %v7285_v59 = vsub.f32 %v7068_v25, %v7267_v53 }
0x1aad   :  { %v7264_v36 = vpop.xlane.xlu1 %7263 }
0x1aae   :  { %v7295_v31 = vmul.f32 1.442695, %v7285_v59  ;;  %v7284_v32 = vsub.f32 %v9889_v21, %v7264_v36 }
0x1aaf   :  { %v7261_v44 = vpop.xlane.xlu0 %7260 }
0x1ab0   :  { %10455 = vpow2.f32 %v7295_v31  ;;  %v7283_v14 = vsub.f32 %v6977_v28, %v7261_v44  ;;  %v7293_v52 = vmul.f32 1.442695, %v7284_v32 }
0x1ab2   :  { %v7291_v49 = vmul.f32 1.442695, %v7283_v14 }
0x1ab3   :  { %v7270_v50 = vpop.xlane.xlu0 %7269 }
0x1ab4   :  { %10457 = vpow2.f32 %v7291_v49  ;;  %v7286_v40 = vsub.f32 %v9896_v42, %v7270_v50 }
0x1ab5   :  { %v7276_v2 = vpop.xlane.xlu1 %7275 }
0x1ab6   :  { %v7297_v58 = vmul.f32 1.442695, %v7286_v40  ;;  %v7288_v34 = vsub.f32 %v9903_v22, %v7276_v2 }
0x1ab7   :  { %v7273_v57 = vpop.xlane.xlu0 %7272 }
0x1ab8   :  { %10459 = vpow2.f32 %v7297_v58  ;;  %v7287_v12 = vsub.f32 %v7159_v6, %v7273_v57  ;;  %v7301_v21 = vmul.f32 1.442695, %v7288_v34 }
0x1ab9   :  { %v7282_v56 = vpop.xlane.xlu1 %7281  ;;  %10461 = vpow2.f32 %v7293_v52 }
0x1aba   :  { %v7290_v25 = vsub.f32 %v9910_v43, %v7282_v56  ;;  %v7299_v36 = vmul.f32 1.442695, %v7287_v12 }
0x1abb   :  { %v7279_v53 = vpop.xlane.xlu0 %7278 }
0x1abc   :  { %v7305_v59 = vmul.f32 1.442695, %v7290_v25  ;;  %v7289_v38 = vsub.f32 %v7250_v45, %v7279_v53 }
0x1abd   :  { %v12471_v31 = vpop.eup %10455  ;;  %v7437_v28 = vpop.permute.xlu1 %7436 }
0x1abe   :  { %10463 = vpow2.f32 %v7305_v59  ;;  %v7303_v42 = vmul.f32 1.442695, %v7289_v38  ;;  %9918 = vmatprep.subr.mxu1 %v7437_v28  ;;  %v7313_v44 = vsel %vm789_vm3, %v12471_v31, 0.0  ;;  %v13080_v59 = vpack.i.bf16 %v12262_v9, %v12264_v41 }
0x1abf   :  { %9919 = vmatpush3.msra.mxu1 %v7437_v28  ;;  %7314 = vadd.xlane.f32.xlu0 %v7313_v44  ;;  %v7350_v22 = vpop.permute.xlu0 %7349 }
0x1ac0   :  { %10465 = vpow2.f32 %v7303_v42  ;;  %9911 = vmatprep.subr.mxu0 %v7350_v22 }
0x1ac1   :  { %v10458_v43 = vpop.eup %10457  ;;  %10467 = vpow2.f32 %v7301_v21  ;;  %v7348_v6 = vpop.permute.xlu1 %7347  ;;  %9912 = vmatpush3.msra.mxu0 %v7350_v22 }
0x1ac2   :  { %10469 = vpow2.f32 %v7299_v36  ;;  %9913 = vmatprep.subr.mxu0 %v7348_v6  ;;  %v7307_v45 = vsel %vm789_vm3, %v10458_v43, 0.0 }
0x1ac3   :  { %7308 = vadd.xlane.f32.xlu0 %v7307_v45  ;;  %9914 = vmatpush3.msra.mxu0 %v7348_v6  ;;  %v12476_v38 = vpop.permute.xlu0 %7523 }
0x1ac4   :  { %9925 = vmatprep.subr.mxu0 %v12476_v38 }
0x1ac5   :  { %v10460_v14 = vpop.eup %10459  ;;  %v7435_v32 = vpop.permute.xlu1 %7434 }
0x1ac6   :  { %9920 = vmatprep.subr.mxu1 %v7435_v32  ;;  %v7316_v49 = vsel %vm789_vm3, %v10460_v14, 0.0  ;;  %v10462_v50 = vpop.eup %10461 }
0x1ac7   :  { %9921 = vmatpush3.msra.mxu1 %v7435_v32  ;;  %7317 = vadd.xlane.f32.xlu1 %v7316_v49  ;;  %v7310_v2 = vsel %vm789_vm3, %v10462_v50, 0.0  ;;  %v9027_v32 = vld [vmem:[%s13069_s2 + $0x38] sm:$0xff] }
0x1ac9   :  { %v7611_v40 = vpop.permute.xlu1 %7610 }
0x1aca   :  { %9932 = vmatprep.subr.mxu1 %v7611_v40 }
0x1acb   :  { %v10464_v52 = vpop.eup %10463  ;;  %7311 = vadd.xlane.f32.xlu1 %v7310_v2 }
0x1acc   :  { %v7328_v34 = vsel %vm789_vm3, %v10464_v52, 0.0 }
0x1acd   :  { %v10466_v58 = vpop.eup %10465 }
0x1ace   :  { %v12481_v57 = vpop.eup %10467  ;;  %v7325_v56 = vsel %vm789_vm3, %v10466_v58, 0.0 }
0x1acf   :  { %v10470_v12 = vpop.eup %10469  ;;  %7329 = vadd.xlane.f32.xlu1 %v7328_v34  ;;  %7326 = vadd.xlane.f32.xlu0 %v7325_v56  ;;  %v7322_v25 = vsel %vm789_vm3, %v12481_v57, 0.0 }
0x1ad0   :  { %v7319_v53 = vsel %vm789_vm3, %v10470_v12, 0.0 }
0x1ad3   :  { %7323 = vadd.xlane.f32.xlu1 %v7322_v25  ;;  %7320 = vadd.xlane.f32.xlu0 %v7319_v53 }
0x1ae4   :  { %7608 = vrot.lane.b32.xlu1 %v11894_v13, %s13078_s7  ;;  %v13081_v13 = vpack.i.bf16 %v12268_v3, %v12270_v18 }
0x1ae8   :  { %10113 = vrot.lane.b32.xlu1 %v10112_v46, %s13079_s0 }
0x1ae9   :  { %7521 = vrot.lane.b32.xlu0 %v11896_v24, %s13078_s7  ;;  %v13082_v24 = vpack.i.bf16 %v12274_v5, %v12276_v16 }
0x1aec   :  { %10123 = vrot.lane.b32.xlu1 %v10122_v37, %s10547_s27 }
0x1aed   :  { %10108 = vrot.lane.b32.xlu0 %v13080_v59, %s13079_s0 }
0x1af0   :  { %10133 = vrot.lane.b32.xlu1 %v13081_v13, %s13079_s0  ;;  %v13084_v13 = vpack.i.bf16 %v12445_v15, %v12447_v20 }
0x1af1   :  { %10118 = vrot.lane.b32.xlu0 %v10117_v39, %s10547_s27 }
0x1af5   :  { %10128 = vrot.lane.b32.xlu0 %v13082_v24, %s13079_s0 }
0x1b48   :  { %v7315_v23 = vpop.xlane.xlu0 %7314 }
0x1b49   :  { %10471 = vrcp.f32 %v7315_v23 }
0x1b4c   :  { %v7309_v4 = vpop.xlane.xlu0 %7308 }
0x1b4d   :  { %10473 = vrcp.f32 %v7309_v4 }
0x1b50   :  { %v7318_v46 = vpop.xlane.xlu1 %7317 }
0x1b51   :  { %10475 = vrcp.f32 %v7318_v46 }
0x1b54   :  { %v7312_v9 = vpop.xlane.xlu1 %7311 }
0x1b55   :  { %10477 = vrcp.f32 %v7312_v9 }
0x1b56   :  { %v10472_v41 = vpop.eup %10471 }
0x1b57   :  { %v7341_v3 = vmul.f32 %v10472_v41, %v12471_v31 }
0x1b58   :  { %v7330_v18 = vpop.xlane.xlu1 %7329  ;;  %v7327_v35 = vpop.xlane.xlu0 %7326 }
0x1b59   :  { %10479 = vrcp.f32 %v7330_v18  ;;  %9922 = vmatprep.mubr.msk.f32.mxu1 %vm789_vm3, %v7341_v3 }
0x1b5a   :  { %v10474_v29 = vpop.eup %10473  ;;  %10481 = vrcp.f32 %v7327_v35 }
0x1b5b   :  { %v7339_v5 = vmul.f32 %v10474_v29, %v10458_v43 }
0x1b5c   :  { %v7324_v16 = vpop.xlane.xlu1 %7323  ;;  %v7321_v37 = vpop.xlane.xlu0 %7320 }
0x1b5d   :  { %10483 = vrcp.f32 %v7324_v16  ;;  %9915 = vmatprep.mubr.msk.f32.mxu0 %vm789_vm3, %v7339_v5 }
0x1b5e   :  { %v10476_v11 = vpop.eup %10475  ;;  %10485 = vrcp.f32 %v7321_v37 }
0x1b5f   :  { %v7342_v55 = vmul.f32 %v10476_v11, %v10460_v14 }
0x1b60   :  { %v7609_v39 = vpop.permute.xlu1 %7608  ;;  %v7522_v36 = vpop.permute.xlu0 %7521 }
0x1b61   :  { %9923 = vmatmul.mubr.msk.f32.vlgmr.msra.gmra.mxu1 %vm789_vm3, %v7342_v55 }
0x1b62   :  { %v10478_v31 = vpop.eup %10477  ;;  %9933 = vmatpush3.msra.mxu1 %v7611_v40  ;;  %v9025_v40 = vld [vmem:[%s13069_s2 + $0x28] sm:$0xff] }
0x1b63   :  { %9934 = vmatprep.subr.mxu1 %v7609_v39  ;;  %v7340_v21 = vmul.f32 %v10478_v31, %v10462_v50  ;;  %v9024_v50 = vld [vmem:[%s13069_s2 + $0x20] sm:$0xff] }
0x1b64   :  { %9935 = vmatpush3.msra.mxu1 %v7609_v39  ;;  %v7824_v2 = vpack.c.bf16 %v9025_v40, %v9024_v50  ;;  %v10114_v46 = vpop.permute.xlu1 %10113  ;;  %v10109_v19 = vpop.permute.xlu0 %10108 }
0x1b65   :  { %9916 = vmatmul.mubr.msk.f32.vlgmr.msra.gmra.mxu0 %vm789_vm3, %v7340_v21  ;;  %v10116_v41 = vunpack.i.h.bf16 %v10114_v46  ;;  %v10115_v3 = vunpack.i.l.bf16 %v10114_v46  ;;  %v10111_v18 = vunpack.i.h.bf16 %v10109_v19  ;;  %v10110_v35 = vunpack.i.l.bf16 %v10109_v19 }
0x1b66   :  { %v10480_v28 = vpop.eup %10479  ;;  %9926 = vmatpush3.msra.mxu0 %v12476_v38  ;;  %v9026_v38 = vld [vmem:[%s13069_s2 + $0x30] sm:$0xff] }
0x1b67   :  { %v10482_v42 = vpop.eup %10481  ;;  %9927 = vmatprep.subr.mxu0 %v7522_v36  ;;  %v7346_v22 = vmul.f32 %v10480_v28, %v10464_v52  ;;  %v7825_v49 = vpack.c.bf16 %v9027_v32, %v9026_v38  ;;  %v7794_v39 = vsel %vm430_vm2, %v12092_v54, %v10116_v41  ;;  %v7793_v31 = vsel %vm430_vm2, %v12096_v8, %v10115_v3 }
0x1b68   :  { %9928 = vmatpush3.msra.mxu0 %v7522_v36  ;;  %v7345_v44 = vmul.f32 %v10482_v42, %v10466_v58  ;;  %v10124_v47 = vpop.permute.xlu1 %10123  ;;  %v7792_v21 = vsel %vm430_vm2, %v12094_v30, %v10111_v18  ;;  %v7791_v28 = vsel %vm430_vm2, %v12100_v51, %v10110_v35 }
0x1b69   :  { %9939 = vmatprep.subr.bf16.mxu0 %v7825_v49  ;;  %v10126_v15 = vunpack.i.h.bf16 %v10124_v47  ;;  %v10125_v20 = vunpack.i.l.bf16 %v10124_v47 }
0x1b6a   :  { %v10484_v43 = vpop.eup %10483  ;;  %9936 = vmatprep.mubr.msk.f32.mxu1 %vm789_vm3, %v7345_v44 }
0x1b6b   :  { %v10486_v6 = vpop.eup %10485  ;;  %9937 = vmatmul.mubr.msk.f32.vlgmr.msra.gmra.mxu1 %vm789_vm3, %v7346_v22  ;;  %v7344_v14 = vmul.f32 %v10484_v43, %v12481_v57  ;;  %v7801_v44 = vsel %vm789_vm3, %v7793_v31, %v10125_v20  ;;  %v7802_v22 = vsel %vm789_vm3, %v7794_v39, %v10126_v15 }
0x1b6c   :  { %v7343_v45 = vmul.f32 %v10486_v6, %v10470_v12  ;;  %v10134_v9 = vpop.permute.xlu1 %10133 }
0x1b6d   :  { %v10136_v50 = vunpack.i.h.bf16 %v10134_v9  ;;  %v10135_v40 = vunpack.i.l.bf16 %v10134_v9 }
0x1b6e   :  { %9929 = vmatprep.mubr.msk.f32.mxu0 %vm789_vm3, %v7343_v45 }
0x1b6f   :  { %9930 = vmatmul.mubr.msk.f32.vlgmr.msra.gmra.mxu0 %vm789_vm3, %v7344_v14 }
0x1b70   :  { %9940 = vmatpush3.bf16.msra.mxu0 %v7825_v49 }
0x1b71   :  { %9941 = vmatprep.subr.bf16.mxu0 %v7824_v2 }
0x1b74   :  { %9942 = vmatpush3.bf16.msra.mxu0 %v7824_v2 }
0x1c21   :  { %v9924_v52 = vpop.f32.mrf.mxu1 }
0x1c23   :  { %v7512_v58 = vpop.f32.mrf.mxu1 }
0x1c24   :  { %v10137_v57 = vpack.i.bf16 %v9924_v52, %v7512_v58 }
0x1c25   :  { %v9917_v34 = vpop.f32.mrf.mxu0 }
0x1c26   :  { %10138 = vrot.lane.b32.xlu1 %v10137_v57, %s13083_s3 }
0x1c27   :  { %v7425_v56 = vpop.f32.mrf.mxu0 }
0x1c28   :  { %v10142_v12 = vpack.i.bf16 %v9917_v34, %v7425_v56 }
0x1c2a   :  { %10153 = vrot.lane.b32.xlu1 %v10152_v61, %s10547_s27  ;;  %10143 = vrot.lane.b32.xlu0 %v10142_v12, %s13083_s3  ;;  %v10119_v61 = vpop.permute.xlu0 %10118 }
0x1c2b   :  { %v9938_v25 = vpop.f32.mrf.mxu1  ;;  %v10121_v16 = vunpack.i.h.bf16 %v10119_v61  ;;  %v10120_v37 = vunpack.i.l.bf16 %v10119_v61 }
0x1c2d   :  { %v7686_v53 = vpop.f32.mrf.mxu1  ;;  %v7799_v45 = vsel %vm789_vm3, %v7791_v28, %v10120_v37  ;;  %v7800_v54 = vsel %vm789_vm3, %v7792_v21, %v10121_v16 }
0x1c2e   :  { %v10162_v59 = vpack.i.bf16 %v9938_v25, %v7686_v53  ;;  %10148 = vrot.lane.b32.xlu0 %v13084_v13, %s10547_s27  ;;  %v10129_v29 = vpop.permute.xlu0 %10128  ;;  %v7797_v13 = vsel %vm430_vm2, %v12104_v7, %v10135_v40 }
0x1c2f   :  { %v9931_v24 = vpop.f32.mrf.mxu0  ;;  %v10131_v2 = vunpack.i.h.bf16 %v10129_v29  ;;  %v10130_v52 = vunpack.i.l.bf16 %v10129_v29  ;;  %v9029_v29 = vld [vmem:[%s13010_s8 + $0x1] ss:$0 sm:$0xff] }
0x1c30   :  { %10163 = vrot.lane.b32.xlu1 %v10162_v59, %s13083_s3  ;;  %v7798_v59 = vsel %vm430_vm2, %v12098_v17, %v10136_v50 }
0x1c31   :  { %v7599_v23 = vpop.f32.mrf.mxu0 }
0x1c32   :  { %v10157_v4 = vpack.i.bf16 %v9931_v24, %v7599_v23  ;;  %v7796_v24 = vsel %vm430_vm2, %v12102_v1, %v10131_v2  ;;  %v7795_v23 = vsel %vm430_vm2, %v12106_v0, %v10130_v52 }
0x1c34   :  { %10158 = vrot.lane.b32.xlu0 %v10157_v4, %s13083_s3 }
0x1c98   :  { %v10139_v5 = vpop.permute.xlu1 %10138 }
0x1c99   :  { %v10141_v11 = vunpack.i.h.bf16 %v10139_v5  ;;  %v10140_v55 = vunpack.i.l.bf16 %v10139_v5 }
0x1c9b   :  { %v7810_v8 = vsel %vm3738_vm4, %v7802_v22, %v10141_v11  ;;  %v7809_v14 = vsel %vm3738_vm4, %v7801_v44, %v10140_v55 }
0x1c9c   :  { %v10154_v36 = vpop.permute.xlu1 %10153  ;;  %v10144_v42 = vpop.permute.xlu0 %10143  ;;  %v7821_v49 = vpack.c.bf16 %v7810_v8, %v7809_v14 }
0x1c9d   :  { %v10146_v43 = vunpack.i.h.bf16 %v10144_v42  ;;  %v10145_v6 = vunpack.i.l.bf16 %v10144_v42  ;;  %v10156_v57 = vunpack.i.h.bf16 %v10154_v36  ;;  %v10155_v34 = vunpack.i.l.bf16 %v10154_v36 }
0x1c9f   :  { %v7807_v30 = vsel %vm3738_vm4, %v7799_v45, %v10145_v6  ;;  %v7808_v51 = vsel %vm3738_vm4, %v7800_v54, %v10146_v43  ;;  %v7806_v46 = vsel %vm789_vm3, %v7798_v59, %v10156_v57  ;;  %v7805_v19 = vsel %vm789_vm3, %v7797_v13, %v10155_v34 }
0x1ca0   :  { %v7820_v38 = vpack.c.bf16 %v7808_v51, %v7807_v30  ;;  %v10149_v32 = vpop.permute.xlu0 %10148 }
0x1ca1   :  { %v10151_v56 = vunpack.i.h.bf16 %v10149_v32  ;;  %v10150_v12 = vunpack.i.l.bf16 %v10149_v32 }
0x1ca2   :  { %v10164_v58 = vpop.permute.xlu1 %10163  ;;  %9943 = vmatprep.mubr.msk.bf16.mxu0 %vm188_vm1, %v7820_v38 }
0x1ca3   :  { %9944 = vmatmul.mubr.msk.bf16.vlgmr.msra.gmra.mxu0 %vm188_vm1, %v7821_v49  ;;  %v10166_v25 = vunpack.i.h.bf16 %v10164_v58  ;;  %v10165_v53 = vunpack.i.l.bf16 %v10164_v58  ;;  %v7803_v9 = vsel %vm789_vm3, %v7795_v23, %v10150_v12  ;;  %v7804_v17 = vsel %vm789_vm3, %v7796_v24, %v10151_v56 }
0x1ca5   :  { %v7814_v41 = vsel %vm3738_vm4, %v7806_v46, %v10166_v25  ;;  %v7813_v7 = vsel %vm3738_vm4, %v7805_v19, %v10165_v53 }
0x1ca6   :  { %v10159_v4 = vpop.permute.xlu0 %10158  ;;  %v7823_v18 = vpack.c.bf16 %v7814_v41, %v7813_v7 }
0x1ca7   :  { %v10161_v47 = vunpack.i.h.bf16 %v10159_v4  ;;  %v10160_v61 = vunpack.i.l.bf16 %v10159_v4 }
0x1ca9   :  { %v7811_v1 = vsel %vm3738_vm4, %v7803_v9, %v10160_v61  ;;  %v7812_v3 = vsel %vm3738_vm4, %v7804_v17, %v10161_v47 }
0x1caa   :  { %v7822_v0 = vpack.c.bf16 %v7812_v3, %v7811_v1 }
0x1cac   :  { %9947 = vmatprep.mubr.msk.bf16.mxu0 %vm188_vm1, %v7822_v0 }
0x1cad   :  { %9948 = vmatmul.mubr.msk.bf16.gmra.mxu0 %vm188_vm1, %v7823_v18 }
0x1d63   :  { %v9945_v35 = vpop.f32.mrf.mxu0 }
0x1d64   :  { %v7889_v15 = vadd.f32 %v9945_v35, %v9029_v29 }
0x1d65   :  { %v7880_v5 = vpop.f32.mrf.mxu0 }
0x1d66   :  { %v7881_v20 = vadd.f32 %v9029_v29, %v7880_v5  ;;  %v7913_v55 = vadd.f32 %v7889_v15, %v11833_v60 }
0x1d67   :  { %v9946_v16 = vpop.f32.mrf.mxu0 }
0x1d68   :  { %v7911_v37 = vadd.f32 %v7881_v20, %v11825_v33  ;;  %v7892_v39 = vadd.f32 %v9946_v16, %v9029_v29  ;;  %v7929_v22 = vsel %vm188_vm1, %v7913_v55, 0.0 }
0x1d69   :  { %v7883_v11 = vpop.f32.mrf.mxu0 }
0x1d6a   :  { %v7884_v31 = vadd.f32 %v9029_v29, %v7883_v11  ;;  %v7923_v21 = vsel %vm188_vm1, %v7911_v37, 0.0  ;;  %v7914_v42 = vadd.f32 %v7892_v39, %v11835_v26  ;;  %v9040_v39 = vld [vmem:[%s13011_s11 + $0x30] sm:$0xff] }
0x1d6b   :  { %7924 = vadd.xlane.f32.xlu0 %v7923_v21 }
0x1d6c   :  { %v7912_v28 = vadd.f32 %v7884_v31, %v11827_v62  ;;  %v7932_v54 = vsel %vm188_vm1, %v7914_v42, 0.0  ;;  %v9041_v31 = vld [vmem:[%s13011_s11 + $0x38] sm:$0xff] }
0x1d6d   :  { %v9949_v36 = vpop.f32.mrf.mxu0  ;;  %v8065_v21 = vpack.c.bf16 %v9041_v31, %v9040_v39 }
0x1d6e   :  { %v7926_v44 = vsel %vm188_vm1, %v7912_v28, 0.0  ;;  %v7905_v60 = vadd.f32 %v9949_v36, %v9029_v29  ;;  %v9039_v36 = vld [vmem:[%s13011_s11 + $0x28] sm:$0xff] }
0x1d6f   :  { %v7896_v43 = vpop.f32.mrf.mxu0  ;;  %7927 = vadd.xlane.f32.xlu1 %v7926_v44  ;;  %7930 = vadd.xlane.f32.xlu0 %v7929_v22 }
0x1d70   :  { %v7897_v33 = vadd.f32 %v9029_v29, %v7896_v43  ;;  %v7917_v26 = vadd.f32 %v7905_v60, %v11850_v10  ;;  %9951 = vmatprep.subr.bf16.mxu1 %v8065_v21 }
0x1d71   :  { %v9950_v6 = vpop.f32.mrf.mxu0  ;;  %9952 = vmatpush3.bf16.msra.mxu1 %v8065_v21 }
0x1d72   :  { %v7915_v45 = vadd.f32 %v7897_v33, %v11842_v48  ;;  %v7908_v62 = vadd.f32 %v9950_v6, %v9029_v29  ;;  %v7941_v48 = vsel %vm188_vm1, %v7917_v26, 0.0 }
0x1d73   :  { %v7899_v8 = vpop.f32.mrf.mxu0  ;;  %7933 = vadd.xlane.f32.xlu0 %v7932_v54 }
0x1d74   :  { %v7900_v14 = vadd.f32 %v9029_v29, %v7899_v8  ;;  %v7935_v51 = vsel %vm188_vm1, %v7915_v45, 0.0  ;;  %v7918_v38 = vadd.f32 %v7908_v62, %v11852_v27 }
0x1d76   :  { %v7916_v30 = vadd.f32 %v7900_v14, %v11844_v63  ;;  %v7944_v49 = vsel %vm188_vm1, %v7918_v38, 0.0 }
0x1d77   :  { %7936 = vadd.xlane.f32.xlu0 %v7935_v51 }
0x1d78   :  { %v7938_v32 = vsel %vm188_vm1, %v7916_v30, 0.0 }
0x1d79   :  { %7939 = vadd.xlane.f32.xlu1 %v7938_v32 }
0x1d7b   :  { %7942 = vadd.xlane.f32.xlu0 %v7941_v48 }
0x1d7d   :  { %7945 = vadd.xlane.f32.xlu1 %v7944_v49 }
0x1df4   :  { %v7925_v50 = vpop.xlane.xlu0 %7924 }
0x1df5   :  { %v7947_v40 = vmul.f32 0.03125, %v7925_v50 }
0x1df7   :  { %v12606_v2 = vsub.f32 %v7911_v37, %v7947_v40 }
0x1df8   :  { %v7928_v10 = vpop.xlane.xlu1 %7927  ;;  %v7931_v63 = vpop.xlane.xlu0 %7930 }
0x1df9   :  { %v7948_v52 = vmul.f32 0.03125, %v7928_v10  ;;  %v7949_v58 = vmul.f32 0.03125, %v7931_v63  ;;  %v7963_v27 = vmul.f32 %v12606_v2, %v12606_v2 }
0x1dfb   :  { %v12610_v57 = vsub.f32 %v7912_v28, %v7948_v52  ;;  %v12612_v34 = vsub.f32 %v7913_v55, %v7949_v58  ;;  %v7971_v56 = vsel %vm188_vm1, %v7963_v27, 0.0  ;;  %v9038_v28 = vld [vmem:[%s13011_s11 + $0x20] sm:$0xff] }
0x1dfc   :  { %7972 = vadd.xlane.f32.xlu0 %v7971_v56  ;;  %v7934_v12 = vpop.xlane.xlu0 %7933  ;;  %v9036_v56 = vld [vmem:[%s13012_s9 + $0x1] ss:$0 sm:$0xff] }
0x1dfd   :  { %v7950_v25 = vmul.f32 0.03125, %v7934_v12  ;;  %v7964_v53 = vmul.f32 %v12610_v57, %v12610_v57  ;;  %v7965_v59 = vmul.f32 %v12612_v34, %v12612_v34 }
0x1dff   :  { %v12619_v13 = vsub.f32 %v7914_v42, %v7950_v25  ;;  %v7974_v24 = vsel %vm188_vm1, %v7964_v53, 0.0  ;;  %v7977_v23 = vsel %vm188_vm1, %v7965_v59, 0.0  ;;  %v8064_v42 = vpack.c.bf16 %v9039_v36, %v9038_v28 }
0x1e00   :  { %7975 = vadd.xlane.f32.xlu1 %v7974_v24  ;;  %7978 = vadd.xlane.f32.xlu0 %v7977_v23  ;;  %v7937_v4 = vpop.xlane.xlu0 %7936 }
0x1e01   :  { %v7951_v46 = vmul.f32 0.03125, %v7937_v4  ;;  %v7966_v19 = vmul.f32 %v12619_v13, %v12619_v13  ;;  %9953 = vmatprep.subr.bf16.mxu1 %v8064_v42  ;;  %v9037_v4 = vld [vmem:[%s13013_s10 + $0x1] ss:$0 sm:$0xff] }
0x1e02   :  { %v7940_v47 = vpop.xlane.xlu1 %7939  ;;  %9954 = vmatpush3.bf16.msra.mxu1 %v8064_v42 }
0x1e03   :  { %v12625_v61 = vsub.f32 %v7915_v45, %v7951_v46  ;;  %v7952_v9 = vmul.f32 0.03125, %v7940_v47  ;;  %v7980_v17 = vsel %vm188_vm1, %v7966_v19, 0.0 }
0x1e04   :  { %7981 = vadd.xlane.f32.xlu1 %v7980_v17  ;;  %v7943_v41 = vpop.xlane.xlu0 %7942 }
0x1e05   :  { %v12628_v7 = vsub.f32 %v7916_v30, %v7952_v9  ;;  %v7953_v1 = vmul.f32 0.03125, %v7943_v41  ;;  %v7967_v3 = vmul.f32 %v12625_v61, %v12625_v61 }
0x1e06   :  { %v7946_v0 = vpop.xlane.xlu1 %7945 }
0x1e07   :  { %v12632_v18 = vsub.f32 %v7917_v26, %v7953_v1  ;;  %v7954_v35 = vmul.f32 0.03125, %v7946_v0  ;;  %v7983_v29 = vsel %vm188_vm1, %v7967_v3, 0.0  ;;  %v7968_v5 = vmul.f32 %v12628_v7, %v12628_v7 }
0x1e08   :  { %7984 = vadd.xlane.f32.xlu0 %v7983_v29 }
0x1e09   :  { %v12637_v15 = vsub.f32 %v7918_v38, %v7954_v35  ;;  %v7986_v20 = vsel %vm188_vm1, %v7968_v5, 0.0  ;;  %v7969_v16 = vmul.f32 %v12632_v18, %v12632_v18 }
0x1e0a   :  { %7987 = vadd.xlane.f32.xlu1 %v7986_v20 }
0x1e0b   :  { %v7989_v37 = vsel %vm188_vm1, %v7969_v16, 0.0  ;;  %v7970_v11 = vmul.f32 %v12637_v15, %v12637_v15 }
0x1e0c   :  { %7990 = vadd.xlane.f32.xlu0 %v7989_v37 }
0x1e0d   :  { %v7992_v55 = vsel %vm188_vm1, %v7970_v11, 0.0 }
0x1e0e   :  { %7993 = vadd.xlane.f32.xlu1 %v7992_v55 }
0x1e85   :  { %v7973_v44 = vpop.xlane.xlu0 %7972 }
0x1e86   :  { %v7995_v22 = vmul.f32 0.03125, %v7973_v44 }
0x1e88   :  { %v8003_v43 = vadd.f32 1e-05, %v7995_v22  ;;  %v9052_v22 = vld [vmem:[%s13014_s13 + $0x60] sm:$0xff] }
0x1e89   :  { %v7976_v33 = vpop.xlane.xlu1 %7975  ;;  %v7979_v6 = vpop.xlane.xlu0 %7978 }
0x1e8a   :  { %10487 = vrsqrt.f32 %v8003_v43  ;;  %v7996_v60 = vmul.f32 0.03125, %v7976_v33  ;;  %v7997_v45 = vmul.f32 0.03125, %v7979_v6  ;;  %v9053_v43 = vld [vmem:[%s13014_s13 + $0x68] sm:$0xff]  ;;  %v9050_v6 = vld [vmem:[%s13014_s13 + $0x50] sm:$0xff] }
0x1e8b   :  { %v8238_v33 = vpack.c.bf16 %v9053_v43, %v9052_v22 }
0x1e8c   :  { %v8004_v54 = vadd.f32 1e-05, %v7996_v60  ;;  %v8005_v8 = vadd.f32 1e-05, %v7997_v45  ;;  %v9051_v60 = vld [vmem:[%s13014_s13 + $0x58] sm:$0xff] }
0x1e8d   :  { %v7982_v62 = vpop.xlane.xlu1 %7981  ;;  %v8237_v45 = vpack.c.bf16 %v9051_v60, %v9050_v6 }
0x1e8e   :  { %10489 = vrsqrt.f32 %v8004_v54  ;;  %v7998_v14 = vmul.f32 0.03125, %v7982_v62  ;;  %v9048_v54 = vld [vmem:[%s13014_s13 + $0x40] sm:$0xff] }
0x1e8f   :  { %10491 = vrsqrt.f32 %v8005_v8  ;;  %v9049_v8 = vld [vmem:[%s13014_s13 + $0x48] sm:$0xff] }
0x1e90   :  { %v8006_v26 = vadd.f32 1e-05, %v7998_v14  ;;  %v8236_v62 = vpack.c.bf16 %v9049_v8, %v9048_v54  ;;  %v9043_v14 = vld [vmem:[%s13015_s12 + $0x1] ss:$0 sm:$0xff] }
0x1e91   :  { %v7985_v30 = vpop.xlane.xlu0 %7984 }
0x1e92   :  { %10493 = vrsqrt.f32 %v8006_v26  ;;  %v7999_v51 = vmul.f32 0.03125, %v7985_v30 }
0x1e93   :  { %v7988_v38 = vpop.xlane.xlu1 %7987 }
0x1e94   :  { %v8007_v32 = vadd.f32 1e-05, %v7999_v51  ;;  %v8000_v48 = vmul.f32 0.03125, %v7988_v38 }
0x1e95   :  { %v7991_v49 = vpop.xlane.xlu0 %7990 }
0x1e96   :  { %10495 = vrsqrt.f32 %v8007_v32  ;;  %v8008_v50 = vadd.f32 1e-05, %v8000_v48  ;;  %v8001_v40 = vmul.f32 0.03125, %v7991_v49 }
0x1e97   :  { %v10488_v10 = vpop.eup %10487  ;;  %v7994_v63 = vpop.xlane.xlu1 %7993 }
0x1e98   :  { %10497 = vrsqrt.f32 %v8008_v50  ;;  %v8009_v52 = vadd.f32 1e-05, %v8001_v40  ;;  %v8002_v58 = vmul.f32 0.03125, %v7994_v63  ;;  %v8019_v27 = vmul.f32 %v10488_v10, %v12606_v2 }
0x1e9a   :  { %10499 = vrsqrt.f32 %v8009_v52  ;;  %v8010_v12 = vadd.f32 1e-05, %v8002_v58  ;;  %v8033_v24 = vmul.f32 %v9036_v56, %v8019_v27 }
0x1e9b   :  { %v10490_v25 = vpop.eup %10489 }
0x1e9c   :  { %v10492_v53 = vpop.eup %10491  ;;  %10501 = vrsqrt.f32 %v8010_v12  ;;  %v8020_v59 = vmul.f32 %v10490_v25, %v12610_v57  ;;  %v12668_v47 = vadd.f32 %v9037_v4, %v8033_v24 }
0x1e9d   :  { %v8021_v23 = vmul.f32 %v10492_v53, %v12612_v34 }
0x1e9e   :  { %v8034_v46 = vmul.f32 %v9036_v56, %v8020_v59 }
0x1e9f   :  { %v10494_v2 = vpop.eup %10493  ;;  %v8035_v17 = vmul.f32 %v9036_v56, %v8021_v23 }
0x1ea0   :  { %v8022_v19 = vmul.f32 %v10494_v2, %v12619_v13  ;;  %v12670_v9 = vadd.f32 %v9037_v4, %v8034_v46 }
0x1ea1   :  { %v12675_v34 = vadd.f32 %v9037_v4, %v8035_v17 }
0x1ea2   :  { %v8060_v41 = vpack.c.bf16 %v12670_v9, %v12668_v47  ;;  %v8036_v57 = vmul.f32 %v9036_v56, %v8022_v19 }
0x1ea3   :  { %v10496_v1 = vpop.eup %10495 }
0x1ea4   :  { %9955 = vmatprep.mubr.msk.bf16.mxu1 %vm188_vm1, %v8060_v41  ;;  %v12677_v3 = vadd.f32 %v9037_v4, %v8036_v57  ;;  %v8023_v0 = vmul.f32 %v10496_v1, %v12625_v61 }
0x1ea5   :  { %v10498_v35 = vpop.eup %10497 }
0x1ea6   :  { %v8061_v13 = vpack.c.bf16 %v12677_v3, %v12675_v34  ;;  %v8024_v29 = vmul.f32 %v10498_v35, %v12628_v7  ;;  %v8037_v5 = vmul.f32 %v9036_v56, %v8023_v0 }
0x1ea7   :  { %v10500_v20 = vpop.eup %10499 }
0x1ea8   :  { %9956 = vmatmul.mubr.msk.bf16.vlgmr.msra.gmra.mxu1 %vm188_vm1, %v8061_v13  ;;  %v8038_v16 = vmul.f32 %v9036_v56, %v8024_v29  ;;  %v12684_v37 = vadd.f32 %v9037_v4, %v8037_v5  ;;  %v8025_v11 = vmul.f32 %v10500_v20, %v12632_v18  ;;  %v9054_v18 = vld [vmem:[%s13014_s13 + $0x70] sm:$0xff] }
0x1ea9   :  { %v10502_v55 = vpop.eup %10501 }
0x1eaa   :  { %v12687_v39 = vadd.f32 %v9037_v4, %v8038_v16  ;;  %v8026_v61 = vmul.f32 %v10502_v55, %v12637_v15  ;;  %v8039_v31 = vmul.f32 %v9036_v56, %v8025_v11  ;;  %v9055_v15 = vld [vmem:[%s13014_s13 + $0x78] sm:$0xff] }
0x1eab   :  { %v8239_v44 = vpack.c.bf16 %v9055_v15, %v9054_v18 }
0x1eac   :  { %v8062_v21 = vpack.c.bf16 %v12687_v39, %v12684_v37  ;;  %v8040_v28 = vmul.f32 %v9036_v56, %v8026_v61  ;;  %v12692_v7 = vadd.f32 %v9037_v4, %v8039_v31 }
0x1ead   :  { %9963 = vmatprep.subr.bf16.mxu0 %v8239_v44 }
0x1eae   :  { %9959 = vmatprep.mubr.msk.bf16.mxu1 %vm188_vm1, %v8062_v21  ;;  %v12695_v36 = vadd.f32 %v9037_v4, %v8040_v28  ;;  %9964 = vmatpush3.bf16.msra.mxu0 %v8239_v44 }
0x1eaf   :  { %9965 = vmatprep.subr.bf16.mxu0 %v8238_v33 }
0x1eb0   :  { %v8063_v42 = vpack.c.bf16 %v12695_v36, %v12692_v7 }
0x1eb2   :  { %9960 = vmatmul.mubr.msk.bf16.gmra.mxu1 %vm188_vm1, %v8063_v42  ;;  %9966 = vmatpush3.bf16.msra.mxu0 %v8238_v33 }
0x1eb3   :  { %9967 = vmatprep.subr.bf16.mxu0 %v8237_v45 }
0x1eb6   :  { %9968 = vmatpush3.bf16.msra.mxu0 %v8237_v45 }
0x1eb7   :  { %9969 = vmatprep.subr.bf16.mxu0 %v8236_v62 }
0x1eba   :  { %9970 = vmatpush3.bf16.msra.mxu0 %v8236_v62 }
0x1f68   :  { %v9957_v26 = vpop.f32.mrf.mxu1 }
0x1f69   :  { %v12727_v30 = vadd.f32 %v9957_v26, %v9043_v14 }
0x1f6a   :  { %v8120_v51 = vpop.f32.mrf.mxu1 }
0x1f6b   :  { %v8153_v38 = vmul.f32 %v12727_v30, %v12727_v30  ;;  %v12731_v32 = vadd.f32 %v9043_v14, %v8120_v51 }
0x1f6c   :  { %v9958_v48 = vpop.f32.mrf.mxu1 }
0x1f6d   :  { %v8161_v49 = vmul.f32 %v8153_v38, %v12727_v30  ;;  %v8151_v50 = vmul.f32 %v12731_v32, %v12731_v32  ;;  %v12736_v40 = vadd.f32 %v9958_v48, %v9043_v14 }
0x1f6e   :  { %v8123_v10 = vpop.f32.mrf.mxu1 }
0x1f6f   :  { %v8169_v63 = vmul.f32 0.044715, %v8161_v49  ;;  %v8159_v52 = vmul.f32 %v8151_v50, %v12731_v32  ;;  %v8154_v58 = vmul.f32 %v12736_v40, %v12736_v40  ;;  %v12741_v27 = vadd.f32 %v9043_v14, %v8123_v10 }
0x1f71   :  { %v8177_v56 = vadd.f32 %v8169_v63, %v12727_v30  ;;  %v8167_v12 = vmul.f32 0.044715, %v8159_v52  ;;  %v8162_v25 = vmul.f32 %v8154_v58, %v12736_v40  ;;  %v8152_v53 = vmul.f32 %v12741_v27, %v12741_v27 }
0x1f72   :  { %v9961_v59 = vpop.f32.mrf.mxu1 }
0x1f73   :  { %v8185_v24 = vmul.f32 0.7978846, %v8177_v56  ;;  %v8175_v23 = vadd.f32 %v8167_v12, %v12731_v32  ;;  %v8170_v4 = vmul.f32 0.044715, %v8162_v25  ;;  %v8160_v46 = vmul.f32 %v8152_v53, %v12741_v27 }
0x1f74   :  { %v12749_v2 = vadd.f32 %v9961_v59, %v9043_v14  ;;  %v8136_v19 = vpop.f32.mrf.mxu1 }
0x1f75   :  { %v8183_v17 = vmul.f32 0.7978846, %v8175_v23  ;;  %v8178_v41 = vadd.f32 %v8170_v4, %v12736_v40  ;;  %v8168_v57 = vmul.f32 0.044715, %v8160_v46  ;;  %10503 = vtanh.f32 %v8185_v24 }
0x1f76   :  { %v8157_v1 = vmul.f32 %v12749_v2, %v12749_v2  ;;  %v12754_v0 = vadd.f32 %v9043_v14, %v8136_v19  ;;  %v9962_v35 = vpop.f32.mrf.mxu1 }
0x1f77   :  { %10505 = vtanh.f32 %v8183_v17  ;;  %v8186_v13 = vmul.f32 0.7978846, %v8178_v41  ;;  %v8176_v29 = vadd.f32 %v8168_v57, %v12741_v27  ;;  %v8148_v5 = vadd.f32 %v9962_v35, %v9043_v14 }
0x1f78   :  { %v8165_v20 = vmul.f32 %v8157_v1, %v12749_v2  ;;  %v8155_v16 = vmul.f32 %v12754_v0, %v12754_v0  ;;  %v8139_v11 = vpop.f32.mrf.mxu1 }
0x1f79   :  { %10507 = vtanh.f32 %v8186_v13  ;;  %v8184_v55 = vmul.f32 0.7978846, %v8176_v29  ;;  %v8158_v61 = vmul.f32 %v8148_v5, %v8148_v5  ;;  %v8140_v31 = vadd.f32 %v9043_v14, %v8139_v11 }
0x1f7a   :  { %v8173_v21 = vmul.f32 0.044715, %v8165_v20  ;;  %v8163_v28 = vmul.f32 %v8155_v16, %v12754_v0 }
0x1f7b   :  { %10509 = vtanh.f32 %v8184_v55  ;;  %v8166_v42 = vmul.f32 %v8158_v61, %v8148_v5  ;;  %v8156_v18 = vmul.f32 %v8140_v31, %v8140_v31 }
0x1f7c   :  { %v8181_v15 = vadd.f32 %v8173_v21, %v12749_v2  ;;  %v8171_v44 = vmul.f32 0.044715, %v8163_v28 }
0x1f7d   :  { %v8174_v22 = vmul.f32 0.044715, %v8166_v42  ;;  %v8164_v43 = vmul.f32 %v8156_v18, %v8140_v31 }
0x1f7e   :  { %v8189_v33 = vmul.f32 0.7978846, %v8181_v15  ;;  %v8179_v6 = vadd.f32 %v8171_v44, %v12754_v0  ;;  %v9057_v15 = vld [vmem:[%s13016_s14 + $0x1] ss:$0 sm:$0xff] }
0x1f7f   :  { %v8182_v60 = vadd.f32 %v8174_v22, %v8148_v5  ;;  %v8172_v45 = vmul.f32 0.044715, %v8164_v43 }
0x1f80   :  { %10511 = vtanh.f32 %v8189_v33  ;;  %v8187_v54 = vmul.f32 0.7978846, %v8179_v6 }
0x1f81   :  { %v8190_v8 = vmul.f32 0.7978846, %v8182_v60  ;;  %v8180_v62 = vadd.f32 %v8172_v45, %v8140_v31 }
0x1f82   :  { %10513 = vtanh.f32 %v8187_v54  ;;  %v10504_v14 = vpop.eup %10503 }
0x1f83   :  { %10515 = vtanh.f32 %v8190_v8  ;;  %v8188_v26 = vmul.f32 0.7978846, %v8180_v62  ;;  %v8201_v49 = vadd.f32 1.0, %v10504_v14 }
0x1f84   :  { %v10506_v51 = vpop.eup %10505 }
0x1f85   :  { %v8199_v38 = vadd.f32 1.0, %v10506_v51  ;;  %10517 = vtanh.f32 %v8188_v26  ;;  %v8209_v56 = vmul.f32 0.5, %v8201_v49 }
0x1f86   :  { %v10508_v48 = vpop.eup %10507 }
0x1f87   :  { %v8202_v50 = vadd.f32 1.0, %v10508_v48  ;;  %v8207_v63 = vmul.f32 0.5, %v8199_v38  ;;  %v8217_v23 = vmul.f32 %v8209_v56, %v12727_v30 }
0x1f88   :  { %v10510_v10 = vpop.eup %10509 }
0x1f89   :  { %v8210_v52 = vmul.f32 0.5, %v8202_v50  ;;  %v8200_v58 = vadd.f32 1.0, %v10510_v10  ;;  %v8215_v59 = vmul.f32 %v8207_v63, %v12731_v32 }
0x1f8b   :  { %v8208_v12 = vmul.f32 0.5, %v8200_v58  ;;  %v8218_v25 = vmul.f32 %v8210_v52, %v12736_v40 }
0x1f8d   :  { %v10512_v53 = vpop.eup %10511  ;;  %v8216_v24 = vmul.f32 %v8208_v12, %v12741_v27  ;;  %v8233_v17 = vpack.c.bf16 %v8218_v25, %v8217_v23 }
0x1f8e   :  { %v8205_v41 = vadd.f32 1.0, %v10512_v53 }
0x1f8f   :  { %v10514_v4 = vpop.eup %10513  ;;  %v8232_v46 = vpack.c.bf16 %v8216_v24, %v8215_v59 }
0x1f90   :  { %v10516_v19 = vpop.eup %10515  ;;  %v8203_v57 = vadd.f32 1.0, %v10514_v4  ;;  %v8213_v32 = vmul.f32 0.5, %v8205_v41 }
0x1f91   :  { %v8206_v1 = vadd.f32 1.0, %v10516_v19  ;;  %9971 = vmatprep.mubr.msk.bf16.mxu0 %vm108_vm0, %v8232_v46 }
0x1f92   :  { %v10518_v35 = vpop.eup %10517  ;;  %9972 = vmatmul.mubr.msk.bf16.vlgmr.msra.gmra.mxu0 %vm108_vm0, %v8233_v17  ;;  %v8211_v40 = vmul.f32 0.5, %v8203_v57  ;;  %v8221_v11 = vmul.f32 %v8213_v32, %v12749_v2 }
0x1f93   :  { %v8214_v13 = vmul.f32 0.5, %v8206_v1  ;;  %v8204_v29 = vadd.f32 1.0, %v10518_v35 }
0x1f94   :  { %v8219_v30 = vmul.f32 %v8211_v40, %v12754_v0 }
0x1f95   :  { %v8212_v20 = vmul.f32 0.5, %v8204_v29  ;;  %v8222_v27 = vmul.f32 %v8214_v13, %v8148_v5 }
0x1f97   :  { %v8220_v16 = vmul.f32 %v8212_v20, %v8140_v31  ;;  %v8235_v61 = vpack.c.bf16 %v8222_v27, %v8221_v11 }
0x1f99   :  { %v8234_v55 = vpack.c.bf16 %v8220_v16, %v8219_v30 }
0x1f9b   :  { %9975 = vmatprep.mubr.msk.bf16.mxu0 %vm108_vm0, %v8234_v55 }
0x1f9c   :  { %9976 = vmatmul.mubr.msk.bf16.gmra.mxu0 %vm108_vm0, %v8235_v61 }
0x2052   :  { %v9973_v21 = vpop.f32.mrf.mxu0 }
0x2053   :  { %v8303_v62 = vadd.f32 %v9973_v21, %v9057_v15 }
0x2054   :  { %v8294_v28 = vpop.f32.mrf.mxu0 }
0x2055   :  { %v8295_v22 = vadd.f32 %v9057_v15, %v8294_v28 }
0x2056   :  { %v9974_v42 = vpop.f32.mrf.mxu0 }
0x2057   :  { %v8325_v14 = vadd.f32 %v8295_v22, %v12668_v47  ;;  %v8306_v48 = vadd.f32 %v9974_v42, %v9057_v15  ;;  %v8516_v22 = vld [vmem:[%s13019_s17 + $0x30] sm:$0xff] }
0x2058   :  { %v8297_v18 = vpop.f32.mrf.mxu0 }
0x2059   :  { %v8298_v26 = vadd.f32 %v9057_v15, %v8297_v18  ;;  %v8337_v50 = vsel %vm188_vm1, %v8325_v14, 0.0  ;;  %v8328_v47 = vadd.f32 %v8306_v48, %v12677_v3 }
0x205b   :  { %v8326_v49 = vadd.f32 %v8298_v26, %v12670_v9  ;;  %v8346_v63 = vsel %vm188_vm1, %v8328_v47, 0.0 }
0x205c   :  { %v9977_v5 = vpop.f32.mrf.mxu0 }
0x205d   :  { %v8319_v44 = vadd.f32 %v9977_v5, %v9057_v15 }
0x205e   :  { %v8310_v0 = vpop.f32.mrf.mxu0 }
0x205f   :  { %v8331_v31 = vadd.f32 %v8319_v44, %v12692_v7  ;;  %v8311_v2 = vadd.f32 %v9057_v15, %v8310_v0 }
0x2060   :  { %v9978_v43 = vpop.f32.mrf.mxu0 }
0x2061   :  { %v8329_v33 = vadd.f32 %v8311_v2, %v12684_v37  ;;  %v8322_v6 = vadd.f32 %v9978_v43, %v9057_v15  ;;  %v8355_v60 = vsel %vm188_vm1, %v8331_v31, 0.0  ;;  %v8327_v37 = vadd.f32 %v8303_v62, %v12675_v34  ;;  %v8517_v43 = vld [vmem:[%s13019_s17 + $0x38] sm:$0xff]  ;;  %v8644_v62 = vld [vmem:[%s13020_s19 + $0x50] sm:$0xff] }
0x2062   :  { %8356 = vadd.xlane.f32.xlu0 %v8355_v60  ;;  %v8313_v45 = vpop.f32.mrf.mxu0  ;;  %v10549_v2 = vmov 0.0   ;;  %v8515_v60 = vld [vmem:[%s13019_s17 + $0x28] sm:$0xff] }
0x2063   :  { %v8332_v54 = vadd.f32 %v8322_v6, %v12695_v36  ;;  %v8314_v8 = vadd.f32 %v9057_v15, %v8313_v45  ;;  %v8349_v38 = vsel %vm188_vm1, %v8329_v33, 0.0  ;;  %v8343_v10 = vsel %vm188_vm1, %v8327_v37, 0.0  ;;  %9979 = vmatprep.subr.bf16.mxu1 %v10549_v2  ;;  %9983 = vmatprep.mubr.msk.bf16.mxu1 %vm10550_vm5, %v10549_v2 }
0x2064   :  { %v8525_v6 = vpack.c.bf16 %v8517_v43, %v8516_v22  ;;  %9995 = vmatprep.subr.bf16.mxu0 %v10549_v2  ;;  %10009 = vmatprep.mubr.msk.bf16.mxu0 %vm10550_vm5, %v10549_v2 }
0x2065   :  { %v8330_v51 = vadd.f32 %v8314_v8, %v12687_v39  ;;  %v8358_v7 = vsel %vm188_vm1, %v8332_v54, 0.0  ;;  %v8340_v39 = vsel %vm188_vm1, %v8326_v49, 0.0 }
0x2066   :  { %8359 = vadd.xlane.f32.xlu1 %v8358_v7  ;;  %8350 = vadd.xlane.f32.xlu0 %v8349_v38  ;;  %v8642_v7 = vld [vmem:[%s13020_s19 + $0x40] sm:$0xff]  ;;  %v8643_v38 = vld [vmem:[%s13020_s19 + $0x48] sm:$0xff] }
0x2067   :  { %v8352_v36 = vsel %vm188_vm1, %v8330_v51, 0.0  ;;  %9980 = vmatpush3.bf16.msra.mxu1 %v8525_v6 }
0x2068   :  { %9981 = vmatprep.subr.bf16.mxu1 %v10549_v2 }
0x206a   :  { %8353 = vadd.xlane.f32.xlu1 %v8352_v36  ;;  %8338 = vadd.xlane.f32.xlu0 %v8337_v50 }
0x206e   :  { %8341 = vadd.xlane.f32.xlu1 %v8340_v39  ;;  %8344 = vadd.xlane.f32.xlu0 %v8343_v10 }
0x2072   :  { %8347 = vadd.xlane.f32.xlu1 %v8346_v63 }
0x20eb   :  { %v8357_v34 = vpop.xlane.xlu0 %8356 }
0x20ec   :  { %v8367_v52 = vmul.f32 0.03125, %v8357_v34 }
0x20ee   :  { %v12792_v9 = vsub.f32 %v8331_v31, %v8367_v52 }
0x20ef   :  { %v8360_v58 = vpop.xlane.xlu1 %8359  ;;  %v8351_v56 = vpop.xlane.xlu0 %8350 }
0x20f0   :  { %v8368_v12 = vmul.f32 0.03125, %v8360_v58  ;;  %v8365_v25 = vmul.f32 0.03125, %v8351_v56  ;;  %v8383_v3 = vmul.f32 %v12792_v9, %v12792_v9 }
0x20f2   :  { %v12796_v53 = vsub.f32 %v8332_v54, %v8368_v12  ;;  %v12798_v59 = vsub.f32 %v8329_v33, %v8365_v25  ;;  %v8403_v24 = vsel %vm188_vm1, %v8383_v3, 0.0  ;;  %v8514_v33 = vld [vmem:[%s13019_s17 + $0x20] sm:$0xff] }
0x20f3   :  { %v8354_v23 = vpop.xlane.xlu1 %8353  ;;  %8404 = vadd.xlane.f32.xlu0 %v8403_v24  ;;  %v8339_v4 = vpop.xlane.xlu0 %8338  ;;  %v8524_v45 = vpack.c.bf16 %v8515_v60, %v8514_v33  ;;  %v8646_v54 = vld [vmem:[%s13020_s19 + $0x60] sm:$0xf] }
0x20f4   :  { %v8366_v46 = vmul.f32 0.03125, %v8354_v23  ;;  %v8361_v19 = vmul.f32 0.03125, %v8339_v4  ;;  %v8384_v17 = vmul.f32 %v12796_v53, %v12796_v53  ;;  %v8381_v41 = vmul.f32 %v12798_v59, %v12798_v59 }
0x20f5   :  { %9982 = vmatpush3.bf16.msra.mxu1 %v8524_v45  ;;  %v8654_v8 = vpack.c.bf16 %v8646_v54, %v8646_v54 }
0x20f6   :  { %v12805_v57 = vsub.f32 %v8330_v51, %v8366_v46  ;;  %v12807_v1 = vsub.f32 %v8325_v14, %v8361_v19  ;;  %v8406_v35 = vsel %vm188_vm1, %v8384_v17, 0.0  ;;  %v8397_v40 = vsel %vm188_vm1, %v8381_v41, 0.0  ;;  %9987 = vmatprep.subr.bf16.mxu1 %v10549_v2  ;;  %v8645_v14 = vld [vmem:[%s13020_s19 + $0x58] sm:$0xff] }
0x20f7   :  { %8407 = vadd.xlane.f32.xlu1 %v8406_v35  ;;  %v8342_v13 = vpop.xlane.xlu1 %8341  ;;  %8398 = vadd.xlane.f32.xlu0 %v8397_v40  ;;  %v8345_v29 = vpop.xlane.xlu0 %8344  ;;  %v8668_v26 = vsel %vm8666_vm6, %v8654_v8, 0  ;;  %v8653_v51 = vpack.c.bf16 %v8645_v14, %v8644_v62 }
0x20f8   :  { %v8362_v32 = vmul.f32 0.03125, %v8342_v13  ;;  %v8363_v20 = vmul.f32 0.03125, %v8345_v29  ;;  %v8382_v27 = vmul.f32 %v12805_v57, %v12805_v57  ;;  %v8377_v30 = vmul.f32 %v12807_v1, %v12807_v1  ;;  %9996 = vmatpush3.bf16.msra.mxu0 %v8668_v26  ;;  %v9064_v13 = vld [vmem:[%s13017_s15 + $0x1] ss:$0 sm:$0xff] }
0x20f9   :  { %9997 = vmatprep.subr.bf16.mxu0 %v10549_v2 }
0x20fa   :  { %v12815_v16 = vsub.f32 %v8326_v49, %v8362_v32  ;;  %v12817_v11 = vsub.f32 %v8327_v37, %v8363_v20  ;;  %v8400_v55 = vsel %vm188_vm1, %v8382_v27, 0.0  ;;  %v8385_v61 = vsel %vm188_vm1, %v8377_v30, 0.0  ;;  %v9065_v30 = vld [vmem:[%s13018_s16 + $0x1] ss:$0 sm:$0xff] }
0x20fb   :  { %8401 = vadd.xlane.f32.xlu1 %v8400_v55  ;;  %v8348_v21 = vpop.xlane.xlu1 %8347  ;;  %8386 = vadd.xlane.f32.xlu0 %v8385_v61  ;;  %v8652_v37 = vpack.c.bf16 %v8643_v38, %v8642_v7 }
0x20fc   :  { %v8364_v28 = vmul.f32 0.03125, %v8348_v21  ;;  %v8378_v42 = vmul.f32 %v12815_v16, %v12815_v16  ;;  %v8379_v18 = vmul.f32 %v12817_v11, %v12817_v11  ;;  %9998 = vmatpush3.bf16.msra.mxu0 %v8653_v51 }
0x20fd   :  { %9999 = vmatprep.subr.bf16.mxu0 %v10549_v2 }
0x20fe   :  { %v12825_v15 = vsub.f32 %v8328_v47, %v8364_v28  ;;  %v8388_v5 = vsel %vm188_vm1, %v8378_v42, 0.0  ;;  %v8391_v44 = vsel %vm188_vm1, %v8379_v18, 0.0 }
0x20ff   :  { %8389 = vadd.xlane.f32.xlu1 %v8388_v5  ;;  %8392 = vadd.xlane.f32.xlu0 %v8391_v44 }
0x2100   :  { %v8380_v0 = vmul.f32 %v12825_v15, %v12825_v15  ;;  %10000 = vmatpush3.bf16.msra.mxu0 %v8652_v37 }
0x2101   :  { %10001 = vmatprep.subr.bf16.mxu0 %v10549_v2 }
0x2102   :  { %v8394_v31 = vsel %vm188_vm1, %v8380_v0, 0.0 }
0x2103   :  { %8395 = vadd.xlane.f32.xlu1 %v8394_v31 }
0x217c   :  { %v8405_v48 = vpop.xlane.xlu0 %8404 }
0x217d   :  { %v8415_v49 = vmul.f32 0.03125, %v8405_v48 }
0x217f   :  { %v8423_v36 = vadd.f32 1e-05, %v8415_v49 }
0x2180   :  { %v8408_v50 = vpop.xlane.xlu1 %8407  ;;  %v8399_v47 = vpop.xlane.xlu0 %8398 }
0x2181   :  { %10519 = vrsqrt.f32 %v8423_v36  ;;  %v8416_v39 = vmul.f32 0.03125, %v8408_v50  ;;  %v8413_v10 = vmul.f32 0.03125, %v8399_v47 }
0x2183   :  { %v8424_v63 = vadd.f32 1e-05, %v8416_v39  ;;  %v8421_v34 = vadd.f32 1e-05, %v8413_v10 }
0x2184   :  { %v8402_v52 = vpop.xlane.xlu1 %8401  ;;  %v8387_v58 = vpop.xlane.xlu0 %8386 }
0x2185   :  { %10521 = vrsqrt.f32 %v8424_v63  ;;  %v8414_v56 = vmul.f32 0.03125, %v8402_v52  ;;  %v8409_v12 = vmul.f32 0.03125, %v8387_v58 }
0x2186   :  { %10523 = vrsqrt.f32 %v8421_v34 }
0x2187   :  { %v8422_v25 = vadd.f32 1e-05, %v8414_v56  ;;  %v8417_v3 = vadd.f32 1e-05, %v8409_v12 }
0x2188   :  { %v8390_v24 = vpop.xlane.xlu1 %8389  ;;  %v8393_v23 = vpop.xlane.xlu0 %8392 }
0x2189   :  { %10525 = vrsqrt.f32 %v8422_v25  ;;  %v8410_v4 = vmul.f32 0.03125, %v8390_v24  ;;  %v8411_v46 = vmul.f32 0.03125, %v8393_v23 }
0x218a   :  { %10527 = vrsqrt.f32 %v8417_v3 }
0x218b   :  { %v8418_v19 = vadd.f32 1e-05, %v8410_v4  ;;  %v8419_v17 = vadd.f32 1e-05, %v8411_v46 }
0x218c   :  { %v8396_v41 = vpop.xlane.xlu1 %8395 }
0x218d   :  { %10529 = vrsqrt.f32 %v8418_v19  ;;  %v8412_v35 = vmul.f32 0.03125, %v8396_v41 }
0x218e   :  { %v10520_v40 = vpop.eup %10519  ;;  %10531 = vrsqrt.f32 %v8419_v17 }
0x218f   :  { %v8439_v29 = vmul.f32 %v10520_v40, %v12792_v9  ;;  %v8420_v32 = vadd.f32 1e-05, %v8412_v35 }
0x2191   :  { %v8453_v20 = vmul.f32 %v9064_v13, %v8439_v29  ;;  %10533 = vrsqrt.f32 %v8420_v32 }
0x2192   :  { %v10522_v27 = vpop.eup %10521 }
0x2193   :  { %v10524_v55 = vpop.eup %10523  ;;  %v8440_v61 = vmul.f32 %v10522_v27, %v12796_v53  ;;  %v8467_v28 = vadd.f32 %v9065_v30, %v8453_v20 }
0x2194   :  { %v8437_v21 = vmul.f32 %v10524_v55, %v12798_v59 }
0x2195   :  { %v8454_v42 = vmul.f32 %v9064_v13, %v8440_v61  ;;  %v8496_v22 = vsel %vm188_vm1, %v8467_v28, 0.0  ;;  %v8512_v28 = vld [vmem:[%s13019_s17 + $0x10] sm:$0xff] }
0x2196   :  { %v10526_v18 = vpop.eup %10525  ;;  %v8451_v5 = vmul.f32 %v9064_v13, %v8437_v21 }
0x2197   :  { %v10528_v44 = vpop.eup %10527  ;;  %v8468_v0 = vadd.f32 %v9065_v30, %v8454_v42  ;;  %v8438_v9 = vmul.f32 %v10526_v18, %v12805_v57  ;;  %v8513_v42 = vld [vmem:[%s13019_s17 + $0x18] sm:$0xff] }
0x2198   :  { %v8433_v31 = vmul.f32 %v10528_v44, %v12807_v1  ;;  %v8465_v33 = vadd.f32 %v9065_v30, %v8451_v5 }
0x2199   :  { %v8497_v43 = vsel %vm188_vm1, %v8468_v0, 0.0  ;;  %v8452_v6 = vmul.f32 %v9064_v13, %v8438_v9 }
0x219a   :  { %v10530_v60 = vpop.eup %10529  ;;  %v8498_v53 = vadd.f32 %v8497_v43, %v8496_v22  ;;  %v8447_v45 = vmul.f32 %v9064_v13, %v8433_v31  ;;  %v8487_v57 = vsel %vm188_vm1, %v8465_v33, 0.0  ;;  %v8521_v31 = vpack.c.bf16 %v8513_v42, %v8512_v28  ;;  %v8510_v33 = vld [vmem:[%s13019_s17] sm:$0xff]  ;;  %v8712_v42 = vld [vmem:[%s13021_s21 + $0x8] sm:$0xff] }
0x219b   :  { %v10532_v59 = vpop.eup %10531  ;;  %v8466_v54 = vadd.f32 %v9065_v30, %v8452_v6  ;;  %v8434_v8 = vmul.f32 %v10530_v60, %v12815_v16  ;;  %v8511_v6 = vld [vmem:[%s13019_s17 + $0x8] sm:$0xff]  ;;  %v8711_v28 = vld [vmem:[%s13021_s21] sm:$0xff] }
0x219c   :  { %v8499_v62 = vrot.slane %v8498_v53, 4  ;;  %v8435_v14 = vmul.f32 %v10532_v59, %v12817_v11  ;;  %v8461_v26 = vadd.f32 %v9065_v30, %v8447_v45  ;;  %v8520_v45 = vpack.c.bf16 %v8511_v6, %v8510_v33 }
0x219d   :  { %v8488_v1 = vsel %vm188_vm1, %v8466_v54, 0.0  ;;  %v8448_v51 = vmul.f32 %v9064_v13, %v8434_v8 }
0x219e   :  { %v10534_v7 = vpop.eup %10533  ;;  %v8500_v38 = vadd.f32 %v8499_v62, %v8498_v53  ;;  %v8489_v37 = vadd.f32 %v8488_v1, %v8487_v57  ;;  %v8449_v48 = vmul.f32 %v9064_v13, %v8435_v14  ;;  %v8469_v16 = vsel %vm188_vm1, %v8461_v26, 0.0  ;;  %v8640_v57 = vld [vmem:[%s13020_s19 + $0x30] sm:$0xff]  ;;  %v8641_v1 = vld [vmem:[%s13020_s19 + $0x38] sm:$0xff] }
0x219f   :  { %v8462_v49 = vadd.f32 %v9065_v30, %v8448_v51  ;;  %v8436_v36 = vmul.f32 %v10534_v7, %v12825_v15  ;;  %v8651_v26 = vpack.c.bf16 %v8641_v1, %v8640_v57  ;;  %v8638_v51 = vld [vmem:[%s13020_s19 + $0x20] sm:$0xff]  ;;  %v8639_v7 = vld [vmem:[%s13020_s19 + $0x28] sm:$0xff] }
0x21a0   :  { %v8501_v50 = vrot.slane %v8500_v38, 2  ;;  %v8490_v47 = vrot.slane %v8489_v37, 4  ;;  %v8463_v11 = vadd.f32 %v9065_v30, %v8449_v48  ;;  %v8637_v48 = vld [vmem:[%s13020_s19 + $0x18] sm:$0xff] }
0x21a1   :  { %v8470_v39 = vsel %vm188_vm1, %v8462_v49, 0.0  ;;  %v8450_v10 = vmul.f32 %v9064_v13, %v8436_v36  ;;  %10002 = vmatpush3.bf16.msra.mxu0 %v8651_v26  ;;  %v8634_v36 = vld [vmem:[%s13020_s19] sm:$0xff] }
0x21a2   :  { %v8491_v63 = vadd.f32 %v8490_v47, %v8489_v37  ;;  %v8471_v34 = vadd.f32 %v8470_v39, %v8469_v16  ;;  %v8502_v52 = vadd.f32 %v8501_v50, %v8500_v38  ;;  %v8478_v3 = vsel %vm188_vm1, %v8463_v11, 0.0  ;;  %10003 = vmatprep.subr.bf16.mxu0 %v10549_v2  ;;  %v8636_v37 = vld [vmem:[%s13020_s19 + $0x10] sm:$0xff]  ;;  %v8635_v50 = vld [vmem:[%s13020_s19 + $0x8] sm:$0xff]  ;;  %v8723_v16 = vld [vmem:[%s13021_s21 + $0x60] sm:$0xf] }
0x21a3   :  { %v8464_v58 = vadd.f32 %v9065_v30, %v8450_v10  ;;  %v8650_v38 = vpack.c.bf16 %v8639_v7, %v8638_v51  ;;  %v8649_v49 = vpack.c.bf16 %v8637_v48, %v8636_v37  ;;  %v8648_v47 = vpack.c.bf16 %v8635_v50, %v8634_v36  ;;  %v8721_v11 = vld [vmem:[%s13021_s21 + $0x50] sm:$0xff]  ;;  %v8722_v10 = vld [vmem:[%s13021_s21 + $0x58] sm:$0xff] }
0x21a4   :  { %v8492_v56 = vrot.slane %v8491_v63, 2  ;;  %v8503_v12 = vrot.slane %v8502_v52, 1  ;;  %v8472_v25 = vrot.slane %v8471_v34, 4  ;;  %v8731_v39 = vpack.c.bf16 %v8723_v16, %v8723_v16 }
0x21a5   :  { %v8479_v24 = vsel %vm188_vm1, %v8464_v58, 0.0  ;;  %10004 = vmatpush3.bf16.msra.mxu0 %v8650_v38  ;;  %v8720_v58 = vld [vmem:[%s13021_s21 + $0x48] sm:$0xff] }
0x21a6   :  { %v8480_v15 = vadd.f32 %v8479_v24, %v8478_v3  ;;  %v8493_v23 = vadd.f32 %v8492_v56, %v8491_v63  ;;  %v8504_v4 = vadd.f32 %v8503_v12, %v8502_v52  ;;  %v8473_v46 = vadd.f32 %v8472_v25, %v8471_v34  ;;  %10005 = vmatprep.subr.bf16.mxu0 %v10549_v2  ;;  %v8719_v52 = vld [vmem:[%s13021_s21 + $0x40] sm:$0xff]  ;;  %v8717_v12 = vld [vmem:[%s13021_s21 + $0x30] sm:$0xff]  ;;  %v8718_v25 = vld [vmem:[%s13021_s21 + $0x38] sm:$0xff] }
0x21a7   :  { %v8743_v63 = vsel %vm8666_vm6, %v8731_v39, 0  ;;  %v8730_v34 = vpack.c.bf16 %v8722_v10, %v8721_v11  ;;  %v8729_v56 = vpack.c.bf16 %v8720_v58, %v8719_v52  ;;  %v8728_v3 = vpack.c.bf16 %v8718_v25, %v8717_v12  ;;  %v8715_v24 = vld [vmem:[%s13021_s21 + $0x20] sm:$0xff] }
0x21a8   :  { %v8481_v19 = vrot.slane %v8480_v15, 4  ;;  %v8494_v17 = vrot.slane %v8493_v23, 1  ;;  %v8509_v41 = vmul.f32 0.0625, %v8504_v4  ;;  %v8474_v35 = vrot.slane %v8473_v46, 2 }
0x21a9   :  { %10006 = vmatpush3.bf16.msra.mxu0 %v8649_v49 }
0x21aa   :  { %v8495_v40 = vadd.f32 %v8494_v17, %v8493_v23  ;;  %v8475_v13 = vadd.f32 %v8474_v35, %v8473_v46  ;;  %v8482_v29 = vadd.f32 %v8481_v19, %v8480_v15  ;;  %v8523_v20 = vpack.c.bf16 %v8509_v41, %v8509_v41  ;;  %10007 = vmatprep.subr.bf16.mxu0 %v10549_v2  ;;  %v8716_v15 = vld [vmem:[%s13021_s21 + $0x28] sm:$0xff]  ;;  %v9068_v35 = vld [vmem:[%s13022_s18] ss:$0 sm:$0xff] }
0x21ab   :  { %v8727_v23 = vpack.c.bf16 %v8716_v15, %v8715_v24 }
0x21ac   :  { %v8508_v32 = vmul.f32 0.0625, %v8495_v40  ;;  %v8476_v27 = vrot.slane %v8475_v13, 1  ;;  %v8483_v30 = vrot.slane %v8482_v29, 2  ;;  %v8529_v5 = vunpack.c.l.b16 %v8523_v20 }
0x21ad   :  { %10008 = vmatpush3.bf16.msra.mxu0 %v8648_v47 }
0x21ae   :  { %v8522_v55 = vpack.c.bf16 %v8508_v32, %v8508_v32  ;;  %v8477_v61 = vadd.f32 %v8476_v27, %v8475_v13  ;;  %v8484_v21 = vadd.f32 %v8483_v30, %v8482_v29 }
0x21b0   :  { %v8528_v18 = vunpack.c.l.b16 %v8522_v55  ;;  %v8485_v44 = vrot.slane %v8484_v21, 1  ;;  %v8506_v0 = vmul.f32 0.0625, %v8477_v61  ;;  %v8713_v55 = vld [vmem:[%s13021_s21 + $0x10] sm:$0xff]  ;;  %v8714_v61 = vld [vmem:[%s13021_s21 + $0x18] sm:$0xff] }
0x21b2   :  { %v8531_v9 = vsel %vm8530_vm7, %v8529_v5, %v8528_v18  ;;  %v8486_v22 = vadd.f32 %v8485_v44, %v8484_v21  ;;  %v8518_v53 = vpack.c.bf16 %v8506_v0, %v8506_v0  ;;  %v8726_v21 = vpack.c.bf16 %v8714_v61, %v8713_v55  ;;  %v9069_v44 = vld [vmem:[%s13024_s20] ss:$0 sm:$0xff] }
0x21b3   :  { %v8532_v43 = vpack.c.b16 %v8531_v9, %v8531_v9  ;;  %v8725_v18 = vpack.c.bf16 %v8712_v42, %v8711_v28  ;;  %v28_v5 = vstv %s13023_s22 }
0x21b4   :  { %v8507_v60 = vmul.f32 0.0625, %v8486_v22  ;;  %v8578_v54 = vunpack.c.l.b16 %v8518_v53  ;;  %29 = vst [vmem:[#allocation2] sm:$0x1] %v28_v5 }
0x21b5   :  { %9984 = vmatmul.mubr.msk.bf16.vlgmr.msra.gmra.mxu1 %vm188_vm1, %v8532_v43 }
0x21b6   :  { %9988 = vmatpush3.bf16.msra.mxu1 %v8521_v31  ;;  %9991 = vmatprep.mubr.msk.bf16.mxu1 %vm10550_vm5, %v10549_v2  ;;  %v8519_v59 = vpack.c.bf16 %v8507_v60, %v8507_v60 }
0x21b7   :  { %9989 = vmatprep.subr.bf16.mxu1 %v10549_v2 }
0x21b8   :  { %v8579_v8 = vunpack.c.l.b16 %v8519_v59 }
0x21ba   :  { %9990 = vmatpush3.bf16.msra.mxu1 %v8520_v45  ;;  %v8580_v62 = vsel %vm8530_vm7, %v8579_v8, %v8578_v54 }
0x21bb   :  { %v8581_v14 = vpack.c.b16 %v8580_v62, %v8580_v62  ;;  %10013 = vmatprep.subr.bf16.mxu1 %v10549_v2  ;;  %v9071_v6 = vld [vmem:[#allocation2] ss:$0 sm:$0xff] }
0x21bd   :  { %9992 = vmatmul.mubr.msk.bf16.vlgmr.msra.gmra.mxu1 %vm188_vm1, %v8581_v14 }
0x21be   :  { %10027 = vmatprep.mubr.msk.bf16.mxu1 %vm10550_vm5, %v10549_v2  ;;  %10014 = vmatpush3.bf16.msra.mxu1 %v8743_v63 }
0x21bf   :  { %10015 = vmatprep.subr.bf16.mxu1 %v10549_v2 }
0x21c2   :  { %10016 = vmatpush3.bf16.msra.mxu1 %v8730_v34 }
0x21c3   :  { %10017 = vmatprep.subr.bf16.mxu1 %v10549_v2 }
0x21c6   :  { %10018 = vmatpush3.bf16.msra.mxu1 %v8729_v56 }
0x21c7   :  { %10019 = vmatprep.subr.bf16.mxu1 %v10549_v2 }
0x21ca   :  { %10020 = vmatpush3.bf16.msra.mxu1 %v8728_v3 }
0x21cb   :  { %10021 = vmatprep.subr.bf16.mxu1 %v10549_v2 }
0x21ce   :  { %10022 = vmatpush3.bf16.msra.mxu1 %v8727_v23 }
0x21cf   :  { %10023 = vmatprep.subr.bf16.mxu1 %v10549_v2 }
0x21d2   :  { %10024 = vmatpush3.bf16.msra.mxu1 %v8726_v21 }
0x21d3   :  { %10025 = vmatprep.subr.bf16.mxu1 %v10549_v2 }
0x21d6   :  { %10026 = vmatpush3.bf16.msra.mxu1 %v8725_v18 }
0x2275   :  { %v8570_v4 = vpop.f32.mrf.mxu1 }
0x2277   :  { %v9985_v46 = vpop.f32.mrf.mxu1 }
0x2279   :  { %v8573_v19 = vpop.f32.mrf.mxu1 }
0x227b   :  { %v9986_v17 = vpop.f32.mrf.mxu1 }
0x227d   :  { %v8619_v41 = vpop.f32.mrf.mxu1 }
0x227e   :  { %v8620_v40 = vadd.f32 %v8619_v41, %v8570_v4 }
0x227f   :  { %v9993_v13 = vpop.f32.mrf.mxu1 }
0x2280   :  { %v8632_v29 = vadd.f32 %v9068_v35, %v8620_v40 }
0x2281   :  { %v8622_v32 = vpop.f32.mrf.mxu1 }
0x2282   :  { %v8633_v20 = vmax.f32 %v8632_v29, 0.0 }
0x2283   :  { %v9994_v27 = vpop.f32.mrf.mxu1 }
0x2284   :  { %v8647_v30 = vpack.c.bf16 %v8633_v20, %v8633_v20 }
0x2286   :  { %10010 = vmatmul.mubr.msk.bf16.vlgmr.msra.gmra.mxu0 %vm8662_vm8, %v8647_v30 }
0x2346   :  { %v8704_v2 = vpop.f32.mrf.mxu0 }
0x2347   :  { %v8705_v0 = vadd.f32 %v9069_v44, %v8704_v2 }
0x2348   :  { %v10011_v9 = vpop.f32.mrf.mxu0 }
0x2349   :  { %v8710_v31 = vmax.f32 %v8705_v0, 0.0 }
0x234a   :  { %v8707_v22 = vpop.f32.mrf.mxu0 }
0x234b   :  { %v8724_v43 = vpack.c.bf16 %v8710_v31, %v8710_v31 }
0x234c   :  { %v10012_v33 = vpop.f32.mrf.mxu0 }
0x234d   :  { %10028 = vmatmul.mubr.msk.bf16.vlgmr.msra.gmra.mxu1 %vm8662_vm8, %v8724_v43 }
0x240d   :  { %v8779_v60 = vpop.f32.mrf.mxu1 }
0x240e   :  { %v8780_v53 = vadd.f32 %v9071_v6, %v8779_v60 }
0x240f   :  { %v10029_v45 = vpop.f32.mrf.mxu1 }
0x2410   :  { %8786 = vst.msk [vmem:[%s13025_s23] sm:$0x3] %vm8785_vm9, %v8780_v53 }
0x2411   :  { %v8782_v59 = vpop.f32.mrf.mxu1 }
0x2413   :  { %v10030_v54 = vpop.f32.mrf.mxu1 }

</bundles_post_ra>
